<compile_context>
chip_gen: v5e
topology: v5e:2x2
jax: 0.10.0
libtpu: 0.0.40
codegen_flags: <defaults>
</compile_context>

<pallas_src>
import jax
import jax.numpy as jnp
from jax.experimental import pallas as pl
from jax.experimental.pallas import tpu as pltpu

NEG_SLOPE = 0.01   # F.leaky_relu default negative_slope
PAD = 8            # lane margin so shifted-window slices never run off the end


# ------------------------------ fused kernel ------------------------------ #
def _make_encoder_kernel(H, W):
    """Build the fused 4-layer kernel for an H x W input (static shapes)."""
    h_out = [H - 2 * (l + 1) for l in range(4)]      # 14, 12, 10, 8 for H=16

    def conv3x3_lrelu(x_sref, w_ref, b_ref, h):
        """out(Co, h*W) = leaky_relu(sum_taps w_tap @ x[:, off:off+h*W] + b).

        x_sref : (Ci, >= (h+2)*W + 2) activation ref, row stride W (chan-major)
        w_ref  : (9, Co, Ci) conv taps, t = kh*3 + kw
        b_ref  : (Co, 1)
        Only output columns xo < (valid width) are meaningful; the remaining
        "wrap" columns are garbage that later layers never read for *their*
        valid outputs, and the wrapper slices them off at the end.
        """
        L = h * W
        Co = w_ref.shape[1]
        acc = jnp.zeros((Co, L), jnp.float32)
        for dy in range(3):
            for dx in range(3):
                t = dy * 3 + dx
                off = dy * W + dx
                acc = acc + jnp.dot(
                    w_ref[t], x_sref[:, pl.ds(off, L)],
                    preferred_element_type=jnp.float32)
        acc = acc + b_ref[...]                        # (Co,1) lane-broadcast
        return jnp.where(acc >= 0, acc, NEG_SLOPE * acc)

    def kernel(x_ref, w1, b1, w2, b2, w3, b3, w4, b4, o_ref, a0, a1, a2, a3):
        # Zero scratch (keeps the +PAD tails deterministic), stage the image.
        a0[...] = jnp.zeros_like(a0)
        a1[...] = jnp.zeros_like(a1)
        a2[...] = jnp.zeros_like(a2)
        a3[...] = jnp.zeros_like(a3)
        a0[:, pl.ds(0, H * W)] = x_ref[...].astype(jnp.float32)

        a1[:, pl.ds(0, h_out[0] * W)] = conv3x3_lrelu(a0, w1, b1, h_out[0])
        a2[:, pl.ds(0, h_out[1] * W)] = conv3x3_lrelu(a1, w2, b2, h_out[1])
        a3[:, pl.ds(0, h_out[2] * W)] = conv3x3_lrelu(a2, w3, b3, h_out[2])
        o_ref[...] = conv3x3_lrelu(a3, w4, b4, h_out[3]).astype(o_ref.dtype)

    return kernel, h_out


# ------------------------------ full Encoder ------------------------------ #
def encoder_forward(x_nchw, params):
    """Matches Encoder.forward: 4x (valid 3x3 conv + leaky_relu). NCHW in/out."""
    N, C0, H, W = x_nchw.shape
    kernel, h_out = _make_encoder_kernel(H, W)
    chans = (C0,) + tuple(w.shape[0] for (w, _) in params)   # (3, 8, 16, 32, 64)
    C_out = chans[-1]
    L_out = h_out[-1] * W                                    # 8 * 16 = 128

    # NCHW is already channel-major: just flatten spatial, no transposes.
    x_flat = x_nchw.reshape(N, C0, H * W)

    # Prepack weights (Co, Ci, 3, 3) -> (9, Co, Ci) with tap t = kh*3 + kw;
    # biases -> (Co, 1) for lane broadcast.  Tiny, done once.
    packed = []
    for (w, b) in params:
        co, ci = w.shape[0], w.shape[1]
        packed.append(jnp.transpose(w, (2, 3, 0, 1)).reshape(9, co, ci))
        packed.append(b.reshape(co, 1))

    in_specs = [pl.BlockSpec((None, C0, H * W), lambda i: (i, 0, 0))]
    for arr in packed:
        in_specs.append(
            pl.BlockSpec(arr.shape, lambda i, _nd=arr.ndim: (0,) * _nd))

    scratch = [
        pltpu.VMEM((chans[0], H * W + PAD), jnp.float32),
        pltpu.VMEM((chans[1], h_out[0] * W + PAD), jnp.float32),
        pltpu.VMEM((chans[2], h_out[1] * W + PAD), jnp.float32),
        pltpu.VMEM((chans[3], h_out[2] * W + PAD), jnp.float32),
    ]

    flops = 0
    bytes_accessed = x_flat.size * 4 + N * C_out * L_out * 4
    for l, (w, b) in enumerate(params):
        co, ci = w.shape[0], w.shape[1]
        flops += 2 * N * 9 * ci * co * h_out[l] * W
        bytes_accessed += (w.size + b.size) * 4

    out = pl.pallas_call(
        kernel,
        out_shape=jax.ShapeDtypeStruct((N, C_out, L_out), jnp.float32),
        grid_spec=pltpu.PrefetchScalarGridSpec(
            num_scalar_prefetch=0,
            grid=(N,),
            in_specs=in_specs,
            out_specs=pl.BlockSpec((None, C_out, L_out), lambda i: (i, 0, 0)),
            scratch_shapes=scratch,
        ),
        compiler_params=pltpu.CompilerParams(
            dimension_semantics=("parallel",)),
        cost_estimate=pl.CostEstimate(
            flops=int(flops), transcendentals=0,
            bytes_accessed=int(bytes_accessed)),
    )(x_flat, *packed)

    # (N, C, h_out*W) with row stride W -> keep valid columns -> NCHW.
    return out.reshape(N, C_out, h_out[-1], W)[:, :, :, :W - 8]


# ------------------------------- params init ------------------------------ #
def init_encoder_params(key, inc=3):
    """Deterministic init matching the Conv2d shapes of the torch module."""
    specs = [(inc, 8), (8, 16), (16, 32), (32, 64)]
    params = []
    for (ci, co) in specs:
        key, kw, kb = jax.random.split(key, 3)
        bound = 1.0 / jnp.sqrt(ci * 9.0)
        w = jax.random.uniform(kw, (co, ci, 3, 3), jnp.float32, -bound, bound)
        b = jax.random.uniform(kb, (co,), jnp.float32, -bound, bound)
        params.append((w, b))
    return params


# ------------------------------- reference -------------------------------- #
def encoder_reference(x_nchw, params):
    x = x_nchw
    for (w, b) in params:
        x = jax.lax.conv_general_dilated(
            x, w, window_strides=(1, 1), padding='VALID',
            dimension_numbers=('NCHW', 'OIHW', 'NCHW'))
        x = x + b.reshape(1, -1, 1, 1)
        x = jnp.where(x >= 0, x, NEG_SLOPE * x)
    return x


if __name__ == "__main__":
    key = jax.random.PRNGKey(0)
    key, kx = jax.random.split(key)

    # N=2, C=3 (module default inc=3), 16x16 spatial
    x = jax.random.normal(kx, (2, 3, 16, 16), jnp.float32)
    params = init_encoder_params(key, inc=3)

    fwd = jax.jit(encoder_forward)
    out = jax.block_until_ready(fwd(x, params))
    assert out.shape == (2, 64, 8, 8), out.shape

    ref = jax.block_until_ready(encoder_reference(x, params))
    assert jnp.allclose(out, ref, atol=1e-4, rtol=1e-4), (
        float(jnp.max(jnp.abs(out - ref))))

    print("KERNEL_OK")
</pallas_src>

<mosaic_0001>
module attributes {stable_mosaic.version = 11 : i64} {
  func.func @kernel(%arg0: i32, %arg1: memref<1x3x256xf32, #tpu.memory_space<vmem>>, %arg2: memref<9x8x3xf32, #tpu.memory_space<vmem>>, %arg3: memref<8x1xf32, #tpu.memory_space<vmem>>, %arg4: memref<9x16x8xf32, #tpu.memory_space<vmem>>, %arg5: memref<16x1xf32, #tpu.memory_space<vmem>>, %arg6: memref<9x32x16xf32, #tpu.memory_space<vmem>>, %arg7: memref<32x1xf32, #tpu.memory_space<vmem>>, %arg8: memref<9x64x32xf32, #tpu.memory_space<vmem>>, %arg9: memref<64x1xf32, #tpu.memory_space<vmem>>, %arg10: memref<1x64x128xf32, #tpu.memory_space<vmem>>, %arg11: memref<3x264xf32, #tpu.memory_space<vmem>>, %arg12: memref<8x232xf32, #tpu.memory_space<vmem>>, %arg13: memref<16x200xf32, #tpu.memory_space<vmem>>, %arg14: memref<32x168xf32, #tpu.memory_space<vmem>>) attributes {dimension_semantics = [#tpu.dimension_semantics<parallel>], iteration_bounds = array<i64: 2>, scalar_prefetch = 0 : i64, scratch_operands = 4 : i64, tpu.core_type = #tpu.core_type<tc>, window_params = [{transform_indices = @transform_0, window_bounds = array<i64: 1, 3, 256>}, {pipeline_mode = #tpu.pipeline_mode<synchronous>, transform_indices = @transform_1, window_bounds = array<i64: 9, 8, 3>}, {pipeline_mode = #tpu.pipeline_mode<synchronous>, transform_indices = @transform_2, window_bounds = array<i64: 8, 1>}, {pipeline_mode = #tpu.pipeline_mode<synchronous>, transform_indices = @transform_3, window_bounds = array<i64: 9, 16, 8>}, {pipeline_mode = #tpu.pipeline_mode<synchronous>, transform_indices = @transform_4, window_bounds = array<i64: 16, 1>}, {pipeline_mode = #tpu.pipeline_mode<synchronous>, transform_indices = @transform_5, window_bounds = array<i64: 9, 32, 16>}, {pipeline_mode = #tpu.pipeline_mode<synchronous>, transform_indices = @transform_6, window_bounds = array<i64: 32, 1>}, {pipeline_mode = #tpu.pipeline_mode<synchronous>, transform_indices = @transform_7, window_bounds = array<i64: 9, 64, 32>}, {pipeline_mode = #tpu.pipeline_mode<synchronous>, transform_indices = @transform_8, window_bounds = array<i64: 64, 1>}, {transform_indices = @transform_9, window_bounds = array<i64: 1, 64, 128>}]} {
    %cst = arith.constant 0.000000e+00 : f32
    %0 = vector.broadcast %cst : f32 to vector<3x264xf32>
    %c0 = arith.constant 0 : index
    %c0_0 = arith.constant 0 : index
    %1 = vector.load %arg11[%c0, %c0_0] : memref<3x264xf32, #tpu.memory_space<vmem>>, vector<3x264xf32>
    tpu.vector_store %arg11[%c0, %c0_0], %0 {strides = array<i32>} : memref<3x264xf32, #tpu.memory_space<vmem>>, vector<3x264xf32>,
    %cst_1 = arith.constant 0.000000e+00 : f32
    %2 = vector.broadcast %cst_1 : f32 to vector<8x232xf32>
    %c0_2 = arith.constant 0 : index
    %c0_3 = arith.constant 0 : index
    %3 = vector.load %arg12[%c0_2, %c0_3] : memref<8x232xf32, #tpu.memory_space<vmem>>, vector<8x232xf32>
    tpu.vector_store %arg12[%c0_2, %c0_3], %2 {strides = array<i32>} : memref<8x232xf32, #tpu.memory_space<vmem>>, vector<8x232xf32>,
    %cst_4 = arith.constant 0.000000e+00 : f32
    %4 = vector.broadcast %cst_4 : f32 to vector<16x200xf32>
    %c0_5 = arith.constant 0 : index
    %c0_6 = arith.constant 0 : index
    %5 = vector.load %arg13[%c0_5, %c0_6] : memref<16x200xf32, #tpu.memory_space<vmem>>, vector<16x200xf32>
    tpu.vector_store %arg13[%c0_5, %c0_6], %4 {strides = array<i32>} : memref<16x200xf32, #tpu.memory_space<vmem>>, vector<16x200xf32>,
    %cst_7 = arith.constant 0.000000e+00 : f32
    %6 = vector.broadcast %cst_7 : f32 to vector<32x168xf32>
    %c0_8 = arith.constant 0 : index
    %c0_9 = arith.constant 0 : index
    %7 = vector.load %arg14[%c0_8, %c0_9] : memref<32x168xf32, #tpu.memory_space<vmem>>, vector<32x168xf32>
    tpu.vector_store %arg14[%c0_8, %c0_9], %6 {strides = array<i32>} : memref<32x168xf32, #tpu.memory_space<vmem>>, vector<32x168xf32>,
    %c0_10 = arith.constant 0 : index
    %c0_11 = arith.constant 0 : index
    %c0_12 = arith.constant 0 : index
    %8 = vector.load %arg1[%c0_10, %c0_11, %c0_12] : memref<1x3x256xf32, #tpu.memory_space<vmem>>, vector<1x3x256xf32>
    %9 = vector.shape_cast %8 : vector<1x3x256xf32> to vector<3x256xf32>
    %c0_13 = arith.constant 0 : index
    %c0_14 = arith.constant 0 : index
    %10 = vector.load %arg11[%c0_13, %c0_14] : memref<3x264xf32, #tpu.memory_space<vmem>>, vector<3x256xf32>
    tpu.vector_store %arg11[%c0_13, %c0_14], %9 {strides = array<i32>} : memref<3x264xf32, #tpu.memory_space<vmem>>, vector<3x256xf32>,
    %cst_15 = arith.constant 0.000000e+00 : f32
    %11 = vector.broadcast %cst_15 : f32 to vector<8x224xf32>
    %c0_16 = arith.constant 0 : index
    %c0_17 = arith.constant 0 : index
    %c0_18 = arith.constant 0 : index
    %12 = vector.load %arg2[%c0_16, %c0_17, %c0_18] : memref<9x8x3xf32, #tpu.memory_space<vmem>>, vector<1x8x3xf32>
    %13 = vector.shape_cast %12 : vector<1x8x3xf32> to vector<8x3xf32>
    %c0_19 = arith.constant 0 : index
    %c0_20 = arith.constant 0 : index
    %14 = vector.load %arg11[%c0_19, %c0_20] : memref<3x264xf32, #tpu.memory_space<vmem>>, vector<3x224xf32>
    %cst_21 = arith.constant dense<0.000000e+00> : vector<8x224xf32>
    %15 = tpu.matmul %13, %14, %cst_21 {dimension_numbers = #tpu.dot_dimension_numbers<[1], [0], [0], [1], [0, 0, 1, 1], [], []>} : vector<8x3xf32>, vector<3x224xf32>, vector<8x224xf32> -> vector<8x224xf32>
    %16 = arith.addf %11, %15 : vector<8x224xf32>
    %c1 = arith.constant 1 : index
    %c0_22 = arith.constant 0 : index
    %c0_23 = arith.constant 0 : index
    %17 = vector.load %arg2[%c1, %c0_22, %c0_23] : memref<9x8x3xf32, #tpu.memory_space<vmem>>, vector<1x8x3xf32>
    %18 = vector.shape_cast %17 : vector<1x8x3xf32> to vector<8x3xf32>
    %c0_24 = arith.constant 0 : index
    %c1_25 = arith.constant 1 : index
    %19 = vector.load %arg11[%c0_24, %c1_25] : memref<3x264xf32, #tpu.memory_space<vmem>>, vector<3x224xf32>
    %cst_26 = arith.constant dense<0.000000e+00> : vector<8x224xf32>
    %20 = tpu.matmul %18, %19, %cst_26 {dimension_numbers = #tpu.dot_dimension_numbers<[1], [0], [0], [1], [0, 0, 1, 1], [], []>} : vector<8x3xf32>, vector<3x224xf32>, vector<8x224xf32> -> vector<8x224xf32>
    %21 = arith.addf %16, %20 : vector<8x224xf32>
    %c2 = arith.constant 2 : index
    %c0_27 = arith.constant 0 : index
    %c0_28 = arith.constant 0 : index
    %22 = vector.load %arg2[%c2, %c0_27, %c0_28] : memref<9x8x3xf32, #tpu.memory_space<vmem>>, vector<1x8x3xf32>
    %23 = vector.shape_cast %22 : vector<1x8x3xf32> to vector<8x3xf32>
    %c0_29 = arith.constant 0 : index
    %c2_30 = arith.constant 2 : index
    %24 = vector.load %arg11[%c0_29, %c2_30] : memref<3x264xf32, #tpu.memory_space<vmem>>, vector<3x224xf32>
    %cst_31 = arith.constant dense<0.000000e+00> : vector<8x224xf32>
    %25 = tpu.matmul %23, %24, %cst_31 {dimension_numbers = #tpu.dot_dimension_numbers<[1], [0], [0], [1], [0, 0, 1, 1], [], []>} : vector<8x3xf32>, vector<3x224xf32>, vector<8x224xf32> -> vector<8x224xf32>
    %26 = arith.addf %21, %25 : vector<8x224xf32>
    %c3 = arith.constant 3 : index
    %c0_32 = arith.constant 0 : index
    %c0_33 = arith.constant 0 : index
    %27 = vector.load %arg2[%c3, %c0_32, %c0_33] : memref<9x8x3xf32, #tpu.memory_space<vmem>>, vector<1x8x3xf32>
    %28 = vector.shape_cast %27 : vector<1x8x3xf32> to vector<8x3xf32>
    %c0_34 = arith.constant 0 : index
    %c16 = arith.constant 16 : index
    %29 = vector.load %arg11[%c0_34, %c16] : memref<3x264xf32, #tpu.memory_space<vmem>>, vector<3x224xf32>
    %cst_35 = arith.constant dense<0.000000e+00> : vector<8x224xf32>
    %30 = tpu.matmul %28, %29, %cst_35 {dimension_numbers = #tpu.dot_dimension_numbers<[1], [0], [0], [1], [0, 0, 1, 1], [], []>} : vector<8x3xf32>, vector<3x224xf32>, vector<8x224xf32> -> vector<8x224xf32>
    %31 = arith.addf %26, %30 : vector<8x224xf32>
    %c4 = arith.constant 4 : index
    %c0_36 = arith.constant 0 : index
    %c0_37 = arith.constant 0 : index
    %32 = vector.load %arg2[%c4, %c0_36, %c0_37] : memref<9x8x3xf32, #tpu.memory_space<vmem>>, vector<1x8x3xf32>
    %33 = vector.shape_cast %32 : vector<1x8x3xf32> to vector<8x3xf32>
    %c0_38 = arith.constant 0 : index
    %c17 = arith.constant 17 : index
    %34 = vector.load %arg11[%c0_38, %c17] : memref<3x264xf32, #tpu.memory_space<vmem>>, vector<3x224xf32>
    %cst_39 = arith.constant dense<0.000000e+00> : vector<8x224xf32>
    %35 = tpu.matmul %33, %34, %cst_39 {dimension_numbers = #tpu.dot_dimension_numbers<[1], [0], [0], [1], [0, 0, 1, 1], [], []>} : vector<8x3xf32>, vector<3x224xf32>, vector<8x224xf32> -> vector<8x224xf32>
    %36 = arith.addf %31, %35 : vector<8x224xf32>
    %c5 = arith.constant 5 : index
    %c0_40 = arith.constant 0 : index
    %c0_41 = arith.constant 0 : index
    %37 = vector.load %arg2[%c5, %c0_40, %c0_41] : memref<9x8x3xf32, #tpu.memory_space<vmem>>, vector<1x8x3xf32>
    %38 = vector.shape_cast %37 : vector<1x8x3xf32> to vector<8x3xf32>
    %c0_42 = arith.constant 0 : index
    %c18 = arith.constant 18 : index
    %39 = vector.load %arg11[%c0_42, %c18] : memref<3x264xf32, #tpu.memory_space<vmem>>, vector<3x224xf32>
    %cst_43 = arith.constant dense<0.000000e+00> : vector<8x224xf32>
    %40 = tpu.matmul %38, %39, %cst_43 {dimension_numbers = #tpu.dot_dimension_numbers<[1], [0], [0], [1], [0, 0, 1, 1], [], []>} : vector<8x3xf32>, vector<3x224xf32>, vector<8x224xf32> -> vector<8x224xf32>
    %41 = arith.addf %36, %40 : vector<8x224xf32>
    %c6 = arith.constant 6 : index
    %c0_44 = arith.constant 0 : index
    %c0_45 = arith.constant 0 : index
    %42 = vector.load %arg2[%c6, %c0_44, %c0_45] : memref<9x8x3xf32, #tpu.memory_space<vmem>>, vector<1x8x3xf32>
    %43 = vector.shape_cast %42 : vector<1x8x3xf32> to vector<8x3xf32>
    %c0_46 = arith.constant 0 : index
    %c32 = arith.constant 32 : index
    %44 = vector.load %arg11[%c0_46, %c32] : memref<3x264xf32, #tpu.memory_space<vmem>>, vector<3x224xf32>
    %cst_47 = arith.constant dense<0.000000e+00> : vector<8x224xf32>
    %45 = tpu.matmul %43, %44, %cst_47 {dimension_numbers = #tpu.dot_dimension_numbers<[1], [0], [0], [1], [0, 0, 1, 1], [], []>} : vector<8x3xf32>, vector<3x224xf32>, vector<8x224xf32> -> vector<8x224xf32>
    %46 = arith.addf %41, %45 : vector<8x224xf32>
    %c7 = arith.constant 7 : index
    %c0_48 = arith.constant 0 : index
    %c0_49 = arith.constant 0 : index
    %47 = vector.load %arg2[%c7, %c0_48, %c0_49] : memref<9x8x3xf32, #tpu.memory_space<vmem>>, vector<1x8x3xf32>
    %48 = vector.shape_cast %47 : vector<1x8x3xf32> to vector<8x3xf32>
    %c0_50 = arith.constant 0 : index
    %c33 = arith.constant 33 : index
    %49 = vector.load %arg11[%c0_50, %c33] : memref<3x264xf32, #tpu.memory_space<vmem>>, vector<3x224xf32>
    %cst_51 = arith.constant dense<0.000000e+00> : vector<8x224xf32>
    %50 = tpu.matmul %48, %49, %cst_51 {dimension_numbers = #tpu.dot_dimension_numbers<[1], [0], [0], [1], [0, 0, 1, 1], [], []>} : vector<8x3xf32>, vector<3x224xf32>, vector<8x224xf32> -> vector<8x224xf32>
    %51 = arith.addf %46, %50 : vector<8x224xf32>
    %c8 = arith.constant 8 : index
    %c0_52 = arith.constant 0 : index
    %c0_53 = arith.constant 0 : index
    %52 = vector.load %arg2[%c8, %c0_52, %c0_53] : memref<9x8x3xf32, #tpu.memory_space<vmem>>, vector<1x8x3xf32>
    %53 = vector.shape_cast %52 : vector<1x8x3xf32> to vector<8x3xf32>
    %c0_54 = arith.constant 0 : index
    %c34 = arith.constant 34 : index
    %54 = vector.load %arg11[%c0_54, %c34] : memref<3x264xf32, #tpu.memory_space<vmem>>, vector<3x224xf32>
    %cst_55 = arith.constant dense<0.000000e+00> : vector<8x224xf32>
    %55 = tpu.matmul %53, %54, %cst_55 {dimension_numbers = #tpu.dot_dimension_numbers<[1], [0], [0], [1], [0, 0, 1, 1], [], []>} : vector<8x3xf32>, vector<3x224xf32>, vector<8x224xf32> -> vector<8x224xf32>
    %56 = arith.addf %51, %55 : vector<8x224xf32>
    %c0_56 = arith.constant 0 : index
    %c0_57 = arith.constant 0 : index
    %57 = vector.load %arg3[%c0_56, %c0_57] : memref<8x1xf32, #tpu.memory_space<vmem>>, vector<8x1xf32>
    %58 = vector.broadcast %57 : vector<8x1xf32> to vector<8x224xf32>
    %59 = arith.addf %56, %58 : vector<8x224xf32>
    %cst_58 = arith.constant 0.000000e+00 : f32
    %60 = vector.broadcast %cst_58 : f32 to vector<8x224xf32>
    %61 = arith.cmpf oge, %59, %60 : vector<8x224xf32>
    %cst_59 = arith.constant 0.00999999977 : f32
    %62 = vector.broadcast %cst_59 : f32 to vector<8x224xf32>
    %63 = arith.mulf %62, %59 : vector<8x224xf32>
    %64 = arith.select %61, %59, %63 : vector<8x224xi1>, vector<8x224xf32>
    %c0_60 = arith.constant 0 : index
    %c0_61 = arith.constant 0 : index
    %65 = vector.load %arg12[%c0_60, %c0_61] : memref<8x232xf32, #tpu.memory_space<vmem>>, vector<8x224xf32>
    tpu.vector_store %arg12[%c0_60, %c0_61], %64 {strides = array<i32>} : memref<8x232xf32, #tpu.memory_space<vmem>>, vector<8x224xf32>,
    %cst_62 = arith.constant 0.000000e+00 : f32
    %66 = vector.broadcast %cst_62 : f32 to vector<16x192xf32>
    %c0_63 = arith.constant 0 : index
    %c0_64 = arith.constant 0 : index
    %c0_65 = arith.constant 0 : index
    %67 = vector.load %arg4[%c0_63, %c0_64, %c0_65] : memref<9x16x8xf32, #tpu.memory_space<vmem>>, vector<1x16x8xf32>
    %68 = vector.shape_cast %67 : vector<1x16x8xf32> to vector<16x8xf32>
    %c0_66 = arith.constant 0 : index
    %c0_67 = arith.constant 0 : index
    %69 = vector.load %arg12[%c0_66, %c0_67] : memref<8x232xf32, #tpu.memory_space<vmem>>, vector<8x192xf32>
    %cst_68 = arith.constant dense<0.000000e+00> : vector<16x192xf32>
    %70 = tpu.matmul %68, %69, %cst_68 {dimension_numbers = #tpu.dot_dimension_numbers<[1], [0], [0], [1], [0, 0, 1, 1], [], []>} : vector<16x8xf32>, vector<8x192xf32>, vector<16x192xf32> -> vector<16x192xf32>
    %71 = arith.addf %66, %70 : vector<16x192xf32>
    %c1_69 = arith.constant 1 : index
    %c0_70 = arith.constant 0 : index
    %c0_71 = arith.constant 0 : index
    %72 = vector.load %arg4[%c1_69, %c0_70, %c0_71] : memref<9x16x8xf32, #tpu.memory_space<vmem>>, vector<1x16x8xf32>
    %73 = vector.shape_cast %72 : vector<1x16x8xf32> to vector<16x8xf32>
    %c0_72 = arith.constant 0 : index
    %c1_73 = arith.constant 1 : index
    %74 = vector.load %arg12[%c0_72, %c1_73] : memref<8x232xf32, #tpu.memory_space<vmem>>, vector<8x192xf32>
    %cst_74 = arith.constant dense<0.000000e+00> : vector<16x192xf32>
    %75 = tpu.matmul %73, %74, %cst_74 {dimension_numbers = #tpu.dot_dimension_numbers<[1], [0], [0], [1], [0, 0, 1, 1], [], []>} : vector<16x8xf32>, vector<8x192xf32>, vector<16x192xf32> -> vector<16x192xf32>
    %76 = arith.addf %71, %75 : vector<16x192xf32>
    %c2_75 = arith.constant 2 : index
    %c0_76 = arith.constant 0 : index
    %c0_77 = arith.constant 0 : index
    %77 = vector.load %arg4[%c2_75, %c0_76, %c0_77] : memref<9x16x8xf32, #tpu.memory_space<vmem>>, vector<1x16x8xf32>
    %78 = vector.shape_cast %77 : vector<1x16x8xf32> to vector<16x8xf32>
    %c0_78 = arith.constant 0 : index
    %c2_79 = arith.constant 2 : index
    %79 = vector.load %arg12[%c0_78, %c2_79] : memref<8x232xf32, #tpu.memory_space<vmem>>, vector<8x192xf32>
    %cst_80 = arith.constant dense<0.000000e+00> : vector<16x192xf32>
    %80 = tpu.matmul %78, %79, %cst_80 {dimension_numbers = #tpu.dot_dimension_numbers<[1], [0], [0], [1], [0, 0, 1, 1], [], []>} : vector<16x8xf32>, vector<8x192xf32>, vector<16x192xf32> -> vector<16x192xf32>
    %81 = arith.addf %76, %80 : vector<16x192xf32>
    %c3_81 = arith.constant 3 : index
    %c0_82 = arith.constant 0 : index
    %c0_83 = arith.constant 0 : index
    %82 = vector.load %arg4[%c3_81, %c0_82, %c0_83] : memref<9x16x8xf32, #tpu.memory_space<vmem>>, vector<1x16x8xf32>
    %83 = vector.shape_cast %82 : vector<1x16x8xf32> to vector<16x8xf32>
    %c0_84 = arith.constant 0 : index
    %c16_85 = arith.constant 16 : index
    %84 = vector.load %arg12[%c0_84, %c16_85] : memref<8x232xf32, #tpu.memory_space<vmem>>, vector<8x192xf32>
    %cst_86 = arith.constant dense<0.000000e+00> : vector<16x192xf32>
    %85 = tpu.matmul %83, %84, %cst_86 {dimension_numbers = #tpu.dot_dimension_numbers<[1], [0], [0], [1], [0, 0, 1, 1], [], []>} : vector<16x8xf32>, vector<8x192xf32>, vector<16x192xf32> -> vector<16x192xf32>
    %86 = arith.addf %81, %85 : vector<16x192xf32>
    %c4_87 = arith.constant 4 : index
    %c0_88 = arith.constant 0 : index
    %c0_89 = arith.constant 0 : index
    %87 = vector.load %arg4[%c4_87, %c0_88, %c0_89] : memref<9x16x8xf32, #tpu.memory_space<vmem>>, vector<1x16x8xf32>
    %88 = vector.shape_cast %87 : vector<1x16x8xf32> to vector<16x8xf32>
    %c0_90 = arith.constant 0 : index
    %c17_91 = arith.constant 17 : index
    %89 = vector.load %arg12[%c0_90, %c17_91] : memref<8x232xf32, #tpu.memory_space<vmem>>, vector<8x192xf32>
    %cst_92 = arith.constant dense<0.000000e+00> : vector<16x192xf32>
    %90 = tpu.matmul %88, %89, %cst_92 {dimension_numbers = #tpu.dot_dimension_numbers<[1], [0], [0], [1], [0, 0, 1, 1], [], []>} : vector<16x8xf32>, vector<8x192xf32>, vector<16x192xf32> -> vector<16x192xf32>
    %91 = arith.addf %86, %90 : vector<16x192xf32>
    %c5_93 = arith.constant 5 : index
    %c0_94 = arith.constant 0 : index
    %c0_95 = arith.constant 0 : index
    %92 = vector.load %arg4[%c5_93, %c0_94, %c0_95] : memref<9x16x8xf32, #tpu.memory_space<vmem>>, vector<1x16x8xf32>
    %93 = vector.shape_cast %92 : vector<1x16x8xf32> to vector<16x8xf32>
    %c0_96 = arith.constant 0 : index
    %c18_97 = arith.constant 18 : index
    %94 = vector.load %arg12[%c0_96, %c18_97] : memref<8x232xf32, #tpu.memory_space<vmem>>, vector<8x192xf32>
    %cst_98 = arith.constant dense<0.000000e+00> : vector<16x192xf32>
    %95 = tpu.matmul %93, %94, %cst_98 {dimension_numbers = #tpu.dot_dimension_numbers<[1], [0], [0], [1], [0, 0, 1, 1], [], []>} : vector<16x8xf32>, vector<8x192xf32>, vector<16x192xf32> -> vector<16x192xf32>
    %96 = arith.addf %91, %95 : vector<16x192xf32>
    %c6_99 = arith.constant 6 : index
    %c0_100 = arith.constant 0 : index
    %c0_101 = arith.constant 0 : index
    %97 = vector.load %arg4[%c6_99, %c0_100, %c0_101] : memref<9x16x8xf32, #tpu.memory_space<vmem>>, vector<1x16x8xf32>
    %98 = vector.shape_cast %97 : vector<1x16x8xf32> to vector<16x8xf32>
    %c0_102 = arith.constant 0 : index
    %c32_103 = arith.constant 32 : index
    %99 = vector.load %arg12[%c0_102, %c32_103] : memref<8x232xf32, #tpu.memory_space<vmem>>, vector<8x192xf32>
    %cst_104 = arith.constant dense<0.000000e+00> : vector<16x192xf32>
    %100 = tpu.matmul %98, %99, %cst_104 {dimension_numbers = #tpu.dot_dimension_numbers<[1], [0], [0], [1], [0, 0, 1, 1], [], []>} : vector<16x8xf32>, vector<8x192xf32>, vector<16x192xf32> -> vector<16x192xf32>
    %101 = arith.addf %96, %100 : vector<16x192xf32>
    %c7_105 = arith.constant 7 : index
    %c0_106 = arith.constant 0 : index
    %c0_107 = arith.constant 0 : index
    %102 = vector.load %arg4[%c7_105, %c0_106, %c0_107] : memref<9x16x8xf32, #tpu.memory_space<vmem>>, vector<1x16x8xf32>
    %103 = vector.shape_cast %102 : vector<1x16x8xf32> to vector<16x8xf32>
    %c0_108 = arith.constant 0 : index
    %c33_109 = arith.constant 33 : index
    %104 = vector.load %arg12[%c0_108, %c33_109] : memref<8x232xf32, #tpu.memory_space<vmem>>, vector<8x192xf32>
    %cst_110 = arith.constant dense<0.000000e+00> : vector<16x192xf32>
    %105 = tpu.matmul %103, %104, %cst_110 {dimension_numbers = #tpu.dot_dimension_numbers<[1], [0], [0], [1], [0, 0, 1, 1], [], []>} : vector<16x8xf32>, vector<8x192xf32>, vector<16x192xf32> -> vector<16x192xf32>
    %106 = arith.addf %101, %105 : vector<16x192xf32>
    %c8_111 = arith.constant 8 : index
    %c0_112 = arith.constant 0 : index
    %c0_113 = arith.constant 0 : index
    %107 = vector.load %arg4[%c8_111, %c0_112, %c0_113] : memref<9x16x8xf32, #tpu.memory_space<vmem>>, vector<1x16x8xf32>
    %108 = vector.shape_cast %107 : vector<1x16x8xf32> to vector<16x8xf32>
    %c0_114 = arith.constant 0 : index
    %c34_115 = arith.constant 34 : index
    %109 = vector.load %arg12[%c0_114, %c34_115] : memref<8x232xf32, #tpu.memory_space<vmem>>, vector<8x192xf32>
    %cst_116 = arith.constant dense<0.000000e+00> : vector<16x192xf32>
    %110 = tpu.matmul %108, %109, %cst_116 {dimension_numbers = #tpu.dot_dimension_numbers<[1], [0], [0], [1], [0, 0, 1, 1], [], []>} : vector<16x8xf32>, vector<8x192xf32>, vector<16x192xf32> -> vector<16x192xf32>
    %111 = arith.addf %106, %110 : vector<16x192xf32>
    %c0_117 = arith.constant 0 : index
    %c0_118 = arith.constant 0 : index
    %112 = vector.load %arg5[%c0_117, %c0_118] : memref<16x1xf32, #tpu.memory_space<vmem>>, vector<16x1xf32>
    %113 = vector.broadcast %112 : vector<16x1xf32> to vector<16x192xf32>
    %114 = arith.addf %111, %113 : vector<16x192xf32>
    %cst_119 = arith.constant 0.000000e+00 : f32
    %115 = vector.broadcast %cst_119 : f32 to vector<16x192xf32>
    %116 = arith.cmpf oge, %114, %115 : vector<16x192xf32>
    %cst_120 = arith.constant 0.00999999977 : f32
    %117 = vector.broadcast %cst_120 : f32 to vector<16x192xf32>
    %118 = arith.mulf %117, %114 : vector<16x192xf32>
    %119 = arith.select %116, %114, %118 : vector<16x192xi1>, vector<16x192xf32>
    %c0_121 = arith.constant 0 : index
    %c0_122 = arith.constant 0 : index
    %120 = vector.load %arg13[%c0_121, %c0_122] : memref<16x200xf32, #tpu.memory_space<vmem>>, vector<16x192xf32>
    tpu.vector_store %arg13[%c0_121, %c0_122], %119 {strides = array<i32>} : memref<16x200xf32, #tpu.memory_space<vmem>>, vector<16x192xf32>,
    %cst_123 = arith.constant 0.000000e+00 : f32
    %121 = vector.broadcast %cst_123 : f32 to vector<32x160xf32>
    %c0_124 = arith.constant 0 : index
    %c0_125 = arith.constant 0 : index
    %c0_126 = arith.constant 0 : index
    %122 = vector.load %arg6[%c0_124, %c0_125, %c0_126] : memref<9x32x16xf32, #tpu.memory_space<vmem>>, vector<1x32x16xf32>
    %123 = vector.shape_cast %122 : vector<1x32x16xf32> to vector<32x16xf32>
    %c0_127 = arith.constant 0 : index
    %c0_128 = arith.constant 0 : index
    %124 = vector.load %arg13[%c0_127, %c0_128] : memref<16x200xf32, #tpu.memory_space<vmem>>, vector<16x160xf32>
    %cst_129 = arith.constant dense<0.000000e+00> : vector<32x160xf32>
    %125 = tpu.matmul %123, %124, %cst_129 {dimension_numbers = #tpu.dot_dimension_numbers<[1], [0], [0], [1], [0, 0, 1, 1], [], []>} : vector<32x16xf32>, vector<16x160xf32>, vector<32x160xf32> -> vector<32x160xf32>
    %126 = arith.addf %121, %125 : vector<32x160xf32>
    %c1_130 = arith.constant 1 : index
    %c0_131 = arith.constant 0 : index
    %c0_132 = arith.constant 0 : index
    %127 = vector.load %arg6[%c1_130, %c0_131, %c0_132] : memref<9x32x16xf32, #tpu.memory_space<vmem>>, vector<1x32x16xf32>
    %128 = vector.shape_cast %127 : vector<1x32x16xf32> to vector<32x16xf32>
    %c0_133 = arith.constant 0 : index
    %c1_134 = arith.constant 1 : index
    %129 = vector.load %arg13[%c0_133, %c1_134] : memref<16x200xf32, #tpu.memory_space<vmem>>, vector<16x160xf32>
    %cst_135 = arith.constant dense<0.000000e+00> : vector<32x160xf32>
    %130 = tpu.matmul %128, %129, %cst_135 {dimension_numbers = #tpu.dot_dimension_numbers<[1], [0], [0], [1], [0, 0, 1, 1], [], []>} : vector<32x16xf32>, vector<16x160xf32>, vector<32x160xf32> -> vector<32x160xf32>
    %131 = arith.addf %126, %130 : vector<32x160xf32>
    %c2_136 = arith.constant 2 : index
    %c0_137 = arith.constant 0 : index
    %c0_138 = arith.constant 0 : index
    %132 = vector.load %arg6[%c2_136, %c0_137, %c0_138] : memref<9x32x16xf32, #tpu.memory_space<vmem>>, vector<1x32x16xf32>
    %133 = vector.shape_cast %132 : vector<1x32x16xf32> to vector<32x16xf32>
    %c0_139 = arith.constant 0 : index
    %c2_140 = arith.constant 2 : index
    %134 = vector.load %arg13[%c0_139, %c2_140] : memref<16x200xf32, #tpu.memory_space<vmem>>, vector<16x160xf32>
    %cst_141 = arith.constant dense<0.000000e+00> : vector<32x160xf32>
    %135 = tpu.matmul %133, %134, %cst_141 {dimension_numbers = #tpu.dot_dimension_numbers<[1], [0], [0], [1], [0, 0, 1, 1], [], []>} : vector<32x16xf32>, vector<16x160xf32>, vector<32x160xf32> -> vector<32x160xf32>
    %136 = arith.addf %131, %135 : vector<32x160xf32>
    %c3_142 = arith.constant 3 : index
    %c0_143 = arith.constant 0 : index
    %c0_144 = arith.constant 0 : index
    %137 = vector.load %arg6[%c3_142, %c0_143, %c0_144] : memref<9x32x16xf32, #tpu.memory_space<vmem>>, vector<1x32x16xf32>
    %138 = vector.shape_cast %137 : vector<1x32x16xf32> to vector<32x16xf32>
    %c0_145 = arith.constant 0 : index
    %c16_146 = arith.constant 16 : index
    %139 = vector.load %arg13[%c0_145, %c16_146] : memref<16x200xf32, #tpu.memory_space<vmem>>, vector<16x160xf32>
    %cst_147 = arith.constant dense<0.000000e+00> : vector<32x160xf32>
    %140 = tpu.matmul %138, %139, %cst_147 {dimension_numbers = #tpu.dot_dimension_numbers<[1], [0], [0], [1], [0, 0, 1, 1], [], []>} : vector<32x16xf32>, vector<16x160xf32>, vector<32x160xf32> -> vector<32x160xf32>
    %141 = arith.addf %136, %140 : vector<32x160xf32>
    %c4_148 = arith.constant 4 : index
    %c0_149 = arith.constant 0 : index
    %c0_150 = arith.constant 0 : index
    %142 = vector.load %arg6[%c4_148, %c0_149, %c0_150] : memref<9x32x16xf32, #tpu.memory_space<vmem>>, vector<1x32x16xf32>
    %143 = vector.shape_cast %142 : vector<1x32x16xf32> to vector<32x16xf32>
    %c0_151 = arith.constant 0 : index
    %c17_152 = arith.constant 17 : index
    %144 = vector.load %arg13[%c0_151, %c17_152] : memref<16x200xf32, #tpu.memory_space<vmem>>, vector<16x160xf32>
    %cst_153 = arith.constant dense<0.000000e+00> : vector<32x160xf32>
    %145 = tpu.matmul %143, %144, %cst_153 {dimension_numbers = #tpu.dot_dimension_numbers<[1], [0], [0], [1], [0, 0, 1, 1], [], []>} : vector<32x16xf32>, vector<16x160xf32>, vector<32x160xf32> -> vector<32x160xf32>
    %146 = arith.addf %141, %145 : vector<32x160xf32>
    %c5_154 = arith.constant 5 : index
    %c0_155 = arith.constant 0 : index
    %c0_156 = arith.constant 0 : index
    %147 = vector.load %arg6[%c5_154, %c0_155, %c0_156] : memref<9x32x16xf32, #tpu.memory_space<vmem>>, vector<1x32x16xf32>
    %148 = vector.shape_cast %147 : vector<1x32x16xf32> to vector<32x16xf32>
    %c0_157 = arith.constant 0 : index
    %c18_158 = arith.constant 18 : index
    %149 = vector.load %arg13[%c0_157, %c18_158] : memref<16x200xf32, #tpu.memory_space<vmem>>, vector<16x160xf32>
    %cst_159 = arith.constant dense<0.000000e+00> : vector<32x160xf32>
    %150 = tpu.matmul %148, %149, %cst_159 {dimension_numbers = #tpu.dot_dimension_numbers<[1], [0], [0], [1], [0, 0, 1, 1], [], []>} : vector<32x16xf32>, vector<16x160xf32>, vector<32x160xf32> -> vector<32x160xf32>
    %151 = arith.addf %146, %150 : vector<32x160xf32>
    %c6_160 = arith.constant 6 : index
    %c0_161 = arith.constant 0 : index
    %c0_162 = arith.constant 0 : index
    %152 = vector.load %arg6[%c6_160, %c0_161, %c0_162] : memref<9x32x16xf32, #tpu.memory_space<vmem>>, vector<1x32x16xf32>
    %153 = vector.shape_cast %152 : vector<1x32x16xf32> to vector<32x16xf32>
    %c0_163 = arith.constant 0 : index
    %c32_164 = arith.constant 32 : index
    %154 = vector.load %arg13[%c0_163, %c32_164] : memref<16x200xf32, #tpu.memory_space<vmem>>, vector<16x160xf32>
    %cst_165 = arith.constant dense<0.000000e+00> : vector<32x160xf32>
    %155 = tpu.matmul %153, %154, %cst_165 {dimension_numbers = #tpu.dot_dimension_numbers<[1], [0], [0], [1], [0, 0, 1, 1], [], []>} : vector<32x16xf32>, vector<16x160xf32>, vector<32x160xf32> -> vector<32x160xf32>
    %156 = arith.addf %151, %155 : vector<32x160xf32>
    %c7_166 = arith.constant 7 : index
    %c0_167 = arith.constant 0 : index
    %c0_168 = arith.constant 0 : index
    %157 = vector.load %arg6[%c7_166, %c0_167, %c0_168] : memref<9x32x16xf32, #tpu.memory_space<vmem>>, vector<1x32x16xf32>
    %158 = vector.shape_cast %157 : vector<1x32x16xf32> to vector<32x16xf32>
    %c0_169 = arith.constant 0 : index
    %c33_170 = arith.constant 33 : index
    %159 = vector.load %arg13[%c0_169, %c33_170] : memref<16x200xf32, #tpu.memory_space<vmem>>, vector<16x160xf32>
    %cst_171 = arith.constant dense<0.000000e+00> : vector<32x160xf32>
    %160 = tpu.matmul %158, %159, %cst_171 {dimension_numbers = #tpu.dot_dimension_numbers<[1], [0], [0], [1], [0, 0, 1, 1], [], []>} : vector<32x16xf32>, vector<16x160xf32>, vector<32x160xf32> -> vector<32x160xf32>
    %161 = arith.addf %156, %160 : vector<32x160xf32>
    %c8_172 = arith.constant 8 : index
    %c0_173 = arith.constant 0 : index
    %c0_174 = arith.constant 0 : index
    %162 = vector.load %arg6[%c8_172, %c0_173, %c0_174] : memref<9x32x16xf32, #tpu.memory_space<vmem>>, vector<1x32x16xf32>
    %163 = vector.shape_cast %162 : vector<1x32x16xf32> to vector<32x16xf32>
    %c0_175 = arith.constant 0 : index
    %c34_176 = arith.constant 34 : index
    %164 = vector.load %arg13[%c0_175, %c34_176] : memref<16x200xf32, #tpu.memory_space<vmem>>, vector<16x160xf32>
    %cst_177 = arith.constant dense<0.000000e+00> : vector<32x160xf32>
    %165 = tpu.matmul %163, %164, %cst_177 {dimension_numbers = #tpu.dot_dimension_numbers<[1], [0], [0], [1], [0, 0, 1, 1], [], []>} : vector<32x16xf32>, vector<16x160xf32>, vector<32x160xf32> -> vector<32x160xf32>
    %166 = arith.addf %161, %165 : vector<32x160xf32>
    %c0_178 = arith.constant 0 : index
    %c0_179 = arith.constant 0 : index
    %167 = vector.load %arg7[%c0_178, %c0_179] : memref<32x1xf32, #tpu.memory_space<vmem>>, vector<32x1xf32>
    %168 = vector.broadcast %167 : vector<32x1xf32> to vector<32x160xf32>
    %169 = arith.addf %166, %168 : vector<32x160xf32>
    %cst_180 = arith.constant 0.000000e+00 : f32
    %170 = vector.broadcast %cst_180 : f32 to vector<32x160xf32>
    %171 = arith.cmpf oge, %169, %170 : vector<32x160xf32>
    %cst_181 = arith.constant 0.00999999977 : f32
    %172 = vector.broadcast %cst_181 : f32 to vector<32x160xf32>
    %173 = arith.mulf %172, %169 : vector<32x160xf32>
    %174 = arith.select %171, %169, %173 : vector<32x160xi1>, vector<32x160xf32>
    %c0_182 = arith.constant 0 : index
    %c0_183 = arith.constant 0 : index
    %175 = vector.load %arg14[%c0_182, %c0_183] : memref<32x168xf32, #tpu.memory_space<vmem>>, vector<32x160xf32>
    tpu.vector_store %arg14[%c0_182, %c0_183], %174 {strides = array<i32>} : memref<32x168xf32, #tpu.memory_space<vmem>>, vector<32x160xf32>,
    %cst_184 = arith.constant 0.000000e+00 : f32
    %176 = vector.broadcast %cst_184 : f32 to vector<64x128xf32>
    %c0_185 = arith.constant 0 : index
    %c0_186 = arith.constant 0 : index
    %c0_187 = arith.constant 0 : index
    %177 = vector.load %arg8[%c0_185, %c0_186, %c0_187] : memref<9x64x32xf32, #tpu.memory_space<vmem>>, vector<1x64x32xf32>
    %178 = vector.shape_cast %177 : vector<1x64x32xf32> to vector<64x32xf32>
    %c0_188 = arith.constant 0 : index
    %c0_189 = arith.constant 0 : index
    %179 = vector.load %arg14[%c0_188, %c0_189] : memref<32x168xf32, #tpu.memory_space<vmem>>, vector<32x128xf32>
    %cst_190 = arith.constant dense<0.000000e+00> : vector<64x128xf32>
    %180 = tpu.matmul %178, %179, %cst_190 {dimension_numbers = #tpu.dot_dimension_numbers<[1], [0], [0], [1], [0, 0, 1, 1], [], []>} : vector<64x32xf32>, vector<32x128xf32>, vector<64x128xf32> -> vector<64x128xf32>
    %181 = arith.addf %176, %180 : vector<64x128xf32>
    %c1_191 = arith.constant 1 : index
    %c0_192 = arith.constant 0 : index
    %c0_193 = arith.constant 0 : index
    %182 = vector.load %arg8[%c1_191, %c0_192, %c0_193] : memref<9x64x32xf32, #tpu.memory_space<vmem>>, vector<1x64x32xf32>
    %183 = vector.shape_cast %182 : vector<1x64x32xf32> to vector<64x32xf32>
    %c0_194 = arith.constant 0 : index
    %c1_195 = arith.constant 1 : index
    %184 = vector.load %arg14[%c0_194, %c1_195] : memref<32x168xf32, #tpu.memory_space<vmem>>, vector<32x128xf32>
    %cst_196 = arith.constant dense<0.000000e+00> : vector<64x128xf32>
    %185 = tpu.matmul %183, %184, %cst_196 {dimension_numbers = #tpu.dot_dimension_numbers<[1], [0], [0], [1], [0, 0, 1, 1], [], []>} : vector<64x32xf32>, vector<32x128xf32>, vector<64x128xf32> -> vector<64x128xf32>
    %186 = arith.addf %181, %185 : vector<64x128xf32>
    %c2_197 = arith.constant 2 : index
    %c0_198 = arith.constant 0 : index
    %c0_199 = arith.constant 0 : index
    %187 = vector.load %arg8[%c2_197, %c0_198, %c0_199] : memref<9x64x32xf32, #tpu.memory_space<vmem>>, vector<1x64x32xf32>
    %188 = vector.shape_cast %187 : vector<1x64x32xf32> to vector<64x32xf32>
    %c0_200 = arith.constant 0 : index
    %c2_201 = arith.constant 2 : index
    %189 = vector.load %arg14[%c0_200, %c2_201] : memref<32x168xf32, #tpu.memory_space<vmem>>, vector<32x128xf32>
    %cst_202 = arith.constant dense<0.000000e+00> : vector<64x128xf32>
    %190 = tpu.matmul %188, %189, %cst_202 {dimension_numbers = #tpu.dot_dimension_numbers<[1], [0], [0], [1], [0, 0, 1, 1], [], []>} : vector<64x32xf32>, vector<32x128xf32>, vector<64x128xf32> -> vector<64x128xf32>
    %191 = arith.addf %186, %190 : vector<64x128xf32>
    %c3_203 = arith.constant 3 : index
    %c0_204 = arith.constant 0 : index
    %c0_205 = arith.constant 0 : index
    %192 = vector.load %arg8[%c3_203, %c0_204, %c0_205] : memref<9x64x32xf32, #tpu.memory_space<vmem>>, vector<1x64x32xf32>
    %193 = vector.shape_cast %192 : vector<1x64x32xf32> to vector<64x32xf32>
    %c0_206 = arith.constant 0 : index
    %c16_207 = arith.constant 16 : index
    %194 = vector.load %arg14[%c0_206, %c16_207] : memref<32x168xf32, #tpu.memory_space<vmem>>, vector<32x128xf32>
    %cst_208 = arith.constant dense<0.000000e+00> : vector<64x128xf32>
    %195 = tpu.matmul %193, %194, %cst_208 {dimension_numbers = #tpu.dot_dimension_numbers<[1], [0], [0], [1], [0, 0, 1, 1], [], []>} : vector<64x32xf32>, vector<32x128xf32>, vector<64x128xf32> -> vector<64x128xf32>
    %196 = arith.addf %191, %195 : vector<64x128xf32>
    %c4_209 = arith.constant 4 : index
    %c0_210 = arith.constant 0 : index
    %c0_211 = arith.constant 0 : index
    %197 = vector.load %arg8[%c4_209, %c0_210, %c0_211] : memref<9x64x32xf32, #tpu.memory_space<vmem>>, vector<1x64x32xf32>
    %198 = vector.shape_cast %197 : vector<1x64x32xf32> to vector<64x32xf32>
    %c0_212 = arith.constant 0 : index
    %c17_213 = arith.constant 17 : index
    %199 = vector.load %arg14[%c0_212, %c17_213] : memref<32x168xf32, #tpu.memory_space<vmem>>, vector<32x128xf32>
    %cst_214 = arith.constant dense<0.000000e+00> : vector<64x128xf32>
    %200 = tpu.matmul %198, %199, %cst_214 {dimension_numbers = #tpu.dot_dimension_numbers<[1], [0], [0], [1], [0, 0, 1, 1], [], []>} : vector<64x32xf32>, vector<32x128xf32>, vector<64x128xf32> -> vector<64x128xf32>
    %201 = arith.addf %196, %200 : vector<64x128xf32>
    %c5_215 = arith.constant 5 : index
    %c0_216 = arith.constant 0 : index
    %c0_217 = arith.constant 0 : index
    %202 = vector.load %arg8[%c5_215, %c0_216, %c0_217] : memref<9x64x32xf32, #tpu.memory_space<vmem>>, vector<1x64x32xf32>
    %203 = vector.shape_cast %202 : vector<1x64x32xf32> to vector<64x32xf32>
    %c0_218 = arith.constant 0 : index
    %c18_219 = arith.constant 18 : index
    %204 = vector.load %arg14[%c0_218, %c18_219] : memref<32x168xf32, #tpu.memory_space<vmem>>, vector<32x128xf32>
    %cst_220 = arith.constant dense<0.000000e+00> : vector<64x128xf32>
    %205 = tpu.matmul %203, %204, %cst_220 {dimension_numbers = #tpu.dot_dimension_numbers<[1], [0], [0], [1], [0, 0, 1, 1], [], []>} : vector<64x32xf32>, vector<32x128xf32>, vector<64x128xf32> -> vector<64x128xf32>
    %206 = arith.addf %201, %205 : vector<64x128xf32>
    %c6_221 = arith.constant 6 : index
    %c0_222 = arith.constant 0 : index
    %c0_223 = arith.constant 0 : index
    %207 = vector.load %arg8[%c6_221, %c0_222, %c0_223] : memref<9x64x32xf32, #tpu.memory_space<vmem>>, vector<1x64x32xf32>
    %208 = vector.shape_cast %207 : vector<1x64x32xf32> to vector<64x32xf32>
    %c0_224 = arith.constant 0 : index
    %c32_225 = arith.constant 32 : index
    %209 = vector.load %arg14[%c0_224, %c32_225] : memref<32x168xf32, #tpu.memory_space<vmem>>, vector<32x128xf32>
    %cst_226 = arith.constant dense<0.000000e+00> : vector<64x128xf32>
    %210 = tpu.matmul %208, %209, %cst_226 {dimension_numbers = #tpu.dot_dimension_numbers<[1], [0], [0], [1], [0, 0, 1, 1], [], []>} : vector<64x32xf32>, vector<32x128xf32>, vector<64x128xf32> -> vector<64x128xf32>
    %211 = arith.addf %206, %210 : vector<64x128xf32>
    %c7_227 = arith.constant 7 : index
    %c0_228 = arith.constant 0 : index
    %c0_229 = arith.constant 0 : index
    %212 = vector.load %arg8[%c7_227, %c0_228, %c0_229] : memref<9x64x32xf32, #tpu.memory_space<vmem>>, vector<1x64x32xf32>
    %213 = vector.shape_cast %212 : vector<1x64x32xf32> to vector<64x32xf32>
    %c0_230 = arith.constant 0 : index
    %c33_231 = arith.constant 33 : index
    %214 = vector.load %arg14[%c0_230, %c33_231] : memref<32x168xf32, #tpu.memory_space<vmem>>, vector<32x128xf32>
    %cst_232 = arith.constant dense<0.000000e+00> : vector<64x128xf32>
    %215 = tpu.matmul %213, %214, %cst_232 {dimension_numbers = #tpu.dot_dimension_numbers<[1], [0], [0], [1], [0, 0, 1, 1], [], []>} : vector<64x32xf32>, vector<32x128xf32>, vector<64x128xf32> -> vector<64x128xf32>
    %216 = arith.addf %211, %215 : vector<64x128xf32>
    %c8_233 = arith.constant 8 : index
    %c0_234 = arith.constant 0 : index
    %c0_235 = arith.constant 0 : index
    %217 = vector.load %arg8[%c8_233, %c0_234, %c0_235] : memref<9x64x32xf32, #tpu.memory_space<vmem>>, vector<1x64x32xf32>
    %218 = vector.shape_cast %217 : vector<1x64x32xf32> to vector<64x32xf32>
    %c0_236 = arith.constant 0 : index
    %c34_237 = arith.constant 34 : index
    %219 = vector.load %arg14[%c0_236, %c34_237] : memref<32x168xf32, #tpu.memory_space<vmem>>, vector<32x128xf32>
    %cst_238 = arith.constant dense<0.000000e+00> : vector<64x128xf32>
    %220 = tpu.matmul %218, %219, %cst_238 {dimension_numbers = #tpu.dot_dimension_numbers<[1], [0], [0], [1], [0, 0, 1, 1], [], []>} : vector<64x32xf32>, vector<32x128xf32>, vector<64x128xf32> -> vector<64x128xf32>
    %221 = arith.addf %216, %220 : vector<64x128xf32>
    %c0_239 = arith.constant 0 : index
    %c0_240 = arith.constant 0 : index
    %222 = vector.load %arg9[%c0_239, %c0_240] : memref<64x1xf32, #tpu.memory_space<vmem>>, vector<64x1xf32>
    %223 = vector.broadcast %222 : vector<64x1xf32> to vector<64x128xf32>
    %224 = arith.addf %221, %223 : vector<64x128xf32>
    %cst_241 = arith.constant 0.000000e+00 : f32
    %225 = vector.broadcast %cst_241 : f32 to vector<64x128xf32>
    %226 = arith.cmpf oge, %224, %225 : vector<64x128xf32>
    %cst_242 = arith.constant 0.00999999977 : f32
    %227 = vector.broadcast %cst_242 : f32 to vector<64x128xf32>
    %228 = arith.mulf %227, %224 : vector<64x128xf32>
    %229 = arith.select %226, %224, %228 : vector<64x128xi1>, vector<64x128xf32>
    %c0_243 = arith.constant 0 : index
    %c0_244 = arith.constant 0 : index
    %c0_245 = arith.constant 0 : index
    %230 = vector.load %arg10[%c0_243, %c0_244, %c0_245] : memref<1x64x128xf32, #tpu.memory_space<vmem>>, vector<1x64x128xf32>
    %231 = vector.shape_cast %230 : vector<1x64x128xf32> to vector<64x128xf32>
    %232 = vector.shape_cast %229 : vector<64x128xf32> to vector<1x64x128xf32>
    tpu.vector_store %arg10[%c0_243, %c0_244, %c0_245], %232 {strides = array<i32>} : memref<1x64x128xf32, #tpu.memory_space<vmem>>, vector<1x64x128xf32>,
    return
  }
  func.func @transform_0(%arg0: i32) -> (i32, i32, i32) {
    %c0_i32 = arith.constant 0 : i32
    %c0_i32_0 = arith.constant 0 : i32
    %c0_i32_1 = arith.constant 0 : i32
    return %arg0, %c0_i32, %c0_i32_0 : i32, i32, i32
  }
  func.func @transform_1(%arg0: i32) -> (i32, i32, i32) {
    %c0_i32 = arith.constant 0 : i32
    %c0_i32_0 = arith.constant 0 : i32
    %c0_i32_1 = arith.constant 0 : i32
    %c0_i32_2 = arith.constant 0 : i32
    return %c0_i32, %c0_i32_0, %c0_i32_1 : i32, i32, i32
  }
  func.func @transform_2(%arg0: i32) -> (i32, i32) {
    %c0_i32 = arith.constant 0 : i32
    %c0_i32_0 = arith.constant 0 : i32
    %c0_i32_1 = arith.constant 0 : i32
    return %c0_i32, %c0_i32_0 : i32, i32
  }
  func.func @transform_3(%arg0: i32) -> (i32, i32, i32) {
    %c0_i32 = arith.constant 0 : i32
    %c0_i32_0 = arith.constant 0 : i32
    %c0_i32_1 = arith.constant 0 : i32
    %c0_i32_2 = arith.constant 0 : i32
    return %c0_i32, %c0_i32_0, %c0_i32_1 : i32, i32, i32
  }
  func.func @transform_4(%arg0: i32) -> (i32, i32) {
    %c0_i32 = arith.constant 0 : i32
    %c0_i32_0 = arith.constant 0 : i32
    %c0_i32_1 = arith.constant 0 : i32
    return %c0_i32, %c0_i32_0 : i32, i32
  }
  func.func @transform_5(%arg0: i32) -> (i32, i32, i32) {
    %c0_i32 = arith.constant 0 : i32
    %c0_i32_0 = arith.constant 0 : i32
    %c0_i32_1 = arith.constant 0 : i32
    %c0_i32_2 = arith.constant 0 : i32
    return %c0_i32, %c0_i32_0, %c0_i32_1 : i32, i32, i32
  }
  func.func @transform_6(%arg0: i32) -> (i32, i32) {
    %c0_i32 = arith.constant 0 : i32
    %c0_i32_0 = arith.constant 0 : i32
    %c0_i32_1 = arith.constant 0 : i32
    return %c0_i32, %c0_i32_0 : i32, i32
  }
  func.func @transform_7(%arg0: i32) -> (i32, i32, i32) {
    %c0_i32 = arith.constant 0 : i32
    %c0_i32_0 = arith.constant 0 : i32
    %c0_i32_1 = arith.constant 0 : i32
    %c0_i32_2 = arith.constant 0 : i32
    return %c0_i32, %c0_i32_0, %c0_i32_1 : i32, i32, i32
  }
  func.func @transform_8(%arg0: i32) -> (i32, i32) {
    %c0_i32 = arith.constant 0 : i32
    %c0_i32_0 = arith.constant 0 : i32
    %c0_i32_1 = arith.constant 0 : i32
    return %c0_i32, %c0_i32_0 : i32, i32
  }
  func.func @transform_9(%arg0: i32) -> (i32, i32, i32) {
    %c0_i32 = arith.constant 0 : i32
    %c0_i32_0 = arith.constant 0 : i32
    %c0_i32_1 = arith.constant 0 : i32
    return %arg0, %c0_i32, %c0_i32_0 : i32, i32, i32
  }
}

</mosaic_0001>

<bundles_post_ra>
// kernel: encoder_forward.1
= control target key start
LH: loop header
LB: loop body
LE: loop exit
PB: predicated region body
PF: predicated region fallthrough
CT: control target
= control target key end

     0   :  { %s4256_s30 = smov 0   ;;  %s5316_s0 = inlined_call_operand.vmem [shape: f32[2,3,256], index: 0, kind: input, shape index: {}]   ;;  %s5317_s1 = inlined_call_operand.vmem [shape: f32[9,8,3], index: 1, kind: input, shape index: {}]   ;;  %s5318_s2 = inlined_call_operand.vmem [shape: f32[8,1], index: 2, kind: input, shape index: {}]   ;;  %s5319_s3 = inlined_call_operand.vmem [shape: f32[9,16,8], index: 3, kind: input, shape index: {}]   ;;  %s5320_s4 = inlined_call_operand.vmem [shape: f32[16,1], index: 4, kind: input, shape index: {}]   ;;  %s5321_s5 = inlined_call_operand.vmem [shape: f32[9,32,16], index: 5, kind: input, shape index: {}]   ;;  %s5322_s6 = inlined_call_operand.vmem [shape: f32[32,1], index: 6, kind: input, shape index: {}]   ;;  %s5323_s7 = inlined_call_operand.vmem [shape: f32[9,64,32], index: 7, kind: input, shape index: {}]   ;;  %s5324_s8 = inlined_call_operand.vmem [shape: f32[64,1], index: 8, kind: input, shape index: {}]   ;;  %s5325_s9 = inlined_call_operand.vmem [shape: f32[2,64,128], index: 9, kind: output, shape index: {}]  }
   0x1 LB: > { %s3538_s10 = sadd.s32 4294967295, %s4194_s30   ;;  %p3542_p0 = scmp.ge.s32.totalorder %s4194_s30, 1  ;;  %s4194_s30 = sphi %s4256_s30, %s19_s30  }
   0x2   : > { %p287_p1 = scmp.lt.s32.totalorder %s4194_s30, 3 }
   0x4   : > { %p288_p2 = pnand %p3542_p0, %p287_p1 }
   0x5   : > { %p323_p3 = scmp.lt.s32.totalorder (!%p288_p2), %s3538_s10, 1  ;;  %s4197_s15 = smov (!%p288_p2), 127  }
   0x6   : > { %291 = sbr.rel (%p288_p2) target bundleno = 1551 (0x60f), region = 56  ;;  %s4198_s16 = smov (!%p288_p2), 95  }
   0x7   : > { %s4199_s17 = smov (!%p288_p2), 126   ;;  %s4200_s18 = smov (!%p288_p2), 112  }
   0x8   : > { %s4201_s19 = smov (!%p288_p2), 111   ;;  %s4202_s20 = smov (!%p288_p2), 110  }
   0x9   : > { %s4203_s21 = smov (!%p288_p2), 96   ;;  %s4204_s22 = smov (!%p288_p2), 94  }
   0xb   : > { %v4196_v0 = vmov 0.0   ;;  %s5327_s10 = smov (!%p323_p3, %s3538_s10), 1  ;;  %vm334_vm0 = vcmask 59392   ;;  %vm373_vm1 = vcmask 1042432   ;;  %vm369_vm2 = vcmask 23552   ;;  %v355_v33 = vld [vmem:[%s5317_s1] sm:$0xff] }
   0xc   : > { %333 = vst [vmem:[#allocation2] sm:$0x77] %v4196_v0  ;;  %s3885_s11 = sshll.u32 %s5327_s10, 3  ;;  %vm367_vm3 = vcmask 1039360   ;;  %v3547_v36 = vld [vmem:[%s5317_s1 + $0x8] sm:$0xff]  ;;  %vm541_vm4 = vcmask 916480  }
   0xd   : > { %s327_s14 = scalar_lea.vmem %s5316_s0, %s3885_s11  ;;  %335 = vst.msk [vmem:[#allocation2 + $0x8] sm:$0x7] %vm334_vm0, %v4196_v0  ;;  %v3561_v40 = vld [vmem:[%s5317_s1 + $0x18] sm:$0xff]  ;;  %vm479_vm5 = vcmask 1031168   ;;  %v3556_v44 = vld [vmem:[%s5317_s1 + $0x10] sm:$0xff]  ;;  %vm603_vm6 = vcmask 908288  }
   0xe   : > { %v353_v1 = vld [vmem:[%s327_s14] sm:$0x77]  ;;  %v4205_v53 = vmov 0   ;;  %vm665_vm7 = vcmask 900096   ;;  %v3571_v54 = vld [vmem:[%s5317_s1 + $0x28] sm:$0xff]  ;;  %v3576_v56 = vld [vmem:[%s5317_s1 + $0x30] sm:$0xff] }
   0xf   : > { %354 = vst [vmem:[#allocation2] sm:$0x77] %v353_v1  ;;  %v3566_v47 = vld [vmem:[%s5317_s1 + $0x20] sm:$0xff]  ;;  %3905 = vset.pattern.permute.xlu0 %v4205_v53  ;;  %3946 = vset.pattern.permute.xlu1 %v4205_v53  ;;  %vm727_vm8 = vcmask 785408   ;;  %vm796_vm9 = vcmask 777216   ;;  %v3581_v62 = vld [vmem:[%s5317_s1 + $0x38] sm:$0xff] }
  0x10   : > { %v918_v52 = vld [vmem:[%s5318_s2] sm:$0xff]  ;;  %3947 = vset.pattern.permute.xlu2 %v4205_v53  ;;  %vm866_vm10 = vcmask 769024   ;;  %vm337_vm11 = vcmask 850944   ;;  %vm950_vm14 = vcmask 64512   ;;  %v935_v53 = vld [vmem:[%s5319_s3 + $0x8] sm:$0xff]  ;;  %vm340_vm15 = vcmask 588800  }
  0x11   : > { %338 = vst.msk [vmem:[#allocation3 + $0x8] sm:$0xff] %vm337_vm11, %v4196_v0  ;;  %vm1546_vm0 = vcmask 523264  }
  0x12   : > { %341 = vst.msk [vmem:[#allocation4 + $0x8] sm:$0xff] %vm340_vm15, %v4196_v0 }
  0x13   : > { %343 = vst.msk [vmem:[#allocation4 + $0x18] sm:$0xff] %vm340_vm15, %v4196_v0  ;;  %vm2458_vm15 = vcmask 261120  }
  0x14   : > { %v781_v5 = vld [vmem:[#allocation2 + $0x8] sm:$0x7] }
  0x15   : > { %786 = vst [vmem:[#allocation1 + $0x10] ss:$2 sm:$0xff] %v781_v5  ;;  %v851_v7 = vld [vmem:[#allocation2 + $0x8] sm:$0x7]  ;;  %v3586_v5 = vld [vmem:[%s5317_s1 + $0x40] sm:$0xff] }
  0x16   : > { %v356_v2 = vld [vmem:[#allocation2] sm:$0x77] }
  0x17   : > { %360 = vst [vmem:[#allocation1] ss:$2 sm:$0xff] %v356_v2  ;;  %v470_v6 = vld [vmem:[#allocation2] sm:$0x77] }
  0x18   : > { %v532_v11 = vld [vmem:[#allocation2] sm:$0x77] }
  0x19   : > { %v594_v14 = vld [vmem:[#allocation2] sm:$0x77] }
  0x1a   : > { %v656_v17 = vld [vmem:[#allocation2] sm:$0x77] }
  0x1b   : > { %v718_v20 = vld [vmem:[#allocation2] sm:$0x77] }
  0x1c   : > { %v789_v10 = vld.sshfl [vmem:[#allocation1 + $0x10] sm:$0xff pattern:$0x75316420]  ;;  %v780_v23 = vld [vmem:[#allocation2] sm:$0x77] }
  0x1d   : > { %794 = vrot.lane.b32.xlu2 %v789_v10, %s4198_s16  ;;  %856 = vst [vmem:[#allocation1 + $0x10] ss:$2 sm:$0xff] %v851_v7  ;;  %v850_v26 = vld [vmem:[#allocation2] sm:$0x77] }
  0x1e   : > { %v361_v3 = vld.sshfl [vmem:[#allocation1] sm:$0xff pattern:$0x75316420]  ;;  %v362_v4 = vld.sshfl [vmem:[#allocation1 + $0x8] sm:$0xff pattern:$0x75316420] }
  0x1f   : > { %363 = vrot.lane.b32.xlu0 %v361_v3, %s4197_s15  ;;  %418 = vst [vmem:[#allocation1] ss:$2 sm:$0xff] %v356_v2 }
  0x24   : > { %v859_v27 = vld.sshfl [vmem:[#allocation1 + $0x10] sm:$0xff pattern:$0x75316420] }
  0x26   : > { %v419_v8 = vld.sshfl [vmem:[#allocation1] sm:$0xff pattern:$0x75316420]  ;;  %v420_v9 = vld.sshfl [vmem:[#allocation1 + $0x8] sm:$0xff pattern:$0x75316420] }
  0x27   : > { %472 = vst [vmem:[#allocation1] ss:$2 sm:$0xff] %v470_v6  ;;  %365 = vrot.lane.b32.xlu0 %v362_v4, %s4197_s15  ;;  %3554 = vmatpush.msk.msra.mxu3 %vm373_vm1, %v420_v9 }
  0x28   : > { %3552 = vmatpush.msk.msra.mxu2 %vm373_vm1, %v419_v8  ;;  %3555 = vmatmul.msk.f32.vlgmr.msra.gmra.mxu3 %vm369_vm2, %v355_v33 }
  0x29   : > { %3553 = vmatmul.msk.f32.vlgmr.msra.gmra.mxu2 %vm369_vm2, %v355_v33 }
  0x2e   : > { %v473_v12 = vld.sshfl [vmem:[#allocation1] sm:$0xff pattern:$0x75316420]  ;;  %v474_v13 = vld.sshfl [vmem:[#allocation1 + $0x8] sm:$0xff pattern:$0x75316420] }
  0x2f   : > { %475 = vrot.lane.b32.xlu1 %v473_v12, %s4199_s17  ;;  %534 = vst [vmem:[#allocation1] ss:$2 sm:$0xff] %v532_v11 }
  0x36   : > { %v535_v15 = vld.sshfl [vmem:[#allocation1] sm:$0xff pattern:$0x75316420]  ;;  %v536_v16 = vld.sshfl [vmem:[#allocation1 + $0x8] sm:$0xff pattern:$0x75316420] }
  0x37   : > { %477 = vrot.lane.b32.xlu1 %v474_v13, %s4199_s17  ;;  %596 = vst [vmem:[#allocation1] ss:$2 sm:$0xff] %v594_v14  ;;  %537 = vrot.lane.b32.xlu2 %v535_v15, %s4200_s18 }
  0x3e   : > { %v597_v18 = vld.sshfl [vmem:[#allocation1] sm:$0xff pattern:$0x75316420]  ;;  %v598_v19 = vld.sshfl [vmem:[#allocation1 + $0x8] sm:$0xff pattern:$0x75316420] }
  0x3f   : > { %599 = vrot.lane.b32.xlu0 %v597_v18, %s4201_s19  ;;  %601 = vrot.lane.b32.xlu1 %v598_v19, %s4201_s19  ;;  %658 = vst [vmem:[#allocation1] ss:$2 sm:$0xff] %v656_v17 }
  0x40   : > { %539 = vrot.lane.b32.xlu2 %v536_v16, %s4200_s18 }
  0x46   : > { %v660_v21 = vld.sshfl [vmem:[#allocation1 + $0x8] sm:$0xff pattern:$0x75316420]  ;;  %v659_v22 = vld.sshfl [vmem:[#allocation1] sm:$0xff pattern:$0x75316420] }
  0x47   : > { %663 = vrot.lane.b32.xlu0 %v660_v21, %s4202_s20  ;;  %720 = vst [vmem:[#allocation1] ss:$2 sm:$0xff] %v718_v20 }
  0x48   : > { %661 = vrot.lane.b32.xlu2 %v659_v22, %s4202_s20 }
  0x4e   : > { %v721_v24 = vld.sshfl [vmem:[#allocation1] sm:$0xff pattern:$0x75316420]  ;;  %v722_v25 = vld.sshfl [vmem:[#allocation1 + $0x8] sm:$0xff pattern:$0x75316420] }
  0x4f   : > { %723 = vrot.lane.b32.xlu1 %v721_v24, %s4203_s21  ;;  %784 = vst [vmem:[#allocation1] ss:$2 sm:$0xff] %v780_v23 }
  0x50   : > { %725 = vrot.lane.b32.xlu2 %v722_v25, %s4203_s21 }
  0x56   : > { %v788_v28 = vld.sshfl [vmem:[#allocation1 + $0x8] sm:$0xff pattern:$0x75316420]  ;;  %v787_v29 = vld.sshfl [vmem:[#allocation1] sm:$0xff pattern:$0x75316420] }
  0x57   : > { %792 = vrot.lane.b32.xlu1 %v788_v28, %s4198_s16  ;;  %790 = vrot.lane.b32.xlu0 %v787_v29, %s4198_s16  ;;  %854 = vst [vmem:[#allocation1] ss:$2 sm:$0xff] %v850_v26 }
  0x58   : > { %864 = vrot.lane.b32.xlu2 %v859_v27, %s4204_s22 }
  0x5e   : > { %v858_v30 = vld.sshfl [vmem:[#allocation1 + $0x8] sm:$0xff pattern:$0x75316420]  ;;  %v857_v31 = vld.sshfl [vmem:[#allocation1] sm:$0xff pattern:$0x75316420] }
  0x5f   : > { %862 = vrot.lane.b32.xlu1 %v858_v30, %s4204_s22  ;;  %860 = vrot.lane.b32.xlu0 %v857_v31, %s4204_s22 }
  0x67   : > { %921 = vperm.xlu0 %3905, %v918_v52  }
  0x77   : > { %v4292_v32 = vpop.permute.xlu2 %794 }
  0x91   : > { %v364_v34 = vpop.permute.xlu0 %363  ;;  %v538_v35 = vpop.permute.xlu2 %537 }
  0x99   : > { %v366_v37 = vpop.permute.xlu0 %365 }
  0x9a   : > { %v368_v38 = vsel %vm367_vm3, %v364_v34, %v366_v37  ;;  %3550 = vmatpush.msk.msra.mxu1 %vm373_vm1, %v366_v37  ;;  %v540_v39 = vpop.permute.xlu2 %539 }
  0x9b   : > { %3548 = vmatpush.msk.msra.mxu0 %vm373_vm1, %v368_v38  ;;  %3551 = vmatmul.msk.f32.vlgmr.msra.gmra.mxu1 %vm369_vm2, %v3547_v36  ;;  %v542_v41 = vsel %vm541_vm4, %v538_v35, %v540_v39 }
  0x9c   : > { %3549 = vmatmul.msk.f32.vlgmr.msra.gmra.mxu0 %vm369_vm2, %v3547_v36  ;;  %3564 = vmatpush.msk.msrb.mxu3 %vm373_vm1, %v540_v39 }
  0x9d   : > { %3562 = vmatpush.msk.msrb.mxu2 %vm373_vm1, %v542_v41  ;;  %3565 = vmatmul.msk.f32.vlgmr.msrb.gmra.mxu3 %vm369_vm2, %v3561_v40 }
  0x9e   : > { %3563 = vmatmul.msk.f32.vlgmr.msrb.gmra.mxu2 %vm369_vm2, %v3561_v40 }
  0xa1   : > { %v476_v42 = vpop.permute.xlu1 %475 }
  0xa2   : > { %v662_v43 = vpop.permute.xlu2 %661 }
  0xa9   : > { %v478_v45 = vpop.permute.xlu1 %477 }
  0xaa   : > { %v480_v46 = vsel %vm479_vm5, %v476_v42, %v478_v45  ;;  %3559 = vmatpush.msk.msrb.mxu1 %vm373_vm1, %v478_v45  ;;  %v726_v48 = vpop.permute.xlu2 %725 }
  0xab   : > { %3557 = vmatpush.msk.msrb.mxu0 %vm373_vm1, %v480_v46  ;;  %3560 = vmatmul.msk.f32.vlgmr.msrb.gmra.mxu1 %vm369_vm2, %v3556_v44  ;;  %v465_v11 = vpop.f32.mrf.mxu3 }
  0xac   : > { %3558 = vmatmul.msk.f32.vlgmr.msrb.gmra.mxu0 %vm369_vm2, %v3556_v44  ;;  %v445_v10 = vpop.f32.mrf.mxu2 }
  0xb1   : > { %v600_v49 = vpop.permute.xlu0 %599  ;;  %v602_v50 = vpop.permute.xlu1 %601 }
  0xb2   : > { %v604_v51 = vsel %vm603_vm6, %v600_v49, %v602_v50  ;;  %3569 = vmatpush.msk.msra.mxu1 %vm373_vm1, %v602_v50  ;;  %v865_v2 = vpop.permute.xlu2 %864 }
  0xb3   : > { %3567 = vmatpush.msk.msra.mxu0 %vm373_vm1, %v604_v51  ;;  %3570 = vmatmul.msk.f32.vlgmr.msra.gmra.mxu1 %vm369_vm2, %v3566_v47  ;;  %v934_v51 = vld [vmem:[%s5319_s3] sm:$0xff] }
  0xb4   : > { %3568 = vmatmul.msk.f32.vlgmr.msra.gmra.mxu0 %vm369_vm2, %v3566_v47  ;;  %3579 = vmatpush.msk.msrb.mxu1 %vm373_vm1, %v726_v48 }
  0xb9   : > { %v664_v55 = vpop.permute.xlu0 %663 }
  0xba   : > { %v666_v57 = vsel %vm665_vm7, %v662_v43, %v664_v55  ;;  %3574 = vmatpush.msk.msra.mxu3 %vm373_vm1, %v664_v55 }
  0xbb   : > { %3572 = vmatpush.msk.msra.mxu2 %vm373_vm1, %v666_v57  ;;  %3575 = vmatmul.msk.f32.vlgmr.msra.gmra.mxu3 %vm369_vm2, %v3571_v54 }
  0xbc   : > { %3573 = vmatmul.msk.f32.vlgmr.msra.gmra.mxu2 %vm369_vm2, %v3571_v54  ;;  %3580 = vmatmul.msk.f32.vlgmr.msrb.gmra.mxu1 %vm369_vm2, %v3576_v56 }
  0xc1   : > { %v724_v58 = vpop.permute.xlu1 %723 }
  0xc2   : > { %v728_v59 = vsel %vm727_vm8, %v724_v58, %v726_v48  ;;  %v3607_v58 = vld [vmem:[%s5319_s3 + $0x30] sm:$0xff] }
  0xc3   : > { %3577 = vmatpush.msk.msrb.mxu0 %vm373_vm1, %v728_v59  ;;  %v3608_v59 = vld [vmem:[%s5319_s3 + $0x38] sm:$0xff] }
  0xc4   : > { %3578 = vmatmul.msk.f32.vlgmr.msrb.gmra.mxu0 %vm369_vm2, %v3576_v56 }
  0xc9   : > { %v793_v60 = vpop.permute.xlu1 %792  ;;  %v791_v61 = vpop.permute.xlu0 %790 }
  0xca   : > { %v798_v63 = vsel %vm796_vm9, %v793_v60, %v4292_v32  ;;  %v797_v1 = vsel %vm796_vm9, %v791_v61, %v793_v60 }
  0xcb   : > { %3582 = vmatpush.msk.msrb.mxu2 %vm373_vm1, %v797_v1  ;;  %3584 = vmatpush.msk.msrb.mxu3 %vm373_vm1, %v798_v63 }
  0xcc   : > { %3583 = vmatmul.msk.f32.vlgmr.msrb.gmra.mxu2 %vm369_vm2, %v3581_v62  ;;  %3585 = vmatmul.msk.f32.vlgmr.msrb.gmra.mxu3 %vm369_vm2, %v3581_v62 }
  0xd1   : > { %v863_v3 = vpop.permute.xlu1 %862  ;;  %v861_v4 = vpop.permute.xlu0 %860 }
  0xd2   : > { %v868_v6 = vsel %vm866_vm10, %v863_v3, %v865_v2  ;;  %v867_v7 = vsel %vm866_vm10, %v861_v4, %v863_v3  ;;  %v3591_v2 = vld [vmem:[%s5319_s3 + $0x10] sm:$0xff] }
  0xd3   : > { %3587 = vmatpush.msk.msra.mxu0 %vm373_vm1, %v867_v7  ;;  %3589 = vmatpush.msk.msra.mxu1 %vm373_vm1, %v868_v6 }
  0xd4   : > { %3588 = vmatmul.msk.f32.vlgmr.msra.gmra.mxu0 %vm369_vm2, %v3586_v5  ;;  %3590 = vmatmul.msk.f32.vlgmr.msra.gmra.mxu1 %vm369_vm2, %v3586_v5 }
  0xd9   : > { %v922_v38 = vpop.permute.xlu0 %921 }
 0x118   : > { %v415_v9 = vpop.f32.mrf.mxu1 }
 0x119   : > { %v395_v8 = vpop.f32.mrf.mxu0  ;;  %v466_v15 = vadd.f32 %v465_v11, %v415_v9  ;;  %v3592_v9 = vld [vmem:[%s5319_s3 + $0x18] sm:$0xff] }
 0x11a   : > { %v446_v14 = vadd.f32 %v445_v10, %v395_v8 }
 0x120   : > { %v587_v17 = vpop.f32.mrf.mxu3 }
 0x121   : > { %v567_v16 = vpop.f32.mrf.mxu2 }
 0x128   : > { %v525_v13 = vpop.f32.mrf.mxu1 }
 0x129   : > { %v505_v12 = vpop.f32.mrf.mxu0  ;;  %v529_v21 = vadd.f32 %v525_v13, %v466_v15 }
 0x12a   : > { %v528_v18 = vadd.f32 %v505_v12, %v446_v14 }
 0x12b   : > { %v591_v23 = vadd.f32 %v587_v17, %v529_v21  ;;  %v3601_v17 = vld [vmem:[%s5319_s3 + $0x20] sm:$0xff]  ;;  %v3619_v21 = vld [vmem:[%s5319_s3 + $0x50] sm:$0xff] }
 0x12c   : > { %v590_v22 = vadd.f32 %v567_v16, %v528_v18 }
 0x130   : > { %v649_v20 = vpop.f32.mrf.mxu1 }
 0x131   : > { %v629_v19 = vpop.f32.mrf.mxu0  ;;  %v653_v27 = vadd.f32 %v649_v20, %v591_v23 }
 0x132   : > { %v652_v24 = vadd.f32 %v629_v19, %v590_v22 }
 0x139   : > { %v773_v28 = vpop.f32.mrf.mxu1 }
 0x13e   : > { %v711_v25 = vpop.f32.mrf.mxu3 }
 0x13f   : > { %v691_v26 = vpop.f32.mrf.mxu2  ;;  %v715_v30 = vadd.f32 %v711_v25, %v653_v27  ;;  %v3620_v25 = vld [vmem:[%s5319_s3 + $0x58] sm:$0xff]  ;;  %v3613_v27 = vld [vmem:[%s5319_s3 + $0x40] sm:$0xff] }
 0x140   : > { %v714_v31 = vadd.f32 %v691_v26, %v652_v24  ;;  %v3602_v24 = vld [vmem:[%s5319_s3 + $0x28] sm:$0xff] }
 0x141   : > { %v753_v29 = vpop.f32.mrf.mxu0  ;;  %v777_v32 = vadd.f32 %v773_v28, %v715_v30  ;;  %v3631_v30 = vld [vmem:[%s5319_s3 + $0x70] sm:$0xff] }
 0x142   : > { %v776_v33 = vadd.f32 %v753_v29, %v714_v31 }
 0x14f   : > { %v823_v34 = vpop.f32.mrf.mxu2  ;;  %v843_v35 = vpop.f32.mrf.mxu3 }
 0x150   : > { %v846_v36 = vadd.f32 %v823_v34, %v776_v33  ;;  %v847_v37 = vadd.f32 %v843_v35, %v777_v32  ;;  %v3614_v32 = vld [vmem:[%s5319_s3 + $0x48] sm:$0xff]  ;;  %v3632_v33 = vld [vmem:[%s5319_s3 + $0x78] sm:$0xff]  ;;  %v1517_v35 = vld [vmem:[%s5320_s4] sm:$0xff] }
 0x151   : > { %v893_v39 = vpop.f32.mrf.mxu0  ;;  %v913_v40 = vpop.f32.mrf.mxu1  ;;  %v1518_v34 = vld [vmem:[%s5320_s4 + $0x8] sm:$0xff] }
 0x152   : > { %v916_v41 = vadd.f32 %v893_v39, %v846_v36  ;;  %v917_v42 = vadd.f32 %v913_v40, %v847_v37  ;;  %v3625_v36 = vld [vmem:[%s5319_s3 + $0x60] sm:$0xff]  ;;  %v3626_v37 = vld [vmem:[%s5319_s3 + $0x68] sm:$0xff] }
 0x153   : > { %v3638_v39 = vld [vmem:[%s5319_s3 + $0x88] sm:$0xff] }
 0x154   : > { %v924_v43 = vadd.f32 %v922_v38, %v916_v41  ;;  %v925_v44 = vadd.f32 %v922_v38, %v917_v42  ;;  %v3637_v38 = vld [vmem:[%s5319_s3 + $0x80] sm:$0xff] }
 0x156   : > { %vm926_vm12 = vcmp.ge.f32.partialorder %v924_v43, 0.0  ;;  %vm927_vm13 = vcmp.ge.f32.partialorder %v925_v44, 0.0  ;;  %v928_v45 = vmul.f32 0.01, %v924_v43  ;;  %v929_v46 = vmul.f32 0.01, %v925_v44 }
 0x158   : > { %v930_v47 = vsel %vm926_vm12, %v924_v43, %v928_v45  ;;  %v931_v48 = vsel %vm927_vm13, %v925_v44, %v929_v46  ;;  %vm1581_vm13 = vcmask 130048  }
 0x159   : > { %1024 = vmatpush.msrb.mxu0 %v930_v47  ;;  %933 = vst.msk [vmem:[#allocation3 + $0x8] sm:$0xff] %vm727_vm8, %v931_v48 }
 0x15a   : > { %3597 = vmatmul.msk.f32.vlgmr.msrb.gmra.mxu0 %vm950_vm14, %v934_v51 }
 0x160   : > { %v937_v49 = vld [vmem:[#allocation3 + $0x8] sm:$0xff] }
 0x161   : > { %1047 = vmatpush.msrb.mxu1 %v937_v49  ;;  %v3926_v50 = vpack.i.bf16 %v937_v49, %v930_v47 }
 0x162   : > { %3599 = vmatmul.msk.f32.vlgmr.msrb.gmra.mxu1 %vm950_vm14, %v934_v51  ;;  %3598 = vmatmul.msk.f32.gmra.mxu0 %vm950_vm14, %v935_v53 }
 0x163   : > { %3927 = vrot.lane.b32.xlu0 %v3926_v50, %s4203_s21  ;;  %3912 = vrot.lane.b32.xlu2 %v3926_v50, %s4199_s17 }
 0x164   : > { %3907 = vrot.lane.b32.xlu1 %v3926_v50, %s4197_s15 }
 0x16a   : > { %3600 = vmatmul.msk.f32.gmra.mxu1 %vm950_vm14, %v935_v53 }
 0x16b   : > { %3942 = vrot.lane.b32.xlu0 %v3926_v50, %s4198_s16  ;;  %3922 = vrot.lane.b32.xlu2 %v3926_v50, %s4200_s18 }
 0x16c   : > { %3917 = vrot.lane.b32.xlu1 %v3926_v50, %s4201_s19 }
 0x173   : > { %3937 = vrot.lane.b32.xlu2 %v3926_v50, %s4204_s22 }
 0x174   : > { %3932 = vrot.lane.b32.xlu1 %v3926_v50, %s4202_s20 }
 0x17b   : > { %1521 = vperm.xlu2 %3947, %v1517_v35  }
 0x17c   : > { %1526 = vperm.xlu1 %3946, %v1518_v34  }
 0x1bd   : > { %v3913_v52 = vpop.permute.xlu2 %3912 }
 0x1be   : > { %v3915_v61 = vunpack.i.h.bf16 %v3913_v52  ;;  %v3914_v62 = vunpack.i.l.bf16 %v3913_v52 }
 0x1c0   : > { %v1062_v5 = vsel %vm479_vm5, %v3914_v62, %v3915_v61 }
 0x1c5   : > { %v3923_v54 = vpop.permute.xlu2 %3922 }
 0x1c6   : > { %v3925_v55 = vunpack.i.h.bf16 %v3923_v54  ;;  %v3924_v56 = vunpack.i.l.bf16 %v3923_v54 }
 0x1c8   : > { %1175 = vmatpush.msra.mxu1 %v3925_v55  ;;  %v1128_v57 = vsel %vm541_vm4, %v3924_v56, %v3925_v55 }
 0x1c9   : > { %1152 = vmatpush.msra.mxu0 %v1128_v57  ;;  %3611 = vmatmul.msk.f32.vlgmr.msra.gmra.mxu1 %vm950_vm14, %v3607_v58 }
 0x1ca   : > { %3609 = vmatmul.msk.f32.vlgmr.msra.gmra.mxu0 %vm950_vm14, %v3607_v58 }
 0x1cd   : > { %v3938_v26 = vpop.permute.xlu2 %3937 }
 0x1ce   : > { %v3940_v28 = vunpack.i.h.bf16 %v3938_v26  ;;  %v3939_v29 = vunpack.i.l.bf16 %v3938_v26 }
 0x1d0   : > { %v1458_v31 = vsel %vm866_vm10, %v3939_v29, %v3940_v28 }
 0x1d1   : > { %3612 = vmatmul.msk.f32.gmra.mxu1 %vm950_vm14, %v3608_v59 }
 0x1d2   : > { %3610 = vmatmul.msk.f32.gmra.mxu0 %vm950_vm14, %v3608_v59 }
 0x1d5   : > { %v3928_v4 = vpop.permute.xlu0 %3927  ;;  %v1522_v29 = vpop.permute.xlu2 %1521 }
 0x1d6   : > { %v3908_v60 = vpop.permute.xlu1 %3907  ;;  %v3930_v18 = vunpack.i.h.bf16 %v3928_v4  ;;  %v3929_v19 = vunpack.i.l.bf16 %v3928_v4 }
 0x1d7   : > { %v3910_v63 = vunpack.i.h.bf16 %v3908_v60  ;;  %v3909_v1 = vunpack.i.l.bf16 %v3908_v60  ;;  %v1026_v40 = vpop.f32.mrf.mxu0 }
 0x1d8   : > { %v1326_v23 = vsel %vm727_vm8, %v3929_v19, %v3930_v18 }
 0x1d9   : > { %995 = vmatpush.msra.mxu3 %v3910_v63  ;;  %v947_v3 = vsel %vm367_vm3, %v3909_v1, %v3910_v63 }
 0x1da   : > { %972 = vmatpush.msra.mxu2 %v947_v3  ;;  %3595 = vmatmul.msk.f32.vlgmr.msra.gmra.mxu3 %vm950_vm14, %v3591_v2 }
 0x1db   : > { %1109 = vmatpush.msrb.mxu3 %v3915_v61  ;;  %3593 = vmatmul.msk.f32.vlgmr.msra.gmra.mxu2 %vm950_vm14, %v3591_v2 }
 0x1dc   : > { %1086 = vmatpush.msrb.mxu2 %v1062_v5 }
 0x1dd   : > { %v3943_v11 = vpop.permute.xlu0 %3942 }
 0x1de   : > { %v3918_v6 = vpop.permute.xlu1 %3917  ;;  %v3945_v13 = vunpack.i.h.bf16 %v3943_v11  ;;  %v3944_v14 = vunpack.i.l.bf16 %v3943_v11 }
 0x1df   : > { %v3920_v7 = vunpack.i.h.bf16 %v3918_v6  ;;  %v3919_v8 = vunpack.i.l.bf16 %v3918_v6  ;;  %v1049_v42 = vpop.f32.mrf.mxu1  ;;  %v1029_v46 = vpop.f32.mrf.mxu0 }
 0x1e0   : > { %v1392_v22 = vsel %vm796_vm9, %v3944_v14, %v3945_v13 }
 0x1e1   : > { %1241 = vmatpush.msra.mxu3 %v3920_v7  ;;  %v1194_v10 = vsel %vm603_vm6, %v3919_v8, %v3920_v7 }
 0x1e2   : > { %3596 = vmatmul.msk.f32.gmra.mxu3 %vm950_vm14, %v3592_v9  ;;  %1218 = vmatpush.msra.mxu2 %v1194_v10 }
 0x1e3   : > { %3594 = vmatmul.msk.f32.gmra.mxu2 %vm950_vm14, %v3592_v9 }
 0x1e6   : > { %v3933_v12 = vpop.permute.xlu1 %3932 }
 0x1e7   : > { %v3935_v15 = vunpack.i.h.bf16 %v3933_v12  ;;  %v3934_v16 = vunpack.i.l.bf16 %v3933_v12  ;;  %v1052_v47 = vpop.f32.mrf.mxu1 }
 0x1e9   : > { %1307 = vmatpush.msrb.mxu1 %v3935_v15  ;;  %v1260_v20 = vsel %vm665_vm7, %v3934_v16, %v3935_v15 }
 0x1ea   : > { %3605 = vmatmul.msk.f32.vlgmr.msrb.gmra.mxu3 %vm950_vm14, %v3601_v17  ;;  %1284 = vmatpush.msrb.mxu0 %v1260_v20 }
 0x1eb   : > { %1373 = vmatpush.msrb.mxu3 %v3930_v18  ;;  %1439 = vmatpush.msra.mxu1 %v3945_v13 }
 0x1ec   : > { %3603 = vmatmul.msk.f32.vlgmr.msrb.gmra.mxu2 %vm950_vm14, %v3601_v17  ;;  %1416 = vmatpush.msra.mxu0 %v1392_v22 }
 0x1ed   : > { %1350 = vmatpush.msrb.mxu2 %v1326_v23  ;;  %3623 = vmatmul.msk.f32.vlgmr.msrb.gmra.mxu1 %vm950_vm14, %v3619_v21 }
 0x1ee   : > { %3621 = vmatmul.msk.f32.vlgmr.msrb.gmra.mxu0 %vm950_vm14, %v3619_v21 }
 0x1f2   : > { %3606 = vmatmul.msk.f32.gmra.mxu3 %vm950_vm14, %v3602_v24 }
 0x1f4   : > { %3604 = vmatmul.msk.f32.gmra.mxu2 %vm950_vm14, %v3602_v24 }
 0x1f5   : > { %3624 = vmatmul.msk.f32.gmra.mxu1 %vm950_vm14, %v3620_v25 }
 0x1f6   : > { %3622 = vmatmul.msk.f32.gmra.mxu0 %vm950_vm14, %v3620_v25 }
 0x1fa   : > { %3617 = vmatmul.msk.f32.vlgmr.msra.gmra.mxu3 %vm950_vm14, %v3613_v27 }
 0x1fb   : > { %1505 = vmatpush.msra.mxu3 %v3940_v28 }
 0x1fc   : > { %3615 = vmatmul.msk.f32.vlgmr.msra.gmra.mxu2 %vm950_vm14, %v3613_v27 }
 0x1fd   : > { %1482 = vmatpush.msra.mxu2 %v1458_v31  ;;  %3635 = vmatmul.msk.f32.vlgmr.msra.gmra.mxu1 %vm950_vm14, %v3631_v30 }
 0x1fe   : > { %3633 = vmatmul.msk.f32.vlgmr.msra.gmra.mxu0 %vm950_vm14, %v3631_v30 }
 0x202   : > { %3618 = vmatmul.msk.f32.gmra.mxu3 %vm950_vm14, %v3614_v32 }
 0x204   : > { %3616 = vmatmul.msk.f32.gmra.mxu2 %vm950_vm14, %v3614_v32 }
 0x205   : > { %3636 = vmatmul.msk.f32.gmra.mxu1 %vm950_vm14, %v3632_v33 }
 0x206   : > { %3634 = vmatmul.msk.f32.gmra.mxu0 %vm950_vm14, %v3632_v33 }
 0x20a   : > { %3629 = vmatmul.msk.f32.vlgmr.msrb.gmra.mxu3 %vm950_vm14, %v3625_v36 }
 0x20c   : > { %3627 = vmatmul.msk.f32.vlgmr.msrb.gmra.mxu2 %vm950_vm14, %v3625_v36 }
 0x212   : > { %3630 = vmatmul.msk.f32.gmra.mxu3 %vm950_vm14, %v3626_v37 }
 0x214   : > { %3628 = vmatmul.msk.f32.gmra.mxu2 %vm950_vm14, %v3626_v37 }
 0x21a   : > { %3641 = vmatmul.msk.f32.vlgmr.msra.gmra.mxu3 %vm950_vm14, %v3637_v38 }
 0x21c   : > { %3639 = vmatmul.msk.f32.vlgmr.msra.gmra.mxu2 %vm950_vm14, %v3637_v38 }
 0x222   : > { %3642 = vmatmul.msk.f32.gmra.mxu3 %vm950_vm14, %v3638_v39 }
 0x224   : > { %3640 = vmatmul.msk.f32.gmra.mxu2 %vm950_vm14, %v3638_v39  ;;  %vm345_vm14 = vcmask 326656  }
 0x225   : > { %346 = vst.msk [vmem:[#allocation5 + $0x8] sm:$0xff] %vm345_vm14, %v4196_v0 }
 0x226   : > { %348 = vst.msk [vmem:[#allocation5 + $0x18] sm:$0xff] %vm345_vm14, %v4196_v0 }
 0x227   : > { %350 = vst.msk [vmem:[#allocation5 + $0x28] sm:$0xff] %vm345_vm14, %v4196_v0 }
 0x228   : > { %352 = vst.msk [vmem:[#allocation5 + $0x38] sm:$0xff] %vm345_vm14, %v4196_v0 }
 0x246   : > { %v1177_v50 = vpop.f32.mrf.mxu1 }
 0x247   : > { %v1154_v51 = vpop.f32.mrf.mxu0 }
 0x24e   : > { %v1180_v54 = vpop.f32.mrf.mxu1 }
 0x24f   : > { %v1157_v55 = vpop.f32.mrf.mxu0 }
 0x25d   : > { %v997_v41 = vpop.f32.mrf.mxu3 }
 0x25e   : > { %v974_v43 = vpop.f32.mrf.mxu2  ;;  %v1050_v62 = vadd.f32 %v1049_v42, %v997_v41 }
 0x25f   : > { %v1027_v63 = vadd.f32 %v1026_v40, %v974_v43 }
 0x265   : > { %v1000_v44 = vpop.f32.mrf.mxu3 }
 0x266   : > { %v977_v45 = vpop.f32.mrf.mxu2  ;;  %v1053_v8 = vadd.f32 %v1052_v47, %v1000_v44  ;;  %v1527_v47 = vpop.permute.xlu1 %1526 }
 0x267   : > { %v1030_v11 = vadd.f32 %v1029_v46, %v977_v45 }
 0x26a   : > { %v1309_v58 = vpop.f32.mrf.mxu1 }
 0x26b   : > { %v1286_v59 = vpop.f32.mrf.mxu0 }
 0x26d   : > { %v1111_v48 = vpop.f32.mrf.mxu3 }
 0x26e   : > { %v1118_v1 = vadd.f32 %v1111_v48, %v1050_v62 }
 0x26f   : > { %v1088_v49 = vpop.f32.mrf.mxu2 }
 0x270   : > { %v1117_v4 = vadd.f32 %v1088_v49, %v1027_v63  ;;  %v1184_v7 = vadd.f32 %v1177_v50, %v1118_v1  ;;  %v1550_v63 = vld [vmem:[%s5321_s5] sm:$0xff]  ;;  %v2404_v1 = vld [vmem:[%s5322_s6 + $0x18] sm:$0xff] }
 0x272   : > { %v1312_v2 = vpop.f32.mrf.mxu1  ;;  %v1183_v9 = vadd.f32 %v1154_v51, %v1117_v4  ;;  %v2402_v4 = vld [vmem:[%s5322_s6 + $0x8] sm:$0xff] }
 0x273   : > { %v1289_v5 = vpop.f32.mrf.mxu0 }
 0x275   : > { %v1114_v52 = vpop.f32.mrf.mxu3 }
 0x276   : > { %v1120_v12 = vadd.f32 %v1114_v52, %v1053_v8 }
 0x277   : > { %v1091_v53 = vpop.f32.mrf.mxu2 }
 0x278   : > { %v1119_v15 = vadd.f32 %v1091_v53, %v1030_v11  ;;  %v1186_v19 = vadd.f32 %v1180_v54, %v1120_v12 }
 0x27a   : > { %v1441_v17 = vpop.f32.mrf.mxu1  ;;  %v1185_v23 = vadd.f32 %v1157_v55, %v1119_v15 }
 0x27b   : > { %v1418_v22 = vpop.f32.mrf.mxu0 }
 0x27d   : > { %v1243_v56 = vpop.f32.mrf.mxu3 }
 0x27e   : > { %v1250_v10 = vadd.f32 %v1243_v56, %v1184_v7  ;;  %v1553_v7 = vld [vmem:[%s5321_s5 + $0x18] sm:$0xff] }
 0x27f   : > { %v1220_v57 = vpop.f32.mrf.mxu2 }
 0x280   : > { %v1249_v13 = vadd.f32 %v1220_v57, %v1183_v9  ;;  %v1316_v16 = vadd.f32 %v1309_v58, %v1250_v10 }
 0x282   : > { %v1315_v20 = vadd.f32 %v1286_v59, %v1249_v13  ;;  %v1444_v38 = vpop.f32.mrf.mxu1 }
 0x283   : > { %v1421_v42 = vpop.f32.mrf.mxu0 }
 0x285   : > { %v1246_v60 = vpop.f32.mrf.mxu3 }
 0x286   : > { %v1252_v24 = vadd.f32 %v1246_v60, %v1186_v19 }
 0x287   : > { %v1223_v61 = vpop.f32.mrf.mxu2 }
 0x288   : > { %v1251_v26 = vadd.f32 %v1223_v61, %v1185_v23  ;;  %v1318_v30 = vadd.f32 %v1312_v2, %v1252_v24  ;;  %v2403_v2 = vld [vmem:[%s5322_s6 + $0x10] sm:$0xff] }
 0x28a   : > { %v1317_v34 = vadd.f32 %v1289_v5, %v1251_v26  ;;  %v1551_v5 = vld [vmem:[%s5321_s5 + $0x8] sm:$0xff]  ;;  %v3643_v26 = vld [vmem:[%s5321_s5 + $0x20] sm:$0xff] }
 0x28d   : > { %v1375_v3 = vpop.f32.mrf.mxu3 }
 0x28e   : > { %v1382_v21 = vadd.f32 %v1375_v3, %v1316_v16  ;;  %v2401_v3 = vld [vmem:[%s5322_s6] sm:$0xff] }
 0x28f   : > { %v1352_v6 = vpop.f32.mrf.mxu2 }
 0x290   : > { %v1381_v25 = vadd.f32 %v1352_v6, %v1315_v20  ;;  %v1448_v27 = vadd.f32 %v1441_v17, %v1382_v21  ;;  %v1552_v6 = vld [vmem:[%s5321_s5 + $0x10] sm:$0xff] }
 0x292   : > { %v1447_v31 = vadd.f32 %v1418_v22, %v1381_v25 }
 0x295   : > { %v1378_v14 = vpop.f32.mrf.mxu3 }
 0x296   : > { %v1384_v35 = vadd.f32 %v1378_v14, %v1318_v30 }
 0x297   : > { %v1355_v18 = vpop.f32.mrf.mxu2 }
 0x298   : > { %v1383_v39 = vadd.f32 %v1355_v18, %v1317_v34  ;;  %v1450_v43 = vadd.f32 %v1444_v38, %v1384_v35 }
 0x29a   : > { %v1449_v48 = vadd.f32 %v1421_v42, %v1383_v39  ;;  %v3644_v39 = vld [vmem:[%s5321_s5 + $0x28] sm:$0xff] }
 0x29d   : > { %v1507_v28 = vpop.f32.mrf.mxu3 }
 0x29e   : > { %v1514_v32 = vadd.f32 %v1507_v28, %v1448_v27 }
 0x29f   : > { %v1484_v33 = vpop.f32.mrf.mxu2 }
 0x2a0   : > { %v1513_v36 = vadd.f32 %v1484_v33, %v1447_v31  ;;  %v1530_v37 = vadd.f32 %v1522_v29, %v1514_v32  ;;  %v3675_v31 = vld [vmem:[%s5321_s5 + $0x60] sm:$0xff] }
 0x2a2   : > { %v1529_v40 = vadd.f32 %v1522_v29, %v1513_v36  ;;  %vm1534_vm1 = vcmp.ge.f32.partialorder %v1530_v37, 0.0  ;;  %v1538_v41 = vmul.f32 0.01, %v1530_v37 }
 0x2a4   : > { %vm1533_vm2 = vcmp.ge.f32.partialorder %v1529_v40, 0.0  ;;  %v1537_v44 = vmul.f32 0.01, %v1529_v40  ;;  %v1542_v45 = vsel %vm1534_vm1, %v1530_v37, %v1538_v41 }
 0x2a5   : > { %1547 = vst.msk [vmem:[#allocation4 + $0x8] sm:$0xff] %vm1546_vm0, %v1542_v45  ;;  %v1510_v46 = vpop.f32.mrf.mxu3 }
 0x2a6   : > { %v1541_v49 = vsel %vm1533_vm2, %v1529_v40, %v1537_v44  ;;  %v1516_v50 = vadd.f32 %v1510_v46, %v1450_v43  ;;  %v3676_v40 = vld [vmem:[%s5321_s5 + $0x68] sm:$0xff] }
 0x2a7   : > { %v1487_v51 = vpop.f32.mrf.mxu2 }
 0x2a8   : > { %v1515_v52 = vadd.f32 %v1487_v51, %v1449_v48  ;;  %v1532_v53 = vadd.f32 %v1527_v47, %v1516_v50  ;;  %v3645_v48 = vld [vmem:[%s5321_s5 + $0x30] sm:$0xff] }
 0x2a9   : > { %v3677_v50 = vld [vmem:[%s5321_s5 + $0x70] sm:$0xff] }
 0x2aa   : > { %v1531_v54 = vadd.f32 %v1527_v47, %v1515_v52  ;;  %vm1536_vm11 = vcmp.ge.f32.partialorder %v1532_v53, 0.0  ;;  %v1540_v55 = vmul.f32 0.01, %v1532_v53 }
 0x2ac   : > { %vm1535_vm12 = vcmp.ge.f32.partialorder %v1531_v54, 0.0  ;;  %v1539_v56 = vmul.f32 0.01, %v1531_v54  ;;  %v1544_v57 = vsel %vm1536_vm11, %v1532_v53, %v1540_v55  ;;  %v1555_v58 = vld [vmem:[#allocation4 + $0x8] sm:$0xff]  ;;  %v3646_v55 = vld [vmem:[%s5321_s5 + $0x38] sm:$0xff] }
 0x2ad   : > { %1549 = vst.msk [vmem:[#allocation4 + $0x18] sm:$0xff] %vm1546_vm0, %v1544_v57  ;;  %v3953_v59 = vpack.i.bf16 %v1555_v58, %v1541_v49  ;;  %v3678_v57 = vld [vmem:[%s5321_s5 + $0x78] sm:$0xff] }
 0x2ae   : > { %v1543_v60 = vsel %vm1535_vm12, %v1531_v54, %v1539_v56 }
 0x2af   : > { %3954 = vrot.lane.b32.xlu1 %v3953_v59, %s4197_s15  ;;  %1678 = vmatpush.msrb.mxu3 %v1543_v60 }
 0x2b1   : > { %1679 = vmatpush.msrb.mxu3 %v1541_v49 }
 0x2b2   : > { %3655 = vmatmul.msk.f32.vlgmr.msrb.gmra.mxu3 %vm1581_vm13, %v1550_v63 }
 0x2b4   : > { %v1557_v61 = vld [vmem:[#allocation4 + $0x18] sm:$0xff] }
 0x2b5   : > { %v3958_v62 = vpack.i.bf16 %v1557_v61, %v1543_v60  ;;  %1707 = vmatpush.msra.mxu3 %v1557_v61 }
 0x2b7   : > { %3959 = vrot.lane.b32.xlu2 %v3958_v62, %s4199_s17  ;;  %3949 = vrot.lane.b32.xlu0 %v3958_v62, %s4197_s15 }
 0x2b8   : > { %3969 = vrot.lane.b32.xlu1 %v3958_v62, %s4200_s18  ;;  %1708 = vmatpush.msra.mxu3 %v1555_v58 }
 0x2ba   : > { %3656 = vmatmul.msk.f32.gmra.mxu3 %vm1581_vm13, %v1551_v5 }
 0x2bf   : > { %3974 = vrot.lane.b32.xlu2 %v3953_v59, %s4200_s18  ;;  %3964 = vrot.lane.b32.xlu0 %v3953_v59, %s4199_s17 }
 0x2c0   : > { %3984 = vrot.lane.b32.xlu1 %v3953_v59, %s4201_s19 }
 0x2c2   : > { %3657 = vmatmul.msk.f32.gmra.mxu3 %vm1581_vm13, %v1552_v6 }
 0x2c7   : > { %3989 = vrot.lane.b32.xlu2 %v3958_v62, %s4202_s20  ;;  %3979 = vrot.lane.b32.xlu0 %v3958_v62, %s4201_s19 }
 0x2c8   : > { %3999 = vrot.lane.b32.xlu1 %v3958_v62, %s4203_s21 }
 0x2ca   : > { %3658 = vmatmul.msk.f32.gmra.mxu3 %vm1581_vm13, %v1553_v7 }
 0x2cf   : > { %4004 = vrot.lane.b32.xlu2 %v3953_v59, %s4203_s21  ;;  %3994 = vrot.lane.b32.xlu0 %v3953_v59, %s4202_s20 }
 0x2d0   : > { %4014 = vrot.lane.b32.xlu1 %v3953_v59, %s4198_s16 }
 0x2d2   : > { %3659 = vmatmul.msk.f32.vlgmr.msra.gmra.mxu3 %vm1581_vm13, %v1550_v63 }
 0x2d7   : > { %4019 = vrot.lane.b32.xlu2 %v3958_v62, %s4204_s22  ;;  %4009 = vrot.lane.b32.xlu0 %v3958_v62, %s4198_s16 }
 0x2d8   : > { %2422 = vperm.xlu1 %3946, %v2404_v1  }
 0x2da   : > { %3660 = vmatmul.msk.f32.gmra.mxu3 %vm1581_vm13, %v1551_v5 }
 0x2df   : > { %2417 = vperm.xlu2 %3947, %v2403_v2   ;;  %4024 = vrot.lane.b32.xlu0 %v3953_v59, %s4204_s22  ;;  %v3663_v2 = vld [vmem:[%s5321_s5 + $0x40] sm:$0xff] }
 0x2e0   : > { %2407 = vperm.xlu1 %3946, %v2401_v3  }
 0x2e2   : > { %3661 = vmatmul.msk.f32.gmra.mxu3 %vm1581_vm13, %v1552_v6 }
 0x2e7   : > { %2412 = vperm.xlu0 %3905, %v2402_v4  }
 0x2ea   : > { %3662 = vmatmul.msk.f32.gmra.mxu3 %vm1581_vm13, %v1553_v7 }
 0x311   : > { %v3960_v8 = vpop.permute.xlu2 %3959 }
 0x312   : > { %v3962_v27 = vunpack.i.h.bf16 %v3960_v8  ;;  %v3961_v28 = vunpack.i.l.bf16 %v3960_v8  ;;  %v3699_v8 = vld [vmem:[%s5321_s5 + $0xa0] sm:$0xff] }
 0x314   : > { %v1736_v34 = vsel %vm479_vm5, %v3961_v28, %v3962_v27  ;;  %v3724_v28 = vld [vmem:[%s5321_s5 + $0xe8] sm:$0xff] }
 0x319   : > { %v3975_v9 = vpop.permute.xlu2 %3974 }
 0x31a   : > { %v3977_v18 = vunpack.i.h.bf16 %v3975_v9  ;;  %v3976_v19 = vunpack.i.l.bf16 %v3975_v9 }
 0x31c   : > { %v1832_v30 = vsel %vm541_vm4, %v3976_v19, %v3977_v18  ;;  %v3687_v19 = vld [vmem:[%s5321_s5 + $0x80] sm:$0xff] }
 0x321   : > { %v3955_v10 = vpop.permute.xlu1 %3954  ;;  %v3990_v12 = vpop.permute.xlu2 %3989 }
 0x322   : > { %v3957_v13 = vunpack.i.h.bf16 %v3955_v10  ;;  %v3956_v14 = vunpack.i.l.bf16 %v3955_v10  ;;  %v3992_v23 = vunpack.i.h.bf16 %v3990_v12  ;;  %v3991_v24 = vunpack.i.l.bf16 %v3990_v12  ;;  %v3700_v12 = vld [vmem:[%s5321_s5 + $0xa8] sm:$0xff] }
 0x324   : > { %v1575_v29 = vsel %vm367_vm3, %v3956_v14, %v3957_v13  ;;  %v2027_v32 = vsel %vm665_vm7, %v3991_v24, %v3992_v23  ;;  %v3701_v14 = vld [vmem:[%s5321_s5 + $0xb0] sm:$0xff]  ;;  %v3723_v24 = vld [vmem:[%s5321_s5 + $0xe0] sm:$0xff] }
 0x329   : > { %v3950_v11 = vpop.permute.xlu0 %3949  ;;  %v4005_v1 = vpop.permute.xlu2 %4004 }
 0x32a   : > { %v3952_v15 = vunpack.i.h.bf16 %v3950_v11  ;;  %v3951_v16 = vunpack.i.l.bf16 %v3950_v11  ;;  %v3970_v17 = vpop.permute.xlu1 %3969  ;;  %v4007_v6 = vunpack.i.h.bf16 %v4005_v1  ;;  %v4006_v7 = vunpack.i.l.bf16 %v4005_v1  ;;  %v3664_v11 = vld [vmem:[%s5321_s5 + $0x48] sm:$0xff] }
 0x32b   : > { %v3972_v20 = vunpack.i.h.bf16 %v3970_v17  ;;  %v3971_v21 = vunpack.i.l.bf16 %v3970_v17 }
 0x32c   : > { %1637 = vmatpush.msrb.mxu1 %v3952_v15  ;;  %v1576_v22 = vsel %vm367_vm3, %v3951_v16, %v3952_v15  ;;  %v2123_v10 = vsel %vm727_vm8, %v4006_v7, %v4007_v6  ;;  %v3666_v15 = vld [vmem:[%s5321_s5 + $0x58] sm:$0xff] }
 0x32d   : > { %1893 = vmatpush.msrb.mxu3 %v3972_v20  ;;  %1608 = vmatpush.msrb.mxu0 %v1576_v22  ;;  %v1833_v25 = vsel %vm541_vm4, %v3971_v21, %v3972_v20  ;;  %v3702_v16 = vld [vmem:[%s5321_s5 + $0xb8] sm:$0xff] }
 0x32e   : > { %1864 = vmatpush.msrb.mxu2 %v1833_v25  ;;  %1638 = vmatpush.msrb.mxu1 %v3957_v13  ;;  %v3665_v13 = vld [vmem:[%s5321_s5 + $0x50] sm:$0xff] }
 0x32f   : > { %1894 = vmatpush.msrb.mxu3 %v3977_v18  ;;  %1609 = vmatpush.msrb.mxu0 %v1575_v29  ;;  %v3689_v29 = vld [vmem:[%s5321_s5 + $0x90] sm:$0xff] }
 0x330   : > { %3651 = vmatmul.msk.f32.vlgmr.msrb.gmra.mxu1 %vm1581_vm13, %v3643_v26  ;;  %1865 = vmatpush.msrb.mxu2 %v1832_v30  ;;  %v3725_v30 = vld [vmem:[%s5321_s5 + $0xf0] sm:$0xff] }
 0x331   : > { %1796 = vmatpush.msra.mxu1 %v3962_v27  ;;  %2087 = vmatpush.msra.mxu3 %v3992_v23  ;;  %v3965_v33 = vpop.permute.xlu0 %3964  ;;  %v4020_v17 = vpop.permute.xlu2 %4019  ;;  %v3688_v27 = vld [vmem:[%s5321_s5 + $0x88] sm:$0xff] }
 0x332   : > { %3647 = vmatmul.msk.f32.vlgmr.msrb.gmra.mxu0 %vm1581_vm13, %v3643_v26  ;;  %2058 = vmatpush.msra.mxu2 %v2027_v32  ;;  %v3967_v35 = vunpack.i.h.bf16 %v3965_v33  ;;  %v3966_v36 = vunpack.i.l.bf16 %v3965_v33  ;;  %v3985_v37 = vpop.permute.xlu1 %3984  ;;  %v4022_v20 = vunpack.i.h.bf16 %v4020_v17  ;;  %v4021_v21 = vunpack.i.l.bf16 %v4020_v17  ;;  %v3726_v33 = vld [vmem:[%s5321_s5 + $0xf8] sm:$0xff] }
 0x333   : > { %1767 = vmatpush.msra.mxu0 %v1736_v34  ;;  %3683 = vmatmul.msk.f32.vlgmr.msrb.gmra.mxu3 %vm1581_vm13, %v3675_v31  ;;  %v3987_v42 = vunpack.i.h.bf16 %v3985_v37  ;;  %v3986_v43 = vunpack.i.l.bf16 %v3985_v37  ;;  %v3711_v34 = vld [vmem:[%s5321_s5 + $0xc0] sm:$0xff] }
 0x334   : > { %1797 = vmatpush.msra.mxu1 %v3967_v35  ;;  %v1735_v38 = vsel %vm479_vm5, %v3966_v36, %v3967_v35  ;;  %3679 = vmatmul.msk.f32.vlgmr.msrb.gmra.mxu2 %vm1581_vm13, %v3675_v31  ;;  %v2318_v25 = vsel %vm866_vm10, %v4021_v21, %v4022_v20  ;;  %v3690_v31 = vld [vmem:[%s5321_s5 + $0x98] sm:$0xff]  ;;  %v3712_v36 = vld [vmem:[%s5321_s5 + $0xc8] sm:$0xff] }
 0x335   : > { %1768 = vmatpush.msra.mxu0 %v1735_v38  ;;  %v1929_v49 = vsel %vm603_vm6, %v3986_v43, %v3987_v42  ;;  %v4664_v32 = vpop.f32.mrf.mxu3  ;;  %v3713_v38 = vld [vmem:[%s5321_s5 + $0xd0] sm:$0xff]  ;;  %v3735_v43 = vld [vmem:[%s5321_s5 + $0x100] sm:$0xff] }
 0x338   : > { %3652 = vmatmul.msk.f32.gmra.mxu1 %vm1581_vm13, %v3644_v39 }
 0x339   : > { %v3980_v41 = vpop.permute.xlu0 %3979 }
 0x33a   : > { %3648 = vmatmul.msk.f32.gmra.mxu0 %vm1581_vm13, %v3644_v39  ;;  %v3982_v44 = vunpack.i.h.bf16 %v3980_v41  ;;  %v3981_v45 = vunpack.i.l.bf16 %v3980_v41  ;;  %v4000_v47 = vpop.permute.xlu1 %3999 }
 0x33b   : > { %3684 = vmatmul.msk.f32.gmra.mxu3 %vm1581_vm13, %v3676_v40  ;;  %v4002_v3 = vunpack.i.h.bf16 %v4000_v47  ;;  %v4001_v4 = vunpack.i.l.bf16 %v4000_v47 }
 0x33c   : > { %1990 = vmatpush.msrb.mxu1 %v3982_v44  ;;  %v1930_v46 = vsel %vm603_vm6, %v3981_v45, %v3982_v44  ;;  %3680 = vmatmul.msk.f32.gmra.mxu2 %vm1581_vm13, %v3676_v40  ;;  %v3714_v40 = vld [vmem:[%s5321_s5 + $0xd8] sm:$0xff] }
 0x33d   : > { %1961 = vmatpush.msrb.mxu0 %v1930_v46  ;;  %v2124_v9 = vsel %vm727_vm8, %v4001_v4, %v4002_v3  ;;  %v4676_v35 = vpop.f32.mrf.mxu3  ;;  %v3736_v46 = vld [vmem:[%s5321_s5 + $0x108] sm:$0xff] }
 0x33e   : > { %1991 = vmatpush.msrb.mxu1 %v3987_v42 }
 0x33f   : > { %1962 = vmatpush.msrb.mxu0 %v1929_v49 }
 0x340   : > { %3653 = vmatmul.msk.f32.gmra.mxu1 %vm1581_vm13, %v3645_v48 }
 0x341   : > { %v3995_v51 = vpop.permute.xlu0 %3994 }
 0x342   : > { %3649 = vmatmul.msk.f32.gmra.mxu0 %vm1581_vm13, %v3645_v48  ;;  %v3997_v52 = vunpack.i.h.bf16 %v3995_v51  ;;  %v3996_v53 = vunpack.i.l.bf16 %v3995_v51  ;;  %v4015_v56 = vpop.permute.xlu1 %4014 }
 0x343   : > { %3685 = vmatmul.msk.f32.gmra.mxu3 %vm1581_vm13, %v3677_v50  ;;  %v4017_v59 = vunpack.i.h.bf16 %v4015_v56  ;;  %v4016_v60 = vunpack.i.l.bf16 %v4015_v56 }
 0x344   : > { %2088 = vmatpush.msra.mxu3 %v3997_v52  ;;  %v2026_v54 = vsel %vm665_vm7, %v3996_v53, %v3997_v52  ;;  %3681 = vmatmul.msk.f32.gmra.mxu2 %vm1581_vm13, %v3677_v50  ;;  %v3737_v50 = vld [vmem:[%s5321_s5 + $0x110] sm:$0xff] }
 0x345   : > { %2059 = vmatpush.msra.mxu2 %v2026_v54  ;;  %v2220_v5 = vsel %vm796_vm9, %v4016_v60, %v4017_v59  ;;  %v4684_v37 = vpop.f32.mrf.mxu3  ;;  %v3738_v54 = vld [vmem:[%s5321_s5 + $0x118] sm:$0xff] }
 0x348   : > { %3654 = vmatmul.msk.f32.gmra.mxu1 %vm1581_vm13, %v3646_v55 }
 0x349   : > { %v4010_v58 = vpop.permute.xlu0 %4009 }
 0x34a   : > { %3650 = vmatmul.msk.f32.gmra.mxu0 %vm1581_vm13, %v3646_v55  ;;  %v4012_v61 = vunpack.i.h.bf16 %v4010_v58  ;;  %v4011_v62 = vunpack.i.l.bf16 %v4010_v58 }
 0x34b   : > { %3686 = vmatmul.msk.f32.gmra.mxu3 %vm1581_vm13, %v3678_v57 }
 0x34c   : > { %2281 = vmatpush.msrb.mxu3 %v4012_v61  ;;  %v2221_v63 = vsel %vm796_vm9, %v4011_v62, %v4012_v61  ;;  %3682 = vmatmul.msk.f32.gmra.mxu2 %vm1581_vm13, %v3678_v57 }
 0x34d   : > { %2252 = vmatpush.msrb.mxu2 %v2221_v63  ;;  %v4692_v39 = vpop.f32.mrf.mxu3 }
 0x34e   : > { %2282 = vmatpush.msrb.mxu3 %v4017_v59 }
 0x34f   : > { %2253 = vmatpush.msrb.mxu2 %v2220_v5 }
 0x350   : > { %3671 = vmatmul.msk.f32.vlgmr.msra.gmra.mxu1 %vm1581_vm13, %v3663_v2 }
 0x351   : > { %2184 = vmatpush.msra.mxu1 %v4002_v3  ;;  %v4025_v18 = vpop.permute.xlu0 %4024 }
 0x352   : > { %3667 = vmatmul.msk.f32.vlgmr.msra.gmra.mxu0 %vm1581_vm13, %v3663_v2  ;;  %v4027_v22 = vunpack.i.h.bf16 %v4025_v18  ;;  %v4026_v23 = vunpack.i.l.bf16 %v4025_v18 }
 0x353   : > { %2155 = vmatpush.msra.mxu0 %v2124_v9  ;;  %2185 = vmatpush.msra.mxu1 %v4007_v6 }
 0x354   : > { %3707 = vmatmul.msk.f32.vlgmr.msra.gmra.mxu3 %vm1581_vm13, %v3699_v8  ;;  %3703 = vmatmul.msk.f32.vlgmr.msra.gmra.mxu2 %vm1581_vm13, %v3699_v8  ;;  %v2317_v26 = vsel %vm866_vm10, %v4026_v23, %v4027_v22 }
 0x355   : > { %2156 = vmatpush.msra.mxu0 %v2123_v10  ;;  %v4701_v42 = vpop.f32.mrf.mxu3 }
 0x358   : > { %3672 = vmatmul.msk.f32.gmra.mxu1 %vm1581_vm13, %v3664_v11 }
 0x35a   : > { %3668 = vmatmul.msk.f32.gmra.mxu0 %vm1581_vm13, %v3664_v11 }
 0x35c   : > { %3708 = vmatmul.msk.f32.gmra.mxu3 %vm1581_vm13, %v3700_v12  ;;  %3704 = vmatmul.msk.f32.gmra.mxu2 %vm1581_vm13, %v3700_v12 }
 0x35d   : > { %v4717_v48 = vpop.f32.mrf.mxu3 }
 0x360   : > { %3673 = vmatmul.msk.f32.gmra.mxu1 %vm1581_vm13, %v3665_v13 }
 0x362   : > { %3669 = vmatmul.msk.f32.gmra.mxu0 %vm1581_vm13, %v3665_v13 }
 0x364   : > { %3709 = vmatmul.msk.f32.gmra.mxu3 %vm1581_vm13, %v3701_v14  ;;  %3705 = vmatmul.msk.f32.gmra.mxu2 %vm1581_vm13, %v3701_v14 }
 0x365   : > { %v4729_v52 = vpop.f32.mrf.mxu3 }
 0x368   : > { %3674 = vmatmul.msk.f32.gmra.mxu1 %vm1581_vm13, %v3666_v15 }
 0x36a   : > { %3670 = vmatmul.msk.f32.gmra.mxu0 %vm1581_vm13, %v3666_v15 }
 0x36c   : > { %3710 = vmatmul.msk.f32.gmra.mxu3 %vm1581_vm13, %v3702_v16  ;;  %3706 = vmatmul.msk.f32.gmra.mxu2 %vm1581_vm13, %v3702_v16 }
 0x36d   : > { %v4741_v56 = vpop.f32.mrf.mxu3 }
 0x370   : > { %3695 = vmatmul.msk.f32.vlgmr.msrb.gmra.mxu1 %vm1581_vm13, %v3687_v19 }
 0x371   : > { %2378 = vmatpush.msrb.mxu1 %v4022_v20 }
 0x372   : > { %3691 = vmatmul.msk.f32.vlgmr.msrb.gmra.mxu0 %vm1581_vm13, %v3687_v19 }
 0x373   : > { %2349 = vmatpush.msrb.mxu0 %v2318_v25  ;;  %2379 = vmatpush.msrb.mxu1 %v4027_v22 }
 0x374   : > { %3731 = vmatmul.msk.f32.vlgmr.msrb.gmra.mxu3 %vm1581_vm13, %v3723_v24  ;;  %3727 = vmatmul.msk.f32.vlgmr.msrb.gmra.mxu2 %vm1581_vm13, %v3723_v24 }
 0x375   : > { %2350 = vmatpush.msrb.mxu0 %v2317_v26 }
 0x378   : > { %3696 = vmatmul.msk.f32.gmra.mxu1 %vm1581_vm13, %v3688_v27 }
 0x37a   : > { %3692 = vmatmul.msk.f32.gmra.mxu0 %vm1581_vm13, %v3688_v27 }
 0x37c   : > { %3732 = vmatmul.msk.f32.gmra.mxu3 %vm1581_vm13, %v3724_v28  ;;  %3728 = vmatmul.msk.f32.gmra.mxu2 %vm1581_vm13, %v3724_v28 }
 0x380   : > { %3697 = vmatmul.msk.f32.gmra.mxu1 %vm1581_vm13, %v3689_v29 }
 0x382   : > { %3693 = vmatmul.msk.f32.gmra.mxu0 %vm1581_vm13, %v3689_v29 }
 0x384   : > { %3733 = vmatmul.msk.f32.gmra.mxu3 %vm1581_vm13, %v3725_v30  ;;  %3729 = vmatmul.msk.f32.gmra.mxu2 %vm1581_vm13, %v3725_v30 }
 0x388   : > { %3698 = vmatmul.msk.f32.gmra.mxu1 %vm1581_vm13, %v3690_v31 }
 0x38a   : > { %3694 = vmatmul.msk.f32.gmra.mxu0 %vm1581_vm13, %v3690_v31 }
 0x38c   : > { %3734 = vmatmul.msk.f32.gmra.mxu3 %vm1581_vm13, %v3726_v33  ;;  %3730 = vmatmul.msk.f32.gmra.mxu2 %vm1581_vm13, %v3726_v33 }
 0x390   : > { %3719 = vmatmul.msk.f32.vlgmr.msra.gmra.mxu1 %vm1581_vm13, %v3711_v34 }
 0x392   : > { %3715 = vmatmul.msk.f32.vlgmr.msra.gmra.mxu0 %vm1581_vm13, %v3711_v34 }
 0x398   : > { %3720 = vmatmul.msk.f32.gmra.mxu1 %vm1581_vm13, %v3712_v36 }
 0x39a   : > { %3716 = vmatmul.msk.f32.gmra.mxu0 %vm1581_vm13, %v3712_v36 }
 0x3a0   : > { %3721 = vmatmul.msk.f32.gmra.mxu1 %vm1581_vm13, %v3713_v38 }
 0x3a2   : > { %3717 = vmatmul.msk.f32.gmra.mxu0 %vm1581_vm13, %v3713_v38 }
 0x3a8   : > { %3722 = vmatmul.msk.f32.gmra.mxu1 %vm1581_vm13, %v3714_v40 }
 0x3aa   : > { %3718 = vmatmul.msk.f32.gmra.mxu0 %vm1581_vm13, %v3714_v40 }
 0x3ad   : > { %v4699_v41 = vpop.f32.mrf.mxu1 }
 0x3ae   : > { %v1711_v29 = vadd.f32 %v4701_v42, %v4699_v41 }
 0x3af   : > { %v4706_v44 = vpop.f32.mrf.mxu0 }
 0x3b0   : > { %3743 = vmatmul.msk.f32.vlgmr.msrb.gmra.mxu1 %vm1581_vm13, %v3735_v43  ;;  %v1682_v31 = vadd.f32 %v4664_v32, %v4706_v44 }
 0x3b2   : > { %3739 = vmatmul.msk.f32.vlgmr.msrb.gmra.mxu0 %vm1581_vm13, %v3735_v43 }
 0x3b5   : > { %v4710_v45 = vpop.f32.mrf.mxu1 }
 0x3b6   : > { %v1896_v59 = vpop.f32.mrf.mxu3  ;;  %v1714_v40 = vadd.f32 %v4717_v48, %v4710_v45 }
 0x3b7   : > { %v4715_v47 = vpop.f32.mrf.mxu0  ;;  %v1867_v60 = vpop.f32.mrf.mxu2 }
 0x3b8   : > { %3744 = vmatmul.msk.f32.gmra.mxu1 %vm1581_vm13, %v3736_v46  ;;  %v1685_v41 = vadd.f32 %v4676_v35, %v4715_v47 }
 0x3ba   : > { %3740 = vmatmul.msk.f32.gmra.mxu0 %vm1581_vm13, %v3736_v46 }
 0x3bd   : > { %v4721_v49 = vpop.f32.mrf.mxu1 }
 0x3be   : > { %v1899_v63 = vpop.f32.mrf.mxu3  ;;  %v1717_v48 = vadd.f32 %v4729_v52, %v4721_v49 }
 0x3bf   : > { %v4726_v51 = vpop.f32.mrf.mxu0  ;;  %v1870_v2 = vpop.f32.mrf.mxu2 }
 0x3c0   : > { %3745 = vmatmul.msk.f32.gmra.mxu1 %vm1581_vm13, %v3737_v50  ;;  %v1688_v35 = vadd.f32 %v4684_v37, %v4726_v51 }
 0x3c2   : > { %3741 = vmatmul.msk.f32.gmra.mxu0 %vm1581_vm13, %v3737_v50 }
 0x3c5   : > { %v4732_v53 = vpop.f32.mrf.mxu1 }
 0x3c6   : > { %v4747_v5 = vpop.f32.mrf.mxu3  ;;  %v1720_v37 = vadd.f32 %v4741_v56, %v4732_v53 }
 0x3c7   : > { %v4737_v55 = vpop.f32.mrf.mxu0  ;;  %v4751_v7 = vpop.f32.mrf.mxu2 }
 0x3c8   : > { %3746 = vmatmul.msk.f32.gmra.mxu1 %vm1581_vm13, %v3738_v54 }
 0x3ca   : > { %3742 = vmatmul.msk.f32.gmra.mxu0 %vm1581_vm13, %v3738_v54  ;;  %v4787_v54 = vpop.permute.xlu1 %2422 }
 0x3cd   : > { %v1799_v57 = vpop.f32.mrf.mxu1 }
 0x3ce   : > { %v4753_v10 = vpop.f32.mrf.mxu3  ;;  %v1812_v33 = vadd.f32 %v1799_v57, %v1711_v29 }
 0x3cf   : > { %v1770_v58 = vpop.f32.mrf.mxu0  ;;  %v4755_v11 = vpop.f32.mrf.mxu2 }
 0x3d0   : > { %v1811_v0 = vadd.f32 %v1770_v58, %v1682_v31  ;;  %v1909_v38 = vadd.f32 %v1896_v59, %v1812_v33 }
 0x3d2   : > { %v1908_v43 = vadd.f32 %v1867_v60, %v1811_v0 }
 0x3d5   : > { %v1802_v61 = vpop.f32.mrf.mxu1 }
 0x3d6   : > { %v1814_v42 = vadd.f32 %v1802_v61, %v1714_v40  ;;  %v2408_v40 = vpop.permute.xlu1 %2407 }
 0x3d7   : > { %v1773_v62 = vpop.f32.mrf.mxu0  ;;  %v2090_v14 = vpop.f32.mrf.mxu3 }
 0x3d8   : > { %v2061_v15 = vpop.f32.mrf.mxu2  ;;  %v1813_v58 = vadd.f32 %v1773_v62, %v1685_v41  ;;  %v1911_v59 = vadd.f32 %v1899_v63, %v1814_v42 }
 0x3da   : > { %v1910_v60 = vadd.f32 %v1870_v2, %v1813_v58 }
 0x3dd   : > { %v1805_v1 = vpop.f32.mrf.mxu1 }
 0x3de   : > { %v1816_v47 = vadd.f32 %v1805_v1, %v1717_v48 }
 0x3df   : > { %v4743_v3 = vpop.f32.mrf.mxu0  ;;  %v2093_v18 = vpop.f32.mrf.mxu3 }
 0x3e0   : > { %v2064_v20 = vpop.f32.mrf.mxu2  ;;  %v1815_v62 = vadd.f32 %v4743_v3, %v1688_v35 }
 0x3e2   : > { %v1912_v51 = vadd.f32 %v4751_v7, %v1815_v62 }
 0x3e5   : > { %v4745_v4 = vpop.f32.mrf.mxu1 }
 0x3e7   : > { %v4749_v6 = vpop.f32.mrf.mxu0  ;;  %v4769_v23 = vpop.f32.mrf.mxu3 }
 0x3e8   : > { %v4771_v25 = vpop.f32.mrf.mxu2 }
 0x3ed   : > { %v1993_v8 = vpop.f32.mrf.mxu1 }
 0x3ee   : > { %v2006_v46 = vadd.f32 %v1993_v8, %v1909_v38 }
 0x3ef   : > { %v1964_v9 = vpop.f32.mrf.mxu0  ;;  %v4773_v28 = vpop.f32.mrf.mxu3 }
 0x3f0   : > { %v4777_v30 = vpop.f32.mrf.mxu2  ;;  %v2005_v32 = vadd.f32 %v1964_v9, %v1908_v43  ;;  %v2103_v29 = vadd.f32 %v2090_v14, %v2006_v46  ;;  %v1913_v43 = vadd.f32 %v4747_v5, %v1816_v47  ;;  %v1691_v5 = vadd.f32 %v4692_v39, %v4737_v55 }
 0x3f2   : > { %v2102_v33 = vadd.f32 %v2061_v15, %v2005_v32  ;;  %v1817_v56 = vadd.f32 %v4749_v6, %v1691_v5 }
 0x3f5   : > { %v1996_v12 = vpop.f32.mrf.mxu1 }
 0x3f6   : > { %v2008_v8 = vadd.f32 %v1996_v12, %v1911_v59  ;;  %v1914_v59 = vadd.f32 %v4755_v11, %v1817_v56  ;;  %v3398_v56 = vld [vmem:[%s5324_s8 + $0x18] sm:$0xff] }
 0x3f7   : > { %v1967_v13 = vpop.f32.mrf.mxu0  ;;  %v2284_v50 = vpop.f32.mrf.mxu3 }
 0x3f8   : > { %v2255_v44 = vpop.f32.mrf.mxu2  ;;  %v2007_v61 = vadd.f32 %v1967_v13, %v1910_v60  ;;  %v2105_v63 = vadd.f32 %v2093_v18, %v2008_v8 }
 0x3fa   : > { %v2104_v2 = vadd.f32 %v2064_v20, %v2007_v61  ;;  %v1818_v20 = vadd.f32 %v4745_v4, %v1720_v37  ;;  %v2418_v61 = vpop.permute.xlu2 %2417 }
 0x3fc   : > { %v1915_v55 = vadd.f32 %v4753_v10, %v1818_v20 }
 0x3fd   : > { %v4757_v16 = vpop.f32.mrf.mxu1 }
 0x3fe   : > { %v2010_v1 = vadd.f32 %v4757_v16, %v1913_v43  ;;  %v2413_v16 = vpop.permute.xlu0 %2412 }
 0x3ff   : > { %v4759_v17 = vpop.f32.mrf.mxu0  ;;  %v2287_v14 = vpop.f32.mrf.mxu3 }
 0x400   : > { %v2258_v49 = vpop.f32.mrf.mxu2 }
 0x405   : > { %v4761_v19 = vpop.f32.mrf.mxu1 }
 0x407   : > { %v4763_v21 = vpop.f32.mrf.mxu0  ;;  %v2290_v4 = vpop.f32.mrf.mxu3 }
 0x408   : > { %v2011_v10 = vadd.f32 %v4763_v21, %v1914_v59  ;;  %v2468_v59 = vld [vmem:[%s5323_s7 + $0x10] sm:$0xff] }
 0x40d   : > { %v2187_v22 = vpop.f32.mrf.mxu1 }
 0x40e   : > { %v2200_v45 = vadd.f32 %v2187_v22, %v2103_v29 }
 0x40f   : > { %v2158_v24 = vpop.f32.mrf.mxu0 }
 0x410   : > { %v2199_v0 = vadd.f32 %v2158_v24, %v2102_v33  ;;  %v2297_v9 = vadd.f32 %v2284_v50, %v2200_v45  ;;  %v2012_v33 = vadd.f32 %v4761_v19, %v1915_v55  ;;  %v2261_v45 = vpop.f32.mrf.mxu2 }
 0x412   : > { %v2296_v15 = vadd.f32 %v2255_v44, %v2199_v0  ;;  %v2109_v35 = vadd.f32 %v4773_v28, %v2012_v33  ;;  %v3402_v33 = vld [vmem:[%s5324_s8 + $0x38] sm:$0xff] }
 0x415   : > { %v2190_v26 = vpop.f32.mrf.mxu1 }
 0x416   : > { %v2202_v12 = vadd.f32 %v2190_v26, %v2105_v63  ;;  %v2009_v26 = vadd.f32 %v4759_v17, %v1912_v51 }
 0x417   : > { %v2161_v27 = vpop.f32.mrf.mxu0 }
 0x418   : > { %v2201_v3 = vadd.f32 %v2161_v27, %v2104_v2  ;;  %v2299_v50 = vadd.f32 %v2287_v14, %v2202_v12  ;;  %v2107_v27 = vadd.f32 %v4769_v23, %v2010_v1  ;;  %v2106_v44 = vadd.f32 %v4771_v25, %v2009_v26 }
 0x41a   : > { %v2298_v42 = vadd.f32 %v2258_v49, %v2201_v3 }
 0x41d   : > { %v4781_v34 = vpop.f32.mrf.mxu1 }
 0x41e   : > { %v2204_v58 = vadd.f32 %v4781_v34, %v2107_v27  ;;  %v2466_v27 = vld [vmem:[%s5323_s7] sm:$0xff] }
 0x41f   : > { %v4783_v36 = vpop.f32.mrf.mxu0 }
 0x420   : > { %v2203_v23 = vadd.f32 %v4783_v36, %v2106_v44  ;;  %v2301_v8 = vadd.f32 %v2290_v4, %v2204_v58  ;;  %v2108_v36 = vadd.f32 %v4777_v30, %v2011_v10  ;;  %v3399_v58 = vld [vmem:[%s5324_s8 + $0x20] sm:$0xff] }
 0x422   : > { %v2300_v11 = vadd.f32 %v2261_v45, %v2203_v23 }
 0x425   : > { %v4791_v57 = vpop.f32.mrf.mxu1 }
 0x426   : > { %v2206_v62 = vadd.f32 %v4791_v57, %v2109_v35 }
 0x427   : > { %v4793_v31 = vpop.f32.mrf.mxu0 }
 0x42d   : > { %v2381_v38 = vpop.f32.mrf.mxu1 }
 0x42e   : > { %v2394_v22 = vadd.f32 %v2381_v38, %v2297_v9  ;;  %v2293_v38 = vpop.f32.mrf.mxu3 }
 0x42f   : > { %v2352_v52 = vpop.f32.mrf.mxu0  ;;  %v2303_v43 = vadd.f32 %v2293_v38, %v2206_v62 }
 0x430   : > { %v2426_v24 = vadd.f32 %v2408_v40, %v2394_v22  ;;  %v2393_v46 = vadd.f32 %v2352_v52, %v2296_v15  ;;  %v2264_v22 = vpop.f32.mrf.mxu2 }
 0x432   : > { %vm2434_vm0 = vcmp.ge.f32.partialorder %v2426_v24, 0.0  ;;  %v2442_v13 = vmul.f32 0.01, %v2426_v24  ;;  %v2425_v18 = vadd.f32 %v2408_v40, %v2393_v46  ;;  %v2205_v40 = vadd.f32 %v4793_v31, %v2108_v36 }
 0x434   : > { %v2450_v41 = vsel %vm2434_vm0, %v2426_v24, %v2442_v13  ;;  %vm2433_vm1 = vcmp.ge.f32.partialorder %v2425_v18, 0.0  ;;  %v2441_v53 = vmul.f32 0.01, %v2425_v18  ;;  %v2302_v12 = vadd.f32 %v2264_v22, %v2205_v40 }
 0x435   : > { %2459 = vst.msk [vmem:[#allocation5 + $0x8] sm:$0xff] %vm2458_vm15, %v2450_v41  ;;  %v2384_v7 = vpop.f32.mrf.mxu1 }
 0x436   : > { %v4812_v32 = vsel %vm2433_vm1, %v2425_v18, %v2441_v53  ;;  %v2396_v39 = vadd.f32 %v2384_v7, %v2299_v50  ;;  %v3395_v53 = vld [vmem:[%s5324_s8] sm:$0xff]  ;;  %v3397_v7 = vld [vmem:[%s5324_s8 + $0x10] sm:$0xff] }
 0x437   : > { %v2355_v17 = vpop.f32.mrf.mxu0 }
 0x438   : > { %v2428_v29 = vadd.f32 %v2413_v16, %v2396_v39  ;;  %v2395_v6 = vadd.f32 %v2355_v17, %v2298_v42  ;;  %v3400_v42 = vld [vmem:[%s5324_s8 + $0x28] sm:$0xff] }
 0x439   : > { %v2467_v17 = vld [vmem:[%s5323_s7 + $0x8] sm:$0xff] }
 0x43a   : > { %vm2436_vm2 = vcmp.ge.f32.partialorder %v2428_v29, 0.0  ;;  %v2444_v48 = vmul.f32 0.01, %v2428_v29  ;;  %v2427_v60 = vadd.f32 %v2413_v16, %v2395_v6  ;;  %v3401_v16 = vld [vmem:[%s5324_s8 + $0x30] sm:$0xff] }
 0x43c   : > { %v2452_v0 = vsel %vm2436_vm2, %v2428_v29, %v2444_v48  ;;  %vm2435_vm11 = vcmp.ge.f32.partialorder %v2427_v60, 0.0  ;;  %v2443_v25 = vmul.f32 0.01, %v2427_v60 }
 0x43d   : > { %2461 = vst.msk [vmem:[#allocation5 + $0x18] sm:$0xff] %vm2458_vm15, %v2452_v0  ;;  %v2387_v34 = vpop.f32.mrf.mxu1 }
 0x43e   : > { %v2451_v47 = vsel %vm2435_vm11, %v2427_v60, %v2443_v25  ;;  %v2398_v19 = vadd.f32 %v2387_v34, %v2301_v8  ;;  %v2469_v25 = vld [vmem:[%s5323_s7 + $0x18] sm:$0xff] }
 0x43f   : > { %v2358_v9 = vpop.f32.mrf.mxu0 }
 0x440   : > { %v2430_v14 = vadd.f32 %v2418_v61, %v2398_v19  ;;  %v2397_v21 = vadd.f32 %v2358_v9, %v2300_v11  ;;  %v3747_v19 = vld [vmem:[%s5323_s7 + $0x40] sm:$0xff] }
 0x442   : > { %vm2438_vm12 = vcmp.ge.f32.partialorder %v2430_v14, 0.0  ;;  %v2446_v63 = vmul.f32 0.01, %v2430_v14  ;;  %v2429_v15 = vadd.f32 %v2418_v61, %v2397_v21 }
 0x444   : > { %v2454_v28 = vsel %vm2438_vm12, %v2430_v14, %v2446_v63  ;;  %vm2437_vm13 = vcmp.ge.f32.partialorder %v2429_v15, 0.0  ;;  %v2445_v49 = vmul.f32 0.01, %v2429_v15  ;;  %v2488_v52 = vld [vmem:[#allocation5 + $0x18] sm:$0xff] }
 0x445   : > { %2463 = vst.msk [vmem:[#allocation5 + $0x28] sm:$0xff] %vm2458_vm15, %v2454_v28  ;;  %v2390_v2 = vpop.f32.mrf.mxu1  ;;  %v4033_v30 = vpack.i.bf16 %v2488_v52, %v2451_v47  ;;  %v2470_v63 = vld [vmem:[%s5323_s7 + $0x20] sm:$0xff] }
 0x446   : > { %v2453_v57 = vsel %vm2437_vm13, %v2429_v15, %v2445_v49  ;;  %v2400_v24 = vadd.f32 %v2390_v2, %v2303_v43  ;;  %v3748_v43 = vld [vmem:[%s5323_s7 + $0x48] sm:$0xff] }
 0x447   : > { %v2361_v46 = vpop.f32.mrf.mxu0  ;;  %4034 = vrot.lane.b32.xlu1 %v4033_v30, %s4197_s15 }
 0x448   : > { %v2432_v31 = vadd.f32 %v4787_v54, %v2400_v24  ;;  %v2399_v37 = vadd.f32 %v2361_v46, %v2302_v12 }
 0x44a   : > { %vm2440_vm14 = vcmp.ge.f32.partialorder %v2432_v31, 0.0  ;;  %v2448_v51 = vmul.f32 0.01, %v2432_v31  ;;  %v2431_v1 = vadd.f32 %v4787_v54, %v2399_v37  ;;  %v2487_v54 = vld [vmem:[#allocation5 + $0x8] sm:$0xff] }
 0x44b   : > { %v4043_v41 = vpack.i.bf16 %v2487_v54, %v4812_v32 }
 0x44c   : > { %v2456_v3 = vsel %vm2440_vm14, %v2432_v31, %v2448_v51  ;;  %vm2439_vm0 = vcmp.ge.f32.partialorder %v2431_v1, 0.0  ;;  %v2447_v13 = vmul.f32 0.01, %v2431_v1  ;;  %v2489_v18 = vld [vmem:[#allocation5 + $0x28] sm:$0xff] }
 0x44d   : > { %2465 = vst.msk [vmem:[#allocation5 + $0x38] sm:$0xff] %vm2458_vm15, %v2456_v3  ;;  %v4028_v5 = vpack.i.bf16 %v2489_v18, %v2453_v57  ;;  %v2471_v31 = vld [vmem:[%s5323_s7 + $0x28] sm:$0xff]  ;;  %v3749_v3 = vld [vmem:[%s5323_s7 + $0x50] sm:$0xff] }
 0x44e   : > { %v2455_v20 = vsel %vm2439_vm0, %v2431_v1, %v2447_v13 }
 0x44f   : > { %4029 = vrot.lane.b32.xlu0 %v4028_v5, %s4197_s15  ;;  %4069 = vrot.lane.b32.xlu1 %v4028_v5, %s4200_s18 }
 0x450   : > { %2624 = vmatpush.msra.mxu3 %v2455_v20 }
 0x452   : > { %2625 = vmatpush.msra.mxu3 %v2453_v57 }
 0x454   : > { %v2490_v26 = vld [vmem:[#allocation5 + $0x38] sm:$0xff]  ;;  %2626 = vmatpush.msra.mxu3 %v2451_v47 }
 0x455   : > { %v4038_v50 = vpack.i.bf16 %v2490_v26, %v2455_v20 }
 0x456   : > { %2627 = vmatpush.msra.mxu3 %v4812_v32  ;;  %v3396_v32 = vld [vmem:[%s5324_s8 + $0x8] sm:$0xff] }
 0x457   : > { %4039 = vrot.lane.b32.xlu2 %v4038_v50, %s4197_s15  ;;  %4054 = vrot.lane.b32.xlu0 %v4028_v5, %s4199_s17 }
 0x458   : > { %4089 = vrot.lane.b32.xlu1 %v4038_v50, %s4199_s17  ;;  %3763 = vmatmul.msk.f32.vlgmr.msra.gmra.mxu3 %vm2458_vm15, %v2466_v27 }
 0x45f   : > { %4064 = vrot.lane.b32.xlu0 %v4033_v30, %s4199_s17  ;;  %4044 = vrot.lane.b32.xlu2 %v4043_v41, %s4197_s15 }
 0x460   : > { %4094 = vrot.lane.b32.xlu1 %v4038_v50, %s4200_s18  ;;  %3764 = vmatmul.msk.f32.gmra.mxu3 %vm2458_vm15, %v2467_v17 }
 0x467   : > { %4079 = vrot.lane.b32.xlu0 %v4038_v50, %s4201_s19  ;;  %4049 = vrot.lane.b32.xlu2 %v4028_v5, %s4201_s19 }
 0x468   : > { %4099 = vrot.lane.b32.xlu1 %v4033_v30, %s4200_s18  ;;  %3765 = vmatmul.msk.f32.gmra.mxu3 %vm2458_vm15, %v2468_v59 }
 0x46f   : > { %4084 = vrot.lane.b32.xlu0 %v4043_v41, %s4199_s17  ;;  %4059 = vrot.lane.b32.xlu2 %v4033_v30, %s4201_s19 }
 0x470   : > { %4109 = vrot.lane.b32.xlu1 %v4028_v5, %s4202_s20  ;;  %3766 = vmatmul.msk.f32.gmra.mxu3 %vm2458_vm15, %v2469_v25  ;;  %v3788_v25 = vld [vmem:[%s5323_s7 + $0xc8] sm:$0xff] }
 0x477   : > { %4119 = vrot.lane.b32.xlu0 %v4043_v41, %s4202_s20  ;;  %4074 = vrot.lane.b32.xlu2 %v4043_v41, %s4201_s19 }
 0x478   : > { %4129 = vrot.lane.b32.xlu1 %v4028_v5, %s4203_s21  ;;  %3767 = vmatmul.msk.f32.gmra.mxu3 %vm2458_vm15, %v2470_v63 }
 0x47f   : > { %4124 = vrot.lane.b32.xlu0 %v4028_v5, %s4204_s22  ;;  %4104 = vrot.lane.b32.xlu2 %v4043_v41, %s4200_s18 }
 0x480   : > { %4139 = vrot.lane.b32.xlu1 %v4033_v30, %s4203_s21  ;;  %3768 = vmatmul.msk.f32.gmra.mxu3 %vm2458_vm15, %v2471_v31 }
 0x487   : > { %4134 = vrot.lane.b32.xlu0 %v4033_v30, %s4204_s22  ;;  %4114 = vrot.lane.b32.xlu2 %v4033_v30, %s4202_s20 }
 0x488   : > { %4159 = vrot.lane.b32.xlu1 %v4038_v50, %s4204_s22 }
 0x48f   : > { %4149 = vrot.lane.b32.xlu0 %v4038_v50, %s4202_s20  ;;  %4144 = vrot.lane.b32.xlu2 %v4028_v5, %s4198_s16 }
 0x490   : > { %4164 = vrot.lane.b32.xlu1 %v4043_v41, %s4203_s21 }
 0x497   : > { %4154 = vrot.lane.b32.xlu0 %v4043_v41, %s4204_s22  ;;  %4169 = vrot.lane.b32.xlu2 %v4038_v50, %s4203_s21  ;;  %s3886_s21 = sshll.u32 %s5327_s10, 6 }
 0x498   : > { %3405 = vperm.xlu1 %3946, %v3395_v53   ;;  %s5282_s24 = scalar_lea.vmem %s5325_s9, %s3886_s21 }
 0x49f   : > { %4184 = vrot.lane.b32.xlu0 %v4043_v41, %s4198_s16  ;;  %4174 = vrot.lane.b32.xlu2 %v4038_v50, %s4198_s16 }
 0x4a0   : > { %3420 = vperm.xlu1 %3946, %v3398_v56  }
 0x4a7   : > { %3415 = vperm.xlu0 %3905, %v3397_v7   ;;  %4179 = vrot.lane.b32.xlu2 %v4033_v30, %s4198_s16 }
 0x4a8   : > { %3435 = vperm.xlu1 %3946, %v3401_v16   ;;  %v2472_v16 = vld [vmem:[%s5323_s7 + $0x30] sm:$0xff] }
 0x4a9   : > { %3769 = vmatmul.msk.f32.gmra.mxu3 %vm2458_vm15, %v2472_v16 }
 0x4af   : > { %3430 = vperm.xlu0 %3905, %v3400_v42   ;;  %3410 = vperm.xlu2 %3947, %v3396_v32  }
 0x4b1   : > { %v4040_v39 = vpop.permute.xlu2 %4039 }
 0x4b2   : > { %v4042_v55 = vunpack.i.h.bf16 %v4040_v39  ;;  %v4041_v4 = vunpack.i.l.bf16 %v4040_v39 }
 0x4b4   : > { %v2518_v44 = vsel %vm367_vm3, %v4041_v4, %v4042_v55 }
 0x4b5   : > { %2559 = vmatpush.msra.mxu2 %v2518_v44  ;;  %v3787_v44 = vld [vmem:[%s5323_s7 + $0xc0] sm:$0xff] }
 0x4b7   : > { %3425 = vperm.xlu2 %3947, %v3399_v58  }
 0x4b9   : > { %v4035_v29 = vpop.permute.xlu1 %4034  ;;  %v4045_v6 = vpop.permute.xlu2 %4044 }
 0x4ba   : > { %v4037_v48 = vunpack.i.h.bf16 %v4035_v29  ;;  %v4036_v60 = vunpack.i.l.bf16 %v4035_v29  ;;  %v4047_v34 = vunpack.i.h.bf16 %v4045_v6  ;;  %v4046_v35 = vunpack.i.l.bf16 %v4045_v6  ;;  %v3750_v29 = vld [vmem:[%s5323_s7 + $0x58] sm:$0xff] }
 0x4bc   : > { %v2516_v47 = vsel %vm367_vm3, %v4036_v60, %v4037_v48  ;;  %v2515_v61 = vsel %vm367_vm3, %v4046_v35, %v4047_v34  ;;  %v3751_v34 = vld [vmem:[%s5323_s7 + $0x60] sm:$0xff] }
 0x4bf   : > { %3440 = vperm.xlu2 %3947, %v3402_v33  }
 0x4c1   : > { %v4030_v45 = vpop.permute.xlu0 %4029  ;;  %v4070_v23 = vpop.permute.xlu1 %4069 }
 0x4c2   : > { %v4032_v10 = vunpack.i.h.bf16 %v4030_v45  ;;  %v4031_v8 = vunpack.i.l.bf16 %v4030_v45  ;;  %v4901_v0 = vpop.permute.xlu2 %4049  ;;  %v4072_v12 = vunpack.i.h.bf16 %v4070_v23  ;;  %v4071_v57 = vunpack.i.l.bf16 %v4070_v23 }
 0x4c3   : > { %v4052_v18 = vunpack.i.h.bf16 %v4901_v0  ;;  %v4051_v5 = vunpack.i.l.bf16 %v4901_v0 }
 0x4c4   : > { %v2517_v11 = vsel %vm367_vm3, %v4031_v8, %v4032_v10  ;;  %v2786_v1 = vsel %vm541_vm4, %v4071_v57, %v4072_v12  ;;  %v3771_v10 = vld [vmem:[%s5323_s7 + $0x80] sm:$0xff]  ;;  %v2473_v8 = vld [vmem:[%s5323_s7 + $0x38] sm:$0xff] }
 0x4c5   : > { %2560 = vmatpush.msra.mxu2 %v2517_v11  ;;  %v2892_v17 = vsel %vm603_vm6, %v4051_v5, %v4052_v18  ;;  %3770 = vmatmul.msk.f32.gmra.mxu3 %vm2458_vm15, %v2473_v8  ;;  %v3774_v5 = vld [vmem:[%s5323_s7 + $0x98] sm:$0xff] }
 0x4c7   : > { %2561 = vmatpush.msra.mxu2 %v2516_v47 }
 0x4c9   : > { %v4055_v9 = vpop.permute.xlu0 %4054  ;;  %2562 = vmatpush.msra.mxu2 %v2515_v61  ;;  %v3789_v61 = vld [vmem:[%s5323_s7 + $0xd0] sm:$0xff] }
 0x4ca   : > { %v4090_v36 = vpop.permute.xlu1 %4089  ;;  %v4060_v62 = vpop.permute.xlu2 %4059  ;;  %3755 = vmatmul.msk.f32.vlgmr.msra.gmra.mxu2 %vm2458_vm15, %v3747_v19  ;;  %v4057_v14 = vunpack.i.h.bf16 %v4055_v9  ;;  %v4056_v21 = vunpack.i.l.bf16 %v4055_v9  ;;  %v3772_v19 = vld [vmem:[%s5323_s7 + $0x88] sm:$0xff] }
 0x4cb   : > { %v4092_v38 = vunpack.i.h.bf16 %v4090_v36  ;;  %v4091_v40 = vunpack.i.l.bf16 %v4090_v36  ;;  %v4062_v27 = vunpack.i.h.bf16 %v4060_v62  ;;  %v4061_v42 = vunpack.i.l.bf16 %v4060_v62  ;;  %v3752_v9 = vld [vmem:[%s5323_s7 + $0x68] sm:$0xff] }
 0x4cc   : > { %v2680_v22 = vsel %vm479_vm5, %v4056_v21, %v4057_v14 }
 0x4cd   : > { %v2681_v15 = vsel %vm479_vm5, %v4091_v40, %v4092_v38  ;;  %v2891_v6 = vsel %vm603_vm6, %v4061_v42, %v4062_v27 }
 0x4ce   : > { %2722 = vmatpush.msra.mxu0 %v2681_v15  ;;  %v3773_v15 = vld [vmem:[%s5323_s7 + $0x90] sm:$0xff] }
 0x4d0   : > { %2723 = vmatpush.msra.mxu0 %v2680_v22 }
 0x4d1   : > { %v4065_v28 = vpop.permute.xlu0 %4064 }
 0x4d2   : > { %v4067_v49 = vunpack.i.h.bf16 %v4065_v28  ;;  %v4066_v52 = vunpack.i.l.bf16 %v4065_v28  ;;  %v4095_v2 = vpop.permute.xlu1 %4094  ;;  %v4075_v30 = vpop.permute.xlu2 %4074  ;;  %3756 = vmatmul.msk.f32.gmra.mxu2 %vm2458_vm15, %v3748_v43 }
 0x4d3   : > { %v4097_v24 = vunpack.i.h.bf16 %v4095_v2  ;;  %v4096_v46 = vunpack.i.l.bf16 %v4095_v2  ;;  %v4077_v55 = vunpack.i.h.bf16 %v4075_v30  ;;  %v4076_v4 = vunpack.i.l.bf16 %v4075_v30  ;;  %v3753_v2 = vld [vmem:[%s5323_s7 + $0x70] sm:$0xff] }
 0x4d4   : > { %v2679_v37 = vsel %vm479_vm5, %v4066_v52, %v4067_v49  ;;  %v3790_v49 = vld [vmem:[%s5323_s7 + $0xd8] sm:$0xff] }
 0x4d5   : > { %2724 = vmatpush.msra.mxu0 %v2679_v37  ;;  %v2787_v51 = vsel %vm541_vm4, %v4096_v46, %v4097_v24  ;;  %v2890_v60 = vsel %vm603_vm6, %v4076_v4, %v4077_v55 }
 0x4d6   : > { %2828 = vmatpush.msra.mxu1 %v2787_v51 }
 0x4d8   : > { %2829 = vmatpush.msra.mxu1 %v2786_v1 }
 0x4d9   : > { %v4080_v13 = vpop.permute.xlu0 %4079 }
 0x4da   : > { %v4082_v20 = vunpack.i.h.bf16 %v4080_v13  ;;  %v4081_v26 = vunpack.i.l.bf16 %v4080_v13  ;;  %v4100_v50 = vpop.permute.xlu1 %4099  ;;  %v4105_v54 = vpop.permute.xlu2 %4104  ;;  %3757 = vmatmul.msk.f32.gmra.mxu2 %vm2458_vm15, %v3749_v3 }
 0x4db   : > { %v4102_v41 = vunpack.i.h.bf16 %v4100_v50  ;;  %v4101_v53 = vunpack.i.l.bf16 %v4100_v50  ;;  %v4107_v56 = vunpack.i.h.bf16 %v4105_v54  ;;  %v4106_v7 = vunpack.i.l.bf16 %v4105_v54 }
 0x4dc   : > { %v2893_v32 = vsel %vm603_vm6, %v4081_v26, %v4082_v20 }
 0x4dd   : > { %v2785_v39 = vsel %vm541_vm4, %v4101_v53, %v4102_v41  ;;  %2934 = vmatpush.msrb.mxu2 %v2893_v32  ;;  %v2784_v58 = vsel %vm541_vm4, %v4106_v7, %v4107_v56  ;;  %v3791_v41 = vld [vmem:[%s5323_s7 + $0xe0] sm:$0xff]  ;;  %v3754_v7 = vld [vmem:[%s5323_s7 + $0x78] sm:$0xff] }
 0x4de   : > { %2830 = vmatpush.msra.mxu1 %v2785_v39 }
 0x4df   : > { %2935 = vmatpush.msrb.mxu2 %v2892_v17 }
 0x4e0   : > { %2831 = vmatpush.msra.mxu1 %v2784_v58 }
 0x4e1   : > { %v4085_v59 = vpop.permute.xlu0 %4084  ;;  %2936 = vmatpush.msrb.mxu2 %v2891_v6  ;;  %3795 = vmatmul.msk.f32.vlgmr.msra.gmra.mxu1 %vm2458_vm15, %v3787_v44 }
 0x4e2   : > { %v4953_v33 = vpop.permute.xlu1 %4109  ;;  %v4087_v45 = vunpack.i.h.bf16 %v4085_v59  ;;  %v4086_v23 = vunpack.i.l.bf16 %v4085_v59  ;;  %v4955_v48 = vpop.permute.xlu2 %4114  ;;  %3758 = vmatmul.msk.f32.gmra.mxu2 %vm2458_vm15, %v3750_v29 }
 0x4e3   : > { %2937 = vmatpush.msrb.mxu2 %v2890_v60  ;;  %v4112_v42 = vunpack.i.h.bf16 %v4953_v33  ;;  %v4111_v32 = vunpack.i.l.bf16 %v4953_v33  ;;  %v4117_v59 = vunpack.i.h.bf16 %v4955_v48  ;;  %v3775_v33 = vld [vmem:[%s5323_s7 + $0xa0] sm:$0xff] }
 0x4e4   : > { %v2678_v0 = vsel %vm479_vm5, %v4086_v23, %v4087_v45  ;;  %v4116_v45 = vunpack.i.l.bf16 %v4955_v48  ;;  %v3792_v48 = vld [vmem:[%s5323_s7 + $0xe8] sm:$0xff] }
 0x4e5   : > { %2725 = vmatpush.msra.mxu0 %v2678_v0 }
 0x4e6   : > { %3779 = vmatmul.msk.f32.vlgmr.msra.gmra.mxu0 %vm2458_vm15, %v3771_v10 }
 0x4e9   : > { %v4974_v35 = vpop.permute.xlu0 %4119  ;;  %3796 = vmatmul.msk.f32.gmra.mxu1 %vm2458_vm15, %v3788_v25  ;;  %v2998_v25 = vsel %vm665_vm7, %v4111_v32, %v4112_v42  ;;  %v3857_v32 = vld [vmem:[%s5323_s7 + $0x1f0] sm:$0xff] }
 0x4ea   : > { %v4130_v11 = vpop.permute.xlu1 %4129  ;;  %v4145_v47 = vpop.permute.xlu2 %4144  ;;  %3759 = vmatmul.msk.f32.gmra.mxu2 %vm2458_vm15, %v3751_v34  ;;  %v4122_v8 = vunpack.i.h.bf16 %v4974_v35  ;;  %v4121_v0 = vunpack.i.l.bf16 %v4974_v35  ;;  %v2997_v34 = vsel %vm665_vm7, %v4116_v45, %v4117_v59  ;;  %v3819_v35 = vld [vmem:[%s5323_s7 + $0x140] sm:$0xff] }
 0x4eb   : > { %v4132_v21 = vunpack.i.h.bf16 %v4130_v11  ;;  %v4131_v38 = vunpack.i.l.bf16 %v4130_v11  ;;  %v4147_v57 = vunpack.i.h.bf16 %v4145_v47  ;;  %v4146_v24 = vunpack.i.l.bf16 %v4145_v47  ;;  %v3803_v11 = vld [vmem:[%s5323_s7 + $0x100] sm:$0xff]  ;;  %v2629_v45 = vpop.f32.mrf.mxu3 }
 0x4ed   : > { %v3104_v52 = vsel %vm727_vm8, %v4131_v38, %v4132_v21  ;;  %v3210_v53 = vsel %vm796_vm9, %v4146_v24, %v4147_v57  ;;  %v3804_v21 = vld [vmem:[%s5323_s7 + $0x108] sm:$0xff]  ;;  %v3822_v57 = vld [vmem:[%s5323_s7 + $0x158] sm:$0xff]  ;;  %v3835_v24 = vld [vmem:[%s5323_s7 + $0x180] sm:$0xff] }
 0x4ee   : > { %3780 = vmatmul.msk.f32.gmra.mxu0 %vm2458_vm15, %v3772_v19 }
 0x4f1   : > { %v4125_v36 = vpop.permute.xlu0 %4124  ;;  %3797 = vmatmul.msk.f32.gmra.mxu1 %vm2458_vm15, %v3789_v61 }
 0x4f2   : > { %v4140_v62 = vpop.permute.xlu1 %4139  ;;  %v4170_v14 = vpop.permute.xlu2 %4169  ;;  %3760 = vmatmul.msk.f32.gmra.mxu2 %vm2458_vm15, %v3752_v9  ;;  %v4127_v46 = vunpack.i.h.bf16 %v4125_v36  ;;  %v4126_v31 = vunpack.i.l.bf16 %v4125_v36  ;;  %v2996_v9 = vsel %vm665_vm7, %v4121_v0, %v4122_v8  ;;  %v3872_v8 = vld [vmem:[%s5323_s7 + $0x228] sm:$0xff] }
 0x4f3   : > { %v4172_v40 = vunpack.i.h.bf16 %v4170_v14  ;;  %v4171_v63 = vunpack.i.l.bf16 %v4170_v14  ;;  %v4142_v22 = vunpack.i.h.bf16 %v4140_v62  ;;  %v4141_v43 = vunpack.i.l.bf16 %v4140_v62  ;;  %v3776_v62 = vld [vmem:[%s5323_s7 + $0xa8] sm:$0xff]  ;;  %v3793_v14 = vld [vmem:[%s5323_s7 + $0xf0] sm:$0xff]  ;;  %v2632_v0 = vpop.f32.mrf.mxu3 }
 0x4f4   : > { %v3316_v56 = vsel %vm866_vm10, %v4126_v31, %v4127_v46  ;;  %v3852_v46 = vld [vmem:[%s5323_s7 + $0x1c8] sm:$0xff]  ;;  %v3807_v31 = vld [vmem:[%s5323_s7 + $0x120] sm:$0xff] }
 0x4f5   : > { %v3105_v28 = vsel %vm727_vm8, %v4171_v63, %v4172_v40  ;;  %v3103_v12 = vsel %vm727_vm8, %v4141_v43, %v4142_v22  ;;  %v3820_v40 = vld [vmem:[%s5323_s7 + $0x148] sm:$0xff]  ;;  %v3777_v43 = vld [vmem:[%s5323_s7 + $0xb0] sm:$0xff] }
 0x4f6   : > { %3146 = vmatpush.msrb.mxu0 %v3105_v28  ;;  %v3794_v28 = vld [vmem:[%s5323_s7 + $0xf8] sm:$0xff] }
 0x4f7   : > { %3781 = vmatmul.msk.f32.gmra.mxu0 %vm2458_vm15, %v3773_v15 }
 0x4f8   : > { %3147 = vmatpush.msrb.mxu0 %v3104_v52  ;;  %v3821_v52 = vld [vmem:[%s5323_s7 + $0x150] sm:$0xff] }
 0x4f9   : > { %v4135_v30 = vpop.permute.xlu0 %4134  ;;  %3798 = vmatmul.msk.f32.gmra.mxu1 %vm2458_vm15, %v3790_v49  ;;  %v3805_v49 = vld [vmem:[%s5323_s7 + $0x110] sm:$0xff] }
 0x4fa   : > { %v4160_v37 = vpop.permute.xlu1 %4159  ;;  %v4175_v51 = vpop.permute.xlu2 %4174  ;;  %3148 = vmatpush.msrb.mxu0 %v3103_v12  ;;  %3761 = vmatmul.msk.f32.gmra.mxu2 %vm2458_vm15, %v3753_v2  ;;  %v4137_v20 = vunpack.i.h.bf16 %v4135_v30  ;;  %v4136_v26 = vunpack.i.l.bf16 %v4135_v30  ;;  %v3778_v2 = vld [vmem:[%s5323_s7 + $0xb8] sm:$0xff]  ;;  %v3851_v30 = vld [vmem:[%s5323_s7 + $0x1c0] sm:$0xff] }
 0x4fb   : > { %v4162_v1 = vunpack.i.h.bf16 %v4160_v37  ;;  %v4161_v3 = vunpack.i.l.bf16 %v4160_v37  ;;  %v4177_v13 = vunpack.i.h.bf16 %v4175_v51  ;;  %v4176_v18 = vunpack.i.l.bf16 %v4175_v51  ;;  %v3806_v12 = vld [vmem:[%s5323_s7 + $0x118] sm:$0xff]  ;;  %v3823_v37 = vld [vmem:[%s5323_s7 + $0x160] sm:$0xff]  ;;  %v3836_v51 = vld [vmem:[%s5323_s7 + $0x188] sm:$0xff] }
 0x4fc   : > { %v3315_v27 = vsel %vm866_vm10, %v4136_v26, %v4137_v20  ;;  %v3809_v20 = vld [vmem:[%s5323_s7 + $0x130] sm:$0xff] }
 0x4fd   : > { %v3211_v50 = vsel %vm796_vm9, %v4176_v18, %v4177_v13  ;;  %v3317_v54 = vsel %vm866_vm10, %v4161_v3, %v4162_v1  ;;  %v3853_v1 = vld [vmem:[%s5323_s7 + $0x1d0] sm:$0xff]  ;;  %v3808_v3 = vld [vmem:[%s5323_s7 + $0x128] sm:$0xff] }
 0x4fe   : > { %3252 = vmatpush.msrb.mxu1 %v3211_v50  ;;  %3358 = vmatpush.msra.mxu2 %v3317_v54  ;;  %v3824_v13 = vld [vmem:[%s5323_s7 + $0x168] sm:$0xff]  ;;  %v3837_v18 = vld [vmem:[%s5323_s7 + $0x190] sm:$0xff]  ;;  %v3838_v50 = vld [vmem:[%s5323_s7 + $0x198] sm:$0xff] }
 0x4ff   : > { %3782 = vmatmul.msk.f32.gmra.mxu0 %vm2458_vm15, %v3774_v5  ;;  %v3854_v5 = vld [vmem:[%s5323_s7 + $0x1d8] sm:$0xff]  ;;  %v3825_v26 = vld [vmem:[%s5323_s7 + $0x170] sm:$0xff]  ;;  %v3855_v54 = vld [vmem:[%s5323_s7 + $0x1e0] sm:$0xff] }
 0x500   : > { %3253 = vmatpush.msrb.mxu1 %v3210_v53  ;;  %3359 = vmatpush.msra.mxu2 %v3316_v56  ;;  %v3826_v53 = vld [vmem:[%s5323_s7 + $0x178] sm:$0xff]  ;;  %v3839_v56 = vld [vmem:[%s5323_s7 + $0x1a0] sm:$0xff] }
 0x501   : > { %v4150_v16 = vpop.permute.xlu0 %4149  ;;  %3799 = vmatmul.msk.f32.gmra.mxu1 %vm2458_vm15, %v3791_v41  ;;  %v3810_v41 = vld [vmem:[%s5323_s7 + $0x138] sm:$0xff] }
 0x502   : > { %v4165_v39 = vpop.permute.xlu1 %4164  ;;  %v4152_v55 = vunpack.i.h.bf16 %v4150_v16  ;;  %v4151_v4 = vunpack.i.l.bf16 %v4150_v16  ;;  %v4180_v17 = vpop.permute.xlu2 %4179  ;;  %3360 = vmatpush.msra.mxu2 %v3315_v27  ;;  %v3867_v16 = vld [vmem:[%s5323_s7 + $0x200] sm:$0xff]  ;;  %v3840_v27 = vld [vmem:[%s5323_s7 + $0x1a8] sm:$0xff] }
 0x503   : > { %v4167_v44 = vunpack.i.h.bf16 %v4165_v39  ;;  %v4166_v58 = vunpack.i.l.bf16 %v4165_v39  ;;  %v4182_v29 = vunpack.i.h.bf16 %v4180_v17  ;;  %v4181_v6 = vunpack.i.l.bf16 %v4180_v17  ;;  %3762 = vmatmul.msk.f32.gmra.mxu2 %vm2458_vm15, %v3754_v7  ;;  %v3856_v7 = vld [vmem:[%s5323_s7 + $0x1e8] sm:$0xff]  ;;  %v3858_v17 = vld [vmem:[%s5323_s7 + $0x1f8] sm:$0xff] }
 0x504   : > { %v2999_v23 = vsel %vm665_vm7, %v4151_v4, %v4152_v55  ;;  %v3868_v39 = vld [vmem:[%s5323_s7 + $0x208] sm:$0xff]  ;;  %v3841_v55 = vld [vmem:[%s5323_s7 + $0x1b0] sm:$0xff] }
 0x505   : > { %3040 = vmatpush.msrb.mxu3 %v2999_v23  ;;  %v3102_v60 = vsel %vm727_vm8, %v4166_v58, %v4167_v44  ;;  %v3209_v10 = vsel %vm796_vm9, %v4181_v6, %v4182_v29  ;;  %v3869_v44 = vld [vmem:[%s5323_s7 + $0x210] sm:$0xff]  ;;  %v3842_v58 = vld [vmem:[%s5323_s7 + $0x1b8] sm:$0xff] }
 0x506   : > { %3149 = vmatpush.msrb.mxu0 %v3102_v60  ;;  %3254 = vmatpush.msrb.mxu1 %v3209_v10  ;;  %v3870_v6 = vld [vmem:[%s5323_s7 + $0x218] sm:$0xff] }
 0x507   : > { %3783 = vmatmul.msk.f32.gmra.mxu0 %vm2458_vm15, %v3775_v33  ;;  %3041 = vmatpush.msrb.mxu3 %v2998_v25  ;;  %v3871_v33 = vld [vmem:[%s5323_s7 + $0x220] sm:$0xff] }
 0x509   : > { %v4155_v47 = vpop.permute.xlu0 %4154  ;;  %3042 = vmatpush.msrb.mxu3 %v2997_v34  ;;  %3800 = vmatmul.msk.f32.gmra.mxu1 %vm2458_vm15, %v3792_v48 }
 0x50a   : > { %v4157_v19 = vunpack.i.h.bf16 %v4155_v47  ;;  %v4156_v61 = vunpack.i.l.bf16 %v4155_v47  ;;  %v2635_v47 = vpop.f32.mrf.mxu3 }
 0x50b   : > { %3811 = vmatmul.msk.f32.vlgmr.msrb.gmra.mxu2 %vm2458_vm15, %v3803_v11  ;;  %3043 = vmatpush.msrb.mxu3 %v2996_v9  ;;  %v3873_v11 = vld [vmem:[%s5323_s7 + $0x230] sm:$0xff]  ;;  %v3874_v9 = vld [vmem:[%s5323_s7 + $0x238] sm:$0xff] }
 0x50c   : > { %3827 = vmatmul.msk.f32.vlgmr.msrb.gmra.mxu3 %vm2458_vm15, %v3819_v35  ;;  %v3314_v36 = vsel %vm866_vm10, %v4156_v61, %v4157_v19 }
 0x50d   : > { %3361 = vmatpush.msra.mxu2 %v3314_v36 }
 0x50f   : > { %3784 = vmatmul.msk.f32.gmra.mxu0 %vm2458_vm15, %v3776_v62 }
 0x511   : > { %v4185_v38 = vpop.permute.xlu0 %4184  ;;  %3801 = vmatmul.msk.f32.gmra.mxu1 %vm2458_vm15, %v3793_v14 }
 0x512   : > { %v4187_v63 = vunpack.i.h.bf16 %v4185_v38  ;;  %v4186_v15 = vunpack.i.l.bf16 %v4185_v38  ;;  %v2638_v36 = vpop.f32.mrf.mxu3 }
 0x513   : > { %3812 = vmatmul.msk.f32.gmra.mxu2 %vm2458_vm15, %v3804_v21 }
 0x514   : > { %3828 = vmatmul.msk.f32.gmra.mxu3 %vm2458_vm15, %v3820_v40  ;;  %v3208_v22 = vsel %vm796_vm9, %v4186_v15, %v4187_v63 }
 0x515   : > { %3255 = vmatpush.msrb.mxu1 %v3208_v22 }
 0x517   : > { %3785 = vmatmul.msk.f32.gmra.mxu0 %vm2458_vm15, %v3777_v43 }
 0x519   : > { %3802 = vmatmul.msk.f32.gmra.mxu1 %vm2458_vm15, %v3794_v28 }
 0x51a   : > { %v5242_v40 = vpop.f32.mrf.mxu3 }
 0x51b   : > { %3813 = vmatmul.msk.f32.gmra.mxu2 %vm2458_vm15, %v3805_v49 }
 0x51c   : > { %3829 = vmatmul.msk.f32.gmra.mxu3 %vm2458_vm15, %v3821_v52 }
 0x51f   : > { %3786 = vmatmul.msk.f32.gmra.mxu0 %vm2458_vm15, %v3778_v2 }
 0x521   : > { %3859 = vmatmul.msk.f32.vlgmr.msrb.gmra.mxu1 %vm2458_vm15, %v3851_v30 }
 0x522   : > { %v5248_v43 = vpop.f32.mrf.mxu3 }
 0x523   : > { %3814 = vmatmul.msk.f32.gmra.mxu2 %vm2458_vm15, %v3806_v12 }
 0x524   : > { %3830 = vmatmul.msk.f32.gmra.mxu3 %vm2458_vm15, %v3822_v57 }
 0x527   : > { %3843 = vmatmul.msk.f32.vlgmr.msrb.gmra.mxu0 %vm2458_vm15, %v3835_v24 }
 0x529   : > { %3860 = vmatmul.msk.f32.gmra.mxu1 %vm2458_vm15, %v3852_v46 }
 0x52b   : > { %3815 = vmatmul.msk.f32.gmra.mxu2 %vm2458_vm15, %v3807_v31 }
 0x52c   : > { %3831 = vmatmul.msk.f32.gmra.mxu3 %vm2458_vm15, %v3823_v37  ;;  %v5254_v2 = vpop.f32.mrf.mxu3 }
 0x52f   : > { %3844 = vmatmul.msk.f32.gmra.mxu0 %vm2458_vm15, %v3836_v51 }
 0x531   : > { %3861 = vmatmul.msk.f32.gmra.mxu1 %vm2458_vm15, %v3853_v1 }
 0x533   : > { %3816 = vmatmul.msk.f32.gmra.mxu2 %vm2458_vm15, %v3808_v3 }
 0x534   : > { %3832 = vmatmul.msk.f32.gmra.mxu3 %vm2458_vm15, %v3824_v13 }
 0x537   : > { %3845 = vmatmul.msk.f32.gmra.mxu0 %vm2458_vm15, %v3837_v18 }
 0x539   : > { %3862 = vmatmul.msk.f32.gmra.mxu1 %vm2458_vm15, %v3854_v5 }
 0x53b   : > { %3817 = vmatmul.msk.f32.gmra.mxu2 %vm2458_vm15, %v3809_v20 }
 0x53c   : > { %3833 = vmatmul.msk.f32.gmra.mxu3 %vm2458_vm15, %v3825_v26 }
 0x53f   : > { %3846 = vmatmul.msk.f32.gmra.mxu0 %vm2458_vm15, %v3838_v50 }
 0x541   : > { %3863 = vmatmul.msk.f32.gmra.mxu1 %vm2458_vm15, %v3855_v54 }
 0x543   : > { %3818 = vmatmul.msk.f32.gmra.mxu2 %vm2458_vm15, %v3810_v41 }
 0x544   : > { %3834 = vmatmul.msk.f32.gmra.mxu3 %vm2458_vm15, %v3826_v53 }
 0x547   : > { %3847 = vmatmul.msk.f32.gmra.mxu0 %vm2458_vm15, %v3839_v56 }
 0x548   : > { %v5260_v24 = vpop.f32.mrf.mxu3 }
 0x549   : > { %3864 = vmatmul.msk.f32.gmra.mxu1 %vm2458_vm15, %v3856_v7 }
 0x54b   : > { %3875 = vmatmul.msk.f32.vlgmr.msra.gmra.mxu2 %vm2458_vm15, %v3867_v16 }
 0x54d   : > { %v5179_v42 = vpop.f32.mrf.mxu2 }
 0x54e   : > { %v2630_v13 = vadd.f32 %v2629_v45, %v5179_v42 }
 0x54f   : > { %3848 = vmatmul.msk.f32.gmra.mxu0 %vm2458_vm15, %v3840_v27 }
 0x551   : > { %3865 = vmatmul.msk.f32.gmra.mxu1 %vm2458_vm15, %v3857_v32 }
 0x553   : > { %3876 = vmatmul.msk.f32.gmra.mxu2 %vm2458_vm15, %v3868_v39 }
 0x555   : > { %v5193_v4 = vpop.f32.mrf.mxu2 }
 0x556   : > { %v2633_v41 = vadd.f32 %v2632_v0, %v5193_v4  ;;  %v3406_v4 = vpop.permute.xlu1 %3405 }
 0x557   : > { %3849 = vmatmul.msk.f32.gmra.mxu0 %vm2458_vm15, %v3841_v55 }
 0x559   : > { %3866 = vmatmul.msk.f32.gmra.mxu1 %vm2458_vm15, %v3858_v17 }
 0x55b   : > { %3877 = vmatmul.msk.f32.gmra.mxu2 %vm2458_vm15, %v3869_v44 }
 0x55d   : > { %v5207_v29 = vpop.f32.mrf.mxu2 }
 0x55e   : > { %v2833_v60 = vpop.f32.mrf.mxu1  ;;  %v2636_v42 = vadd.f32 %v2635_v47, %v5207_v29 }
 0x55f   : > { %3850 = vmatmul.msk.f32.gmra.mxu0 %vm2458_vm15, %v3842_v58 }
 0x563   : > { %3878 = vmatmul.msk.f32.gmra.mxu2 %vm2458_vm15, %v3870_v6  ;;  %v2727_v23 = vpop.f32.mrf.mxu0 }
 0x564   : > { %v2751_v5 = vadd.f32 %v2727_v23, %v2630_v13 }
 0x565   : > { %v5214_v59 = vpop.f32.mrf.mxu2 }
 0x566   : > { %v2836_v34 = vpop.f32.mrf.mxu1  ;;  %v2857_v50 = vadd.f32 %v2833_v60, %v2751_v5 }
 0x56b   : > { %3879 = vmatmul.msk.f32.gmra.mxu2 %vm2458_vm15, %v3871_v33  ;;  %v2730_v25 = vpop.f32.mrf.mxu0 }
 0x56c   : > { %v2752_v56 = vadd.f32 %v2730_v25, %v2633_v41 }
 0x56d   : > { %v5220_v10 = vpop.f32.mrf.mxu2 }
 0x56e   : > { %v2839_v61 = vpop.f32.mrf.mxu1  ;;  %v2858_v32 = vadd.f32 %v2836_v34, %v2752_v56  ;;  %v2642_v5 = vadd.f32 %v5242_v40, %v5220_v10 }
 0x573   : > { %3880 = vmatmul.msk.f32.gmra.mxu2 %vm2458_vm15, %v3872_v8 }
 0x574   : > { %v2733_v35 = vpop.f32.mrf.mxu0 }
 0x575   : > { %v5226_v48 = vpop.f32.mrf.mxu2  ;;  %v2753_v58 = vadd.f32 %v2733_v35, %v2636_v42 }
 0x576   : > { %v5240_v21 = vpop.f32.mrf.mxu1  ;;  %v2645_v10 = vadd.f32 %v5248_v43, %v5226_v48 }
 0x577   : > { %v2859_v8 = vadd.f32 %v2839_v61, %v2753_v58 }
 0x57b   : > { %3881 = vmatmul.msk.f32.gmra.mxu2 %vm2458_vm15, %v3873_v11  ;;  %v2639_v11 = vadd.f32 %v2638_v36, %v5214_v59  ;;  %v3411_v59 = vpop.permute.xlu2 %3410 }
 0x57c   : > { %v2736_v62 = vpop.f32.mrf.mxu0 }
 0x57d   : > { %v5232_v19 = vpop.f32.mrf.mxu2  ;;  %v2754_v35 = vadd.f32 %v2736_v62, %v2639_v11 }
 0x57e   : > { %v5246_v15 = vpop.f32.mrf.mxu1 }
 0x57f   : > { %v2860_v36 = vadd.f32 %v5240_v21, %v2754_v35  ;;  %v3416_v21 = vpop.permute.xlu0 %3415 }
 0x583   : > { %3882 = vmatmul.msk.f32.gmra.mxu2 %vm2458_vm15, %v3874_v9  ;;  %v3426_v35 = vpop.permute.xlu2 %3425 }
 0x584   : > { %v5244_v63 = vpop.f32.mrf.mxu0 }
 0x586   : > { %v5238_v14 = vpop.f32.mrf.mxu2  ;;  %v5252_v49 = vpop.f32.mrf.mxu1 }
 0x58c   : > { %v5250_v28 = vpop.f32.mrf.mxu0 }
 0x58e   : > { %v2939_v38 = vpop.f32.mrf.mxu2  ;;  %v5258_v57 = vpop.f32.mrf.mxu1 }
 0x58f   : > { %v3045_v51 = vpop.f32.mrf.mxu3  ;;  %v2963_v53 = vadd.f32 %v2939_v38, %v2857_v50  ;;  %v2755_v50 = vadd.f32 %v5244_v63, %v2642_v5 }
 0x591   : > { %v3069_v27 = vadd.f32 %v3045_v51, %v2963_v53 }
 0x594   : > { %v5256_v30 = vpop.f32.mrf.mxu0 }
 0x596   : > { %v2942_v22 = vpop.f32.mrf.mxu2  ;;  %v5266_v37 = vpop.f32.mrf.mxu1 }
 0x597   : > { %v3048_v26 = vpop.f32.mrf.mxu3  ;;  %v2964_v17 = vadd.f32 %v2942_v22, %v2858_v32 }
 0x599   : > { %v3070_v23 = vadd.f32 %v3048_v26, %v2964_v17  ;;  %v2756_v17 = vadd.f32 %v5250_v28, %v2645_v10  ;;  %v3441_v10 = vpop.permute.xlu2 %3440 }
 0x59c   : > { %v5262_v46 = vpop.f32.mrf.mxu0 }
 0x59e   : > { %v2945_v52 = vpop.f32.mrf.mxu2  ;;  %v3257_v18 = vpop.f32.mrf.mxu1 }
 0x59f   : > { %v3051_v55 = vpop.f32.mrf.mxu3  ;;  %v2965_v34 = vadd.f32 %v2945_v52, %v2859_v8 }
 0x5a1   : > { %v3071_v51 = vadd.f32 %v3051_v55, %v2965_v34 }
 0x5a4   : > { %v3151_v3 = vpop.f32.mrf.mxu0 }
 0x5a5   : > { %v3175_v39 = vadd.f32 %v3151_v3, %v3069_v27 }
 0x5a6   : > { %v2948_v12 = vpop.f32.mrf.mxu2  ;;  %v3260_v7 = vpop.f32.mrf.mxu1 }
 0x5a7   : > { %v3281_v6 = vadd.f32 %v3257_v18, %v3175_v39  ;;  %v3054_v47 = vpop.f32.mrf.mxu3  ;;  %v2966_v26 = vadd.f32 %v2948_v12, %v2860_v36  ;;  %v2861_v39 = vadd.f32 %v5246_v15, %v2755_v50  ;;  %v3421_v15 = vpop.permute.xlu1 %3420 }
 0x5ac   : > { %v3154_v54 = vpop.f32.mrf.mxu0 }
 0x5ad   : > { %v3176_v0 = vadd.f32 %v3154_v54, %v3070_v23 }
 0x5ae   : > { %v5264_v31 = vpop.f32.mrf.mxu2  ;;  %v3263_v60 = vpop.f32.mrf.mxu1 }
 0x5af   : > { %v3282_v9 = vadd.f32 %v3260_v7, %v3176_v0  ;;  %v3057_v53 = vpop.f32.mrf.mxu3  ;;  %v3072_v7 = vadd.f32 %v3054_v47, %v2966_v26  ;;  %v2967_v40 = vadd.f32 %v5264_v31, %v2861_v39  ;;  %v2648_v31 = vadd.f32 %v5254_v2, %v5232_v19 }
 0x5b0   : > { %v2651_v2 = vadd.f32 %v5260_v24, %v5238_v14 }
 0x5b1   : > { %v2757_v0 = vadd.f32 %v5256_v30, %v2648_v31 }
 0x5b4   : > { %v3157_v44 = vpop.f32.mrf.mxu0 }
 0x5b5   : > { %v3177_v52 = vadd.f32 %v3157_v44, %v3071_v51  ;;  %v2758_v51 = vadd.f32 %v5262_v46, %v2651_v2 }
 0x5b6   : > { %v5268_v1 = vpop.f32.mrf.mxu2  ;;  %v3266_v18 = vpop.f32.mrf.mxu1 }
 0x5b7   : > { %v3283_v54 = vadd.f32 %v3263_v60, %v3177_v52  ;;  %v2864_v5 = vadd.f32 %v5266_v37, %v2758_v51 }
 0x5bc   : > { %v3160_v22 = vpop.f32.mrf.mxu0 }
 0x5bd   : > { %v3178_v55 = vadd.f32 %v3160_v22, %v3072_v7  ;;  %v3436_v7 = vpop.permute.xlu1 %3435 }
 0x5be   : > { %v5271_v20 = vpop.f32.mrf.mxu2  ;;  %v3269_v12 = vpop.f32.mrf.mxu1 }
 0x5bf   : > { %v3284_v44 = vadd.f32 %v3266_v18, %v3178_v55 }
 0x5c4   : > { %v3163_v32 = vpop.f32.mrf.mxu0 }
 0x5c6   : > { %v5274_v16 = vpop.f32.mrf.mxu2  ;;  %v3272_v34 = vpop.f32.mrf.mxu1 }
 0x5c7   : > { %v2970_v24 = vadd.f32 %v5274_v16, %v2864_v5 }
 0x5cc   : > { %v3166_v43 = vpop.f32.mrf.mxu0 }
 0x5ce   : > { %v3363_v45 = vpop.f32.mrf.mxu2  ;;  %v3275_v18 = vpop.f32.mrf.mxu1 }
 0x5cf   : > { %v3387_v33 = vadd.f32 %v3363_v45, %v3281_v6  ;;  %v3073_v45 = vadd.f32 %v3057_v53, %v2967_v40 }
 0x5d1   : > { %v3443_v25 = vadd.f32 %v3406_v4, %v3387_v33  ;;  %v3060_v33 = vpop.f32.mrf.mxu3  ;;  %v2862_v4 = vadd.f32 %v5252_v49, %v2756_v17  ;;  %v3179_v60 = vadd.f32 %v3163_v32, %v3073_v45 }
 0x5d3   : > { %vm3451_vm3 = vcmp.ge.f32.partialorder %v3443_v25, 0.0  ;;  %v3459_v29 = vmul.f32 0.01, %v3443_v25  ;;  %v2968_v8 = vadd.f32 %v5268_v1, %v2862_v4 }
 0x5d5   : > { %v3467_v38 = vsel %vm3451_vm3, %v3443_v25, %v3459_v29  ;;  %v3285_v25 = vadd.f32 %v3269_v12, %v3179_v60  ;;  %v3074_v47 = vadd.f32 %v3060_v33, %v2968_v8 }
 0x5d6   : > { %3475 = vst [vmem:[%s5282_s24] sm:$0xff] %v3467_v38  ;;  %v3366_v61 = vpop.f32.mrf.mxu2  ;;  %v3278_v37 = vpop.f32.mrf.mxu1 }
 0x5d7   : > { %v3388_v3 = vadd.f32 %v3366_v61, %v3282_v9  ;;  %v2863_v9 = vadd.f32 %v5258_v57, %v2757_v0  ;;  %v3180_v38 = vadd.f32 %v3166_v43, %v3074_v47  ;;  %v3169_v61 = vpop.f32.mrf.mxu0 }
 0x5d9   : > { %v3444_v13 = vadd.f32 %v3411_v59, %v3388_v3  ;;  %v3063_v19 = vpop.f32.mrf.mxu3  ;;  %v2969_v1 = vadd.f32 %v5271_v20, %v2863_v9  ;;  %v3286_v3 = vadd.f32 %v3272_v34, %v3180_v38 }
 0x5db   : > { %vm3452_vm4 = vcmp.ge.f32.partialorder %v3444_v13, 0.0  ;;  %v3460_v62 = vmul.f32 0.01, %v3444_v13  ;;  %v3075_v52 = vadd.f32 %v3063_v19, %v2969_v1 }
 0x5dd   : > { %v3468_v41 = vsel %vm3452_vm4, %v3444_v13, %v3460_v62  ;;  %v3431_v13 = vpop.permute.xlu0 %3430  ;;  %v3181_v26 = vadd.f32 %v3169_v61, %v3075_v52 }
 0x5de   : > { %3476 = vst [vmem:[%s5282_s24 + $0x8] sm:$0xff] %v3468_v41  ;;  %v3369_v56 = vpop.f32.mrf.mxu2 }
 0x5df   : > { %v3389_v27 = vadd.f32 %v3369_v56, %v3283_v54  ;;  %v3287_v46 = vadd.f32 %v3275_v18, %v3181_v26  ;;  %v3172_v54 = vpop.f32.mrf.mxu0 }
 0x5e1   : > { %v3445_v42 = vadd.f32 %v3416_v21, %v3389_v27  ;;  %v3066_v62 = vpop.f32.mrf.mxu3 }
 0x5e2   : > { %v3076_v53 = vadd.f32 %v3066_v62, %v2970_v24 }
 0x5e3   : > { %vm3453_vm5 = vcmp.ge.f32.partialorder %v3445_v42, 0.0  ;;  %v3461_v63 = vmul.f32 0.01, %v3445_v42 }
 0x5e4   : > { %v3182_v27 = vadd.f32 %v3172_v54, %v3076_v53 }
 0x5e5   : > { %v3469_v58 = vsel %vm3453_vm5, %v3445_v42, %v3461_v63 }
 0x5e6   : > { %3477 = vst [vmem:[%s5282_s24 + $0x10] sm:$0xff] %v3469_v58  ;;  %v3372_v6 = vpop.f32.mrf.mxu2  ;;  %v3288_v39 = vadd.f32 %v3278_v37, %v3182_v27 }
 0x5e7   : > { %v3390_v23 = vadd.f32 %v3372_v6, %v3284_v44 }
 0x5e9   : > { %v3446_v48 = vadd.f32 %v3421_v15, %v3390_v23 }
 0x5eb   : > { %vm3454_vm6 = vcmp.ge.f32.partialorder %v3446_v48, 0.0  ;;  %v3462_v28 = vmul.f32 0.01, %v3446_v48 }
 0x5ed   : > { %v3470_v11 = vsel %vm3454_vm6, %v3446_v48, %v3462_v28 }
 0x5ee   : > { %3478 = vst [vmem:[%s5282_s24 + $0x18] sm:$0xff] %v3470_v11  ;;  %v3375_v29 = vpop.f32.mrf.mxu2 }
 0x5ef   : > { %v3391_v49 = vadd.f32 %v3375_v29, %v3285_v25 }
 0x5f1   : > { %v3447_v22 = vadd.f32 %v3426_v35, %v3391_v49 }
 0x5f3   : > { %vm3455_vm7 = vcmp.ge.f32.partialorder %v3447_v22, 0.0  ;;  %v3463_v30 = vmul.f32 0.01, %v3447_v22 }
 0x5f5   : > { %v3471_v59 = vsel %vm3455_vm7, %v3447_v22, %v3463_v30 }
 0x5f6   : > { %3479 = vst [vmem:[%s5282_s24 + $0x20] sm:$0xff] %v3471_v59  ;;  %v3378_v36 = vpop.f32.mrf.mxu2 }
 0x5f7   : > { %v3392_v57 = vadd.f32 %v3378_v36, %v3286_v3 }
 0x5f9   : > { %v3448_v14 = vadd.f32 %v3431_v13, %v3392_v57 }
 0x5fb   : > { %vm3456_vm8 = vcmp.ge.f32.partialorder %v3448_v14, 0.0  ;;  %v3464_v20 = vmul.f32 0.01, %v3448_v14 }
 0x5fd   : > { %v3472_v50 = vsel %vm3456_vm8, %v3448_v14, %v3464_v20 }
 0x5fe   : > { %3480 = vst [vmem:[%s5282_s24 + $0x28] sm:$0xff] %v3472_v50  ;;  %v3381_v41 = vpop.f32.mrf.mxu2 }
 0x5ff   : > { %v3393_v56 = vadd.f32 %v3381_v41, %v3287_v46 }
 0x601   : > { %v3449_v21 = vadd.f32 %v3436_v7, %v3393_v56 }
 0x603   : > { %vm3457_vm9 = vcmp.ge.f32.partialorder %v3449_v21, 0.0  ;;  %v3465_v32 = vmul.f32 0.01, %v3449_v21 }
 0x605   : > { %v3473_v16 = vsel %vm3457_vm9, %v3449_v21, %v3465_v32 }
 0x606   : > { %3481 = vst [vmem:[%s5282_s24 + $0x30] sm:$0xff] %v3473_v16  ;;  %v3384_v55 = vpop.f32.mrf.mxu2 }
 0x607   : > { %v3394_v42 = vadd.f32 %v3384_v55, %v3288_v39 }
 0x609   : > { %v3450_v40 = vadd.f32 %v3441_v10, %v3394_v42 }
 0x60b   : > { %vm3458_vm10 = vcmp.ge.f32.partialorder %v3450_v40, 0.0  ;;  %v3466_v63 = vmul.f32 0.01, %v3450_v40 }
 0x60d   : > { %v3474_v12 = vsel %vm3458_vm10, %v3450_v40, %v3466_v63 }
 0x60e   : > { %3482 = vst [vmem:[%s5282_s24 + $0x38] sm:$0xff] %v3474_v12 }
 0x60f PF: > { %s19_s30 = sadd.s32 1, %s4194_s30  }
 0x610   : > { %p16_p4 = scmp.ge.s32.totalorder %s19_s30, 4  }
 0x612   :  { %18 = sbr.rel (!%p16_p4) target bundleno = 1 (0x1), region = 120 }

</bundles_post_ra>
